<compile_context>
chip_gen: v5e
topology: v5e:2x2
jax: 0.10.0
libtpu: 0.0.40
codegen_flags: <defaults>
</compile_context>

<pallas_src>
import functools
import math

import jax
import jax.numpy as jnp
from jax.experimental import pallas as pl
from jax.experimental.pallas import tpu as pltpu


_EPS = 1e-5
_VMEM_LIMIT = 32 * 1024 * 1024  # default scoped limit on v6e/v7x; safe on v5e too


def _bytes(*arrays):
    return int(sum(int(a.size) * a.dtype.itemsize for a in arrays))


def _layer_norm(x, g, b, eps):
    """x: (M, D) f32; g/b: (1, D) f32. LayerNorm over the last dim (f32 stats)."""
    mu = jnp.mean(x, axis=-1, keepdims=True)
    var = jnp.mean(jnp.square(x - mu), axis=-1, keepdims=True)
    return (x - mu) * jax.lax.rsqrt(var + eps) * g + b


# --------------------------- fused attention kernel ---------------------------

def _fused_attn_kernel(qsrc_ref, qpos_ref, kvsrc_ref, kpos_ref,
                       wq_ref, bq_ref, wk_ref, bk_ref, wv_ref, bv_ref,
                       wo_ref, bo_ref, g_ref, b_ref, o_ref,
                       *, nhead, scale, eps, mdt):
    """One batch element per grid step: LN(qsrc + MHA(qsrc+qpos, kvsrc+kpos, kvsrc))."""
    x = qsrc_ref[0].astype(jnp.float32)                  # (Lq, D) residual source
    q_in = x + qpos_ref[0].astype(jnp.float32)           # (Lq, D)
    kv = kvsrc_ref[0].astype(jnp.float32)                # (Lk, D)
    k_in = kv + kpos_ref[0].astype(jnp.float32)          # (Lk, D)

    def proj(a, w_r, bias_r):
        return (jnp.dot(a.astype(mdt), w_r[...].astype(mdt),
                        preferred_element_type=jnp.float32)
                + bias_r[...].astype(jnp.float32))

    q = proj(q_in, wq_ref, bq_ref)                       # (Lq, D)
    k = proj(k_in, wk_ref, bk_ref)                       # (Lk, D)
    v = proj(kv,   wv_ref, bv_ref)                       # (Lk, D)

    d_model = q.shape[-1]
    dh = d_model // nhead
    wo = wo_ref[...].astype(jnp.float32)

    attn = None
    for h in range(nhead):                               # static unroll over heads
        sl = slice(h * dh, (h + 1) * dh)
        qh, kh, vh = q[:, sl], k[:, sl], v[:, sl]
        s = jax.lax.dot_general(qh.astype(mdt), kh.astype(mdt),
                                (((1,), (1,)), ((), ())),
                                preferred_element_type=jnp.float32) * scale
        m = jnp.max(s, axis=-1, keepdims=True)
        p = jnp.exp(s - m)
        l = jnp.sum(p, axis=-1, keepdims=True)
        oh = jnp.dot(p.astype(mdt), vh.astype(mdt),
                     preferred_element_type=jnp.float32)       # (Lq, dh)
        # Deferred softmax normalization: scale the small (Lq, dh) output instead
        # of the (Lq, Lk) probabilities; reciprocal runs on the EUP slot.
        oh = oh * pl.reciprocal(l, approx=True)
        # Output projection folded per head: (Lq, dh) @ (dh, D).
        contrib = jnp.dot(oh.astype(mdt), wo[sl, :].astype(mdt),
                          preferred_element_type=jnp.float32)
        attn = contrib if attn is None else attn + contrib

    y = x + attn + bo_ref[...].astype(jnp.float32)       # residual + out-proj bias
    y = _layer_norm(y, g_ref[...].astype(jnp.float32),
                    b_ref[...].astype(jnp.float32), eps)
    o_ref[0] = y.astype(o_ref.dtype)


def fused_attention(qsrc, qpos, kvsrc, kpos, p, ln, nhead, mdt):
    """qsrc/qpos: (B, Lq, D); kvsrc/kpos: (B, Lk, D) -> LN(qsrc + MHA): (B, Lq, D)."""
    B, Lq, D = qsrc.shape
    Lk = kvsrc.shape[1]
    dh = D // nhead
    row = lambda v: v.reshape(1, -1)

    args = (qsrc, qpos, kvsrc, kpos,
            p["wq"], row(p["bq"]), p["wk"], row(p["bk"]),
            p["wv"], row(p["bv"]), p["wo"], row(p["bo"]),
            row(ln["g"]), row(ln["b"]))

    def act_spec(L):
        return pl.BlockSpec((1, L, D), lambda b: (b, 0, 0))

    def full_spec(shape):
        return pl.BlockSpec(shape, lambda b: (0,) * len(shape))

    in_specs = [act_spec(Lq), act_spec(Lq), act_spec(Lk), act_spec(Lk)]
    in_specs += [full_spec(a.shape) for a in args[4:]]

    flops = int(B * (2 * Lq * D * D        # q projection
                     + 4 * Lk * D * D      # k and v projections
                     + 4 * Lq * Lk * D     # scores + PV over all heads
                     + 2 * Lq * D * D))    # output projection
    transc = int(B * nhead * Lq * Lk + 2 * B * Lq)
    cost = pl.CostEstimate(flops=flops, transcendentals=transc,
                           bytes_accessed=_bytes(*args) + _bytes(qsrc))

    return pl.pallas_call(
        functools.partial(_fused_attn_kernel, nhead=nhead,
                          scale=1.0 / math.sqrt(dh), eps=_EPS, mdt=mdt),
        out_shape=jax.ShapeDtypeStruct((B, Lq, D), qsrc.dtype),
        grid=(B,),
        in_specs=in_specs,
        out_specs=act_spec(Lq),
        compiler_params=pltpu.CompilerParams(
            dimension_semantics=("parallel",),
            vmem_limit_bytes=_VMEM_LIMIT),
        cost_estimate=cost,
    )(*args)


# ------------------------------ fused FFN kernel ------------------------------

def _fused_ffn_kernel(x_ref, w1_ref, b1_ref, w2_ref, b2_ref,
                      g3_ref, b3_ref, gf_ref, bf_ref, o_ref, n_ref, *, eps, mdt):
    x = x_ref[0].astype(jnp.float32)                      # (Lq, D)
    h = (jnp.dot(x.astype(mdt), w1_ref[...].astype(mdt),
                 preferred_element_type=jnp.float32)
         + b1_ref[...].astype(jnp.float32))
    h = jnp.maximum(h, 0.0)                               # ReLU
    y = (jnp.dot(h.astype(mdt), w2_ref[...].astype(mdt),
                 preferred_element_type=jnp.float32)
         + b2_ref[...].astype(jnp.float32))
    z = _layer_norm(x + y, g3_ref[...].astype(jnp.float32),
                    b3_ref[...].astype(jnp.float32), eps)
    o_ref[0] = z.astype(o_ref.dtype)
    # Decoder-level final norm fused here (used for return_intermediate and as
    # the final output of the last layer) — no extra LayerNorm pallas_call.
    n = _layer_norm(z, gf_ref[...].astype(jnp.float32),
                    bf_ref[...].astype(jnp.float32), eps)
    n_ref[0] = n.astype(n_ref.dtype)


def fused_ffn(x, p, norm, mdt):
    """x: (B, Lq, D) -> (carry, final_normed), both (B, Lq, D)."""
    B, Lq, D = x.shape
    F = p["w1"].shape[1]
    row = lambda v: v.reshape(1, -1)
    args = (x, p["w1"], row(p["b1"]), p["w2"], row(p["b2"]),
            row(p["ln3"]["g"]), row(p["ln3"]["b"]), row(norm["g"]), row(norm["b"]))

    act_spec = pl.BlockSpec((1, Lq, D), lambda b: (b, 0, 0))

    def full_spec(shape):
        return pl.BlockSpec(shape, lambda b: (0,) * len(shape))

    in_specs = [act_spec] + [full_spec(a.shape) for a in args[1:]]

    cost = pl.CostEstimate(flops=int(4 * B * Lq * D * F),
                           transcendentals=int(4 * B * Lq),
                           bytes_accessed=_bytes(*args) + 2 * _bytes(x))

    return pl.pallas_call(
        functools.partial(_fused_ffn_kernel, eps=_EPS, mdt=mdt),
        out_shape=(jax.ShapeDtypeStruct((B, Lq, D), x.dtype),
                   jax.ShapeDtypeStruct((B, Lq, D), x.dtype)),
        grid=(B,),
        in_specs=in_specs,
        out_specs=(act_spec, act_spec),
        compiler_params=pltpu.CompilerParams(
            dimension_semantics=("parallel",),
            vmem_limit_bytes=_VMEM_LIMIT),
        cost_estimate=cost,
    )(*args)


# ----------------------------- Model components ------------------------------

def decoder_layer(output, memory_b, qpos_b, mpos_b, p, norm, nhead, mdt):
    # self-attention: q = k = output + querypos, v = output
    output = fused_attention(output, qpos_b, output, qpos_b,
                             p["sa"], p["ln1"], nhead, mdt)
    # cross-attention: q = output + querypos, k = memory + memorypos, v = memory
    output = fused_attention(output, qpos_b, memory_b, mpos_b,
                             p["ca"], p["ln2"], nhead, mdt)
    # feed-forward (+ LN3 + fused decoder final norm)
    output, normed = fused_ffn(output, p, norm, mdt)
    return output, normed


def transformer_decoder(tgt, memory, reference, querypos, memorypos, params, nhead,
                        return_intermediate=False, matmul_dtype=jnp.float32):
    """Mirrors PICAM TransformerDecoder.forward semantics.

    tgt/querypos: (Lq, B, D); memory/memorypos: (Lk, B, D); reference: (Lq, B, 2).
    """
    del reference  # TODO(synk): see header note — PICAM decoder_layer not provided.
    Lq, B, D = tgt.shape

    # One-time layout change to batch-leading (B, L, D).
    output = jnp.transpose(tgt, (1, 0, 2))
    memory_b = jnp.transpose(memory, (1, 0, 2))
    qpos_b = jnp.transpose(querypos, (1, 0, 2))
    mpos_b = jnp.transpose(memorypos, (1, 0, 2))

    norm = params["norm"]
    if norm is None:
        norm = {"g": jnp.ones((D,), output.dtype), "b": jnp.zeros((D,), output.dtype)}

    intermediate = []
    normed = output
    for p in params["layers"]:
        output, normed = decoder_layer(output, memory_b, qpos_b, mpos_b,
                                       p, norm, nhead, matmul_dtype)
        if return_intermediate:
            intermediate.append(normed)

    if params["norm"] is not None:
        output = normed  # final norm of the last layer, already computed in-kernel

    if return_intermediate:
        # each entry is (B, Lq, D) -> stack as (num_layers, Lq, B, D)
        return jnp.stack([jnp.transpose(x, (1, 0, 2)) for x in intermediate])
    return jnp.transpose(output, (1, 0, 2))


# ------------------------------- Param init ---------------------------------

def init_params(key, num_layers, d_model, nhead, dim_ff):
    scale = 0.02

    def dense(k, din, dout):
        return jax.random.normal(k, (din, dout), jnp.float32) * scale

    def mha_params(k):
        ks = jax.random.split(k, 4)
        return {
            "wq": dense(ks[0], d_model, d_model), "bq": jnp.zeros((d_model,), jnp.float32),
            "wk": dense(ks[1], d_model, d_model), "bk": jnp.zeros((d_model,), jnp.float32),
            "wv": dense(ks[2], d_model, d_model), "bv": jnp.zeros((d_model,), jnp.float32),
            "wo": dense(ks[3], d_model, d_model), "bo": jnp.zeros((d_model,), jnp.float32),
        }

    def ln_params():
        return {"g": jnp.ones((d_model,), jnp.float32),
                "b": jnp.zeros((d_model,), jnp.float32)}

    layers = []
    keys = jax.random.split(key, num_layers + 1)
    for lk in keys[:num_layers]:
        k_sa, k_ca, k_ff1, k_ff2 = jax.random.split(lk, 4)
        layers.append({
            "sa": mha_params(k_sa),
            "ca": mha_params(k_ca),
            "w1": dense(k_ff1, d_model, dim_ff), "b1": jnp.zeros((dim_ff,), jnp.float32),
            "w2": dense(k_ff2, dim_ff, d_model), "b2": jnp.zeros((d_model,), jnp.float32),
            "ln1": ln_params(), "ln2": ln_params(), "ln3": ln_params(),
        })
    return {"layers": layers, "norm": ln_params()}


# ---------------------------------- Main -------------------------------------

if __name__ == "__main__":
    num_layers = 2
    d_model = 32
    nhead = 4
    dim_ff = 64
    Lq, Lk, B = 8, 16, 2   # num queries, memory length, batch

    root = jax.random.PRNGKey(0)
    k_p, k_t, k_m, k_r, k_qp, k_mp = jax.random.split(root, 6)

    params = init_params(k_p, num_layers, d_model, nhead, dim_ff)

    tgt = jax.random.normal(k_t, (Lq, B, d_model), jnp.float32)
    memory = jax.random.normal(k_m, (Lk, B, d_model), jnp.float32)
    reference = jax.random.normal(k_r, (Lq, B, 2), jnp.float32)
    querypos = jax.random.normal(k_qp, (Lq, B, d_model), jnp.float32)
    memorypos = jax.random.normal(k_mp, (Lk, B, d_model), jnp.float32)

    run_inter = jax.jit(functools.partial(transformer_decoder, nhead=nhead,
                                          return_intermediate=True))
    out = jax.block_until_ready(run_inter(tgt, memory, reference, querypos,
                                          memorypos, params))
    assert out.shape == (num_layers, Lq, B, d_model), out.shape
    assert bool(jnp.all(jnp.isfinite(out)))

    run_final = jax.jit(functools.partial(transformer_decoder, nhead=nhead,
                                          return_intermediate=False))
    final = jax.block_until_ready(run_final(tgt, memory, reference, querypos,
                                            memorypos, params))
    assert final.shape == (Lq, B, d_model), final.shape
    assert bool(jnp.all(jnp.isfinite(final)))

    print("KERNEL_OK")
</pallas_src>

<mosaic_0001>
module attributes {stable_mosaic.version = 11 : i64} {
  func.func @_fused_attn_kernel(%arg0: i32, %arg1: memref<1x8x32xf32, #tpu.memory_space<vmem>>, %arg2: memref<1x8x32xf32, #tpu.memory_space<vmem>>, %arg3: memref<1x16x32xf32, #tpu.memory_space<vmem>>, %arg4: memref<1x16x32xf32, #tpu.memory_space<vmem>>, %arg5: memref<32x32xf32, #tpu.memory_space<vmem>>, %arg6: memref<1x32xf32, #tpu.memory_space<vmem>>, %arg7: memref<32x32xf32, #tpu.memory_space<vmem>>, %arg8: memref<1x32xf32, #tpu.memory_space<vmem>>, %arg9: memref<32x32xf32, #tpu.memory_space<vmem>>, %arg10: memref<1x32xf32, #tpu.memory_space<vmem>>, %arg11: memref<32x32xf32, #tpu.memory_space<vmem>>, %arg12: memref<1x32xf32, #tpu.memory_space<vmem>>, %arg13: memref<1x32xf32, #tpu.memory_space<vmem>>, %arg14: memref<1x32xf32, #tpu.memory_space<vmem>>, %arg15: memref<1x8x32xf32, #tpu.memory_space<vmem>>) attributes {dimension_semantics = [#tpu.dimension_semantics<parallel>], iteration_bounds = array<i64: 2>, scalar_prefetch = 0 : i64, scratch_operands = 0 : i64, tpu.core_type = #tpu.core_type<tc>, window_params = [{transform_indices = @transform_0, window_bounds = array<i64: 1, 8, 32>}, {transform_indices = @transform_1, window_bounds = array<i64: 1, 8, 32>}, {transform_indices = @transform_2, window_bounds = array<i64: 1, 16, 32>}, {transform_indices = @transform_3, window_bounds = array<i64: 1, 16, 32>}, {pipeline_mode = #tpu.pipeline_mode<synchronous>, transform_indices = @transform_4, window_bounds = array<i64: 32, 32>}, {pipeline_mode = #tpu.pipeline_mode<synchronous>, transform_indices = @transform_5, window_bounds = array<i64: 1, 32>}, {pipeline_mode = #tpu.pipeline_mode<synchronous>, transform_indices = @transform_6, window_bounds = array<i64: 32, 32>}, {pipeline_mode = #tpu.pipeline_mode<synchronous>, transform_indices = @transform_7, window_bounds = array<i64: 1, 32>}, {pipeline_mode = #tpu.pipeline_mode<synchronous>, transform_indices = @transform_8, window_bounds = array<i64: 32, 32>}, {pipeline_mode = #tpu.pipeline_mode<synchronous>, transform_indices = @transform_9, window_bounds = array<i64: 1, 32>}, {pipeline_mode = #tpu.pipeline_mode<synchronous>, transform_indices = @transform_10, window_bounds = array<i64: 32, 32>}, {pipeline_mode = #tpu.pipeline_mode<synchronous>, transform_indices = @transform_11, window_bounds = array<i64: 1, 32>}, {pipeline_mode = #tpu.pipeline_mode<synchronous>, transform_indices = @transform_12, window_bounds = array<i64: 1, 32>}, {pipeline_mode = #tpu.pipeline_mode<synchronous>, transform_indices = @transform_13, window_bounds = array<i64: 1, 32>}, {transform_indices = @transform_14, window_bounds = array<i64: 1, 8, 32>}]} {
    %c0 = arith.constant 0 : index
    %c0_0 = arith.constant 0 : index
    %c0_1 = arith.constant 0 : index
    %0 = vector.load %arg1[%c0, %c0_0, %c0_1] : memref<1x8x32xf32, #tpu.memory_space<vmem>>, vector<1x8x32xf32>
    %1 = vector.shape_cast %0 : vector<1x8x32xf32> to vector<8x32xf32>
    %c0_2 = arith.constant 0 : index
    %c0_3 = arith.constant 0 : index
    %c0_4 = arith.constant 0 : index
    %2 = vector.load %arg2[%c0_2, %c0_3, %c0_4] : memref<1x8x32xf32, #tpu.memory_space<vmem>>, vector<1x8x32xf32>
    %3 = vector.shape_cast %2 : vector<1x8x32xf32> to vector<8x32xf32>
    %4 = arith.addf %1, %3 : vector<8x32xf32>
    %c0_5 = arith.constant 0 : index
    %c0_6 = arith.constant 0 : index
    %c0_7 = arith.constant 0 : index
    %5 = vector.load %arg3[%c0_5, %c0_6, %c0_7] : memref<1x16x32xf32, #tpu.memory_space<vmem>>, vector<1x16x32xf32>
    %6 = vector.shape_cast %5 : vector<1x16x32xf32> to vector<16x32xf32>
    %c0_8 = arith.constant 0 : index
    %c0_9 = arith.constant 0 : index
    %c0_10 = arith.constant 0 : index
    %7 = vector.load %arg4[%c0_8, %c0_9, %c0_10] : memref<1x16x32xf32, #tpu.memory_space<vmem>>, vector<1x16x32xf32>
    %8 = vector.shape_cast %7 : vector<1x16x32xf32> to vector<16x32xf32>
    %9 = arith.addf %6, %8 : vector<16x32xf32>
    %c0_11 = arith.constant 0 : index
    %c0_12 = arith.constant 0 : index
    %10 = vector.load %arg5[%c0_11, %c0_12] : memref<32x32xf32, #tpu.memory_space<vmem>>, vector<32x32xf32>
    %cst = arith.constant dense<0.000000e+00> : vector<8x32xf32>
    %11 = tpu.matmul %4, %10, %cst {dimension_numbers = #tpu.dot_dimension_numbers<[1], [0], [0], [1], [0, 0, 1, 1], [], []>} : vector<8x32xf32>, vector<32x32xf32>, vector<8x32xf32> -> vector<8x32xf32>
    %c0_13 = arith.constant 0 : index
    %c0_14 = arith.constant 0 : index
    %12 = vector.load %arg6[%c0_13, %c0_14] : memref<1x32xf32, #tpu.memory_space<vmem>>, vector<1x32xf32>
    %13 = vector.broadcast %12 : vector<1x32xf32> to vector<8x32xf32>
    %14 = arith.addf %11, %13 : vector<8x32xf32>
    %c0_15 = arith.constant 0 : index
    %c0_16 = arith.constant 0 : index
    %15 = vector.load %arg7[%c0_15, %c0_16] : memref<32x32xf32, #tpu.memory_space<vmem>>, vector<32x32xf32>
    %cst_17 = arith.constant dense<0.000000e+00> : vector<16x32xf32>
    %16 = tpu.matmul %9, %15, %cst_17 {dimension_numbers = #tpu.dot_dimension_numbers<[1], [0], [0], [1], [0, 0, 1, 1], [], []>} : vector<16x32xf32>, vector<32x32xf32>, vector<16x32xf32> -> vector<16x32xf32>
    %c0_18 = arith.constant 0 : index
    %c0_19 = arith.constant 0 : index
    %17 = vector.load %arg8[%c0_18, %c0_19] : memref<1x32xf32, #tpu.memory_space<vmem>>, vector<1x32xf32>
    %18 = vector.broadcast %17 : vector<1x32xf32> to vector<16x32xf32>
    %19 = arith.addf %16, %18 : vector<16x32xf32>
    %c0_20 = arith.constant 0 : index
    %c0_21 = arith.constant 0 : index
    %20 = vector.load %arg9[%c0_20, %c0_21] : memref<32x32xf32, #tpu.memory_space<vmem>>, vector<32x32xf32>
    %cst_22 = arith.constant dense<0.000000e+00> : vector<16x32xf32>
    %21 = tpu.matmul %6, %20, %cst_22 {dimension_numbers = #tpu.dot_dimension_numbers<[1], [0], [0], [1], [0, 0, 1, 1], [], []>} : vector<16x32xf32>, vector<32x32xf32>, vector<16x32xf32> -> vector<16x32xf32>
    %c0_23 = arith.constant 0 : index
    %c0_24 = arith.constant 0 : index
    %22 = vector.load %arg10[%c0_23, %c0_24] : memref<1x32xf32, #tpu.memory_space<vmem>>, vector<1x32xf32>
    %23 = vector.broadcast %22 : vector<1x32xf32> to vector<16x32xf32>
    %24 = arith.addf %21, %23 : vector<16x32xf32>
    %c0_25 = arith.constant 0 : index
    %c0_26 = arith.constant 0 : index
    %25 = vector.load %arg11[%c0_25, %c0_26] : memref<32x32xf32, #tpu.memory_space<vmem>>, vector<32x32xf32>
    %26 = vector.extract_strided_slice %14 {offsets = [0, 0], sizes = [8, 8], strides = [1, 1]} : vector<8x32xf32> to vector<8x8xf32>
    %27 = vector.extract_strided_slice %19 {offsets = [0, 0], sizes = [16, 8], strides = [1, 1]} : vector<16x32xf32> to vector<16x8xf32>
    %28 = vector.extract_strided_slice %24 {offsets = [0, 0], sizes = [16, 8], strides = [1, 1]} : vector<16x32xf32> to vector<16x8xf32>
    %cst_27 = arith.constant dense<0.000000e+00> : vector<8x16xf32>
    %29 = tpu.matmul %26, %27, %cst_27 {dimension_numbers = #tpu.dot_dimension_numbers<[1], [1], [0], [0], [0, 0, 1, 0], [], []>} : vector<8x8xf32>, vector<16x8xf32>, vector<8x16xf32> -> vector<8x16xf32>
    %cst_28 = arith.constant 0.353553385 : f32
    %30 = vector.broadcast %cst_28 : f32 to vector<8x16xf32>
    %31 = arith.mulf %29, %30 : vector<8x16xf32>
    %cst_29 = arith.constant dense<0xFF800000> : vector<8xf32>
    %32 = vector.multi_reduction <maximumf>, %31, %cst_29 [1] : vector<8x16xf32> to vector<8xf32>
    %33 = vector.shape_cast %32 : vector<8xf32> to vector<8x1xf32>
    %34 = vector.broadcast %33 : vector<8x1xf32> to vector<8x16xf32>
    %35 = arith.subf %31, %34 : vector<8x16xf32>
    %36 = math.exp %35 : vector<8x16xf32>
    %cst_30 = arith.constant dense<0.000000e+00> : vector<8xf32>
    %37 = vector.multi_reduction <add>, %36, %cst_30 [1] : vector<8x16xf32> to vector<8xf32>
    %38 = vector.shape_cast %37 : vector<8xf32> to vector<8x1xf32>
    %cst_31 = arith.constant dense<0.000000e+00> : vector<8x8xf32>
    %39 = tpu.matmul %36, %28, %cst_31 {dimension_numbers = #tpu.dot_dimension_numbers<[1], [0], [0], [1], [0, 0, 1, 1], [], []>} : vector<8x16xf32>, vector<16x8xf32>, vector<8x8xf32> -> vector<8x8xf32>
    %40 = tpu.reciprocal %38 {approx = true} : vector<8x1xf32> -> vector<8x1xf32>
    %41 = vector.broadcast %40 : vector<8x1xf32> to vector<8x8xf32>
    %42 = arith.mulf %39, %41 : vector<8x8xf32>
    %43 = vector.extract_strided_slice %25 {offsets = [0, 0], sizes = [8, 32], strides = [1, 1]} : vector<32x32xf32> to vector<8x32xf32>
    %cst_32 = arith.constant dense<0.000000e+00> : vector<8x32xf32>
    %44 = tpu.matmul %42, %43, %cst_32 {dimension_numbers = #tpu.dot_dimension_numbers<[1], [0], [0], [1], [0, 0, 1, 1], [], []>} : vector<8x8xf32>, vector<8x32xf32>, vector<8x32xf32> -> vector<8x32xf32>
    %45 = vector.extract_strided_slice %14 {offsets = [0, 8], sizes = [8, 8], strides = [1, 1]} : vector<8x32xf32> to vector<8x8xf32>
    %46 = vector.extract_strided_slice %19 {offsets = [0, 8], sizes = [16, 8], strides = [1, 1]} : vector<16x32xf32> to vector<16x8xf32>
    %47 = vector.extract_strided_slice %24 {offsets = [0, 8], sizes = [16, 8], strides = [1, 1]} : vector<16x32xf32> to vector<16x8xf32>
    %cst_33 = arith.constant dense<0.000000e+00> : vector<8x16xf32>
    %48 = tpu.matmul %45, %46, %cst_33 {dimension_numbers = #tpu.dot_dimension_numbers<[1], [1], [0], [0], [0, 0, 1, 0], [], []>} : vector<8x8xf32>, vector<16x8xf32>, vector<8x16xf32> -> vector<8x16xf32>
    %cst_34 = arith.constant 0.353553385 : f32
    %49 = vector.broadcast %cst_34 : f32 to vector<8x16xf32>
    %50 = arith.mulf %48, %49 : vector<8x16xf32>
    %cst_35 = arith.constant dense<0xFF800000> : vector<8xf32>
    %51 = vector.multi_reduction <maximumf>, %50, %cst_35 [1] : vector<8x16xf32> to vector<8xf32>
    %52 = vector.shape_cast %51 : vector<8xf32> to vector<8x1xf32>
    %53 = vector.broadcast %52 : vector<8x1xf32> to vector<8x16xf32>
    %54 = arith.subf %50, %53 : vector<8x16xf32>
    %55 = math.exp %54 : vector<8x16xf32>
    %cst_36 = arith.constant dense<0.000000e+00> : vector<8xf32>
    %56 = vector.multi_reduction <add>, %55, %cst_36 [1] : vector<8x16xf32> to vector<8xf32>
    %57 = vector.shape_cast %56 : vector<8xf32> to vector<8x1xf32>
    %cst_37 = arith.constant dense<0.000000e+00> : vector<8x8xf32>
    %58 = tpu.matmul %55, %47, %cst_37 {dimension_numbers = #tpu.dot_dimension_numbers<[1], [0], [0], [1], [0, 0, 1, 1], [], []>} : vector<8x16xf32>, vector<16x8xf32>, vector<8x8xf32> -> vector<8x8xf32>
    %59 = tpu.reciprocal %57 {approx = true} : vector<8x1xf32> -> vector<8x1xf32>
    %60 = vector.broadcast %59 : vector<8x1xf32> to vector<8x8xf32>
    %61 = arith.mulf %58, %60 : vector<8x8xf32>
    %62 = vector.extract_strided_slice %25 {offsets = [8, 0], sizes = [8, 32], strides = [1, 1]} : vector<32x32xf32> to vector<8x32xf32>
    %cst_38 = arith.constant dense<0.000000e+00> : vector<8x32xf32>
    %63 = tpu.matmul %61, %62, %cst_38 {dimension_numbers = #tpu.dot_dimension_numbers<[1], [0], [0], [1], [0, 0, 1, 1], [], []>} : vector<8x8xf32>, vector<8x32xf32>, vector<8x32xf32> -> vector<8x32xf32>
    %64 = arith.addf %44, %63 : vector<8x32xf32>
    %65 = vector.extract_strided_slice %14 {offsets = [0, 16], sizes = [8, 8], strides = [1, 1]} : vector<8x32xf32> to vector<8x8xf32>
    %66 = vector.extract_strided_slice %19 {offsets = [0, 16], sizes = [16, 8], strides = [1, 1]} : vector<16x32xf32> to vector<16x8xf32>
    %67 = vector.extract_strided_slice %24 {offsets = [0, 16], sizes = [16, 8], strides = [1, 1]} : vector<16x32xf32> to vector<16x8xf32>
    %cst_39 = arith.constant dense<0.000000e+00> : vector<8x16xf32>
    %68 = tpu.matmul %65, %66, %cst_39 {dimension_numbers = #tpu.dot_dimension_numbers<[1], [1], [0], [0], [0, 0, 1, 0], [], []>} : vector<8x8xf32>, vector<16x8xf32>, vector<8x16xf32> -> vector<8x16xf32>
    %cst_40 = arith.constant 0.353553385 : f32
    %69 = vector.broadcast %cst_40 : f32 to vector<8x16xf32>
    %70 = arith.mulf %68, %69 : vector<8x16xf32>
    %cst_41 = arith.constant dense<0xFF800000> : vector<8xf32>
    %71 = vector.multi_reduction <maximumf>, %70, %cst_41 [1] : vector<8x16xf32> to vector<8xf32>
    %72 = vector.shape_cast %71 : vector<8xf32> to vector<8x1xf32>
    %73 = vector.broadcast %72 : vector<8x1xf32> to vector<8x16xf32>
    %74 = arith.subf %70, %73 : vector<8x16xf32>
    %75 = math.exp %74 : vector<8x16xf32>
    %cst_42 = arith.constant dense<0.000000e+00> : vector<8xf32>
    %76 = vector.multi_reduction <add>, %75, %cst_42 [1] : vector<8x16xf32> to vector<8xf32>
    %77 = vector.shape_cast %76 : vector<8xf32> to vector<8x1xf32>
    %cst_43 = arith.constant dense<0.000000e+00> : vector<8x8xf32>
    %78 = tpu.matmul %75, %67, %cst_43 {dimension_numbers = #tpu.dot_dimension_numbers<[1], [0], [0], [1], [0, 0, 1, 1], [], []>} : vector<8x16xf32>, vector<16x8xf32>, vector<8x8xf32> -> vector<8x8xf32>
    %79 = tpu.reciprocal %77 {approx = true} : vector<8x1xf32> -> vector<8x1xf32>
    %80 = vector.broadcast %79 : vector<8x1xf32> to vector<8x8xf32>
    %81 = arith.mulf %78, %80 : vector<8x8xf32>
    %82 = vector.extract_strided_slice %25 {offsets = [16, 0], sizes = [8, 32], strides = [1, 1]} : vector<32x32xf32> to vector<8x32xf32>
    %cst_44 = arith.constant dense<0.000000e+00> : vector<8x32xf32>
    %83 = tpu.matmul %81, %82, %cst_44 {dimension_numbers = #tpu.dot_dimension_numbers<[1], [0], [0], [1], [0, 0, 1, 1], [], []>} : vector<8x8xf32>, vector<8x32xf32>, vector<8x32xf32> -> vector<8x32xf32>
    %84 = arith.addf %64, %83 : vector<8x32xf32>
    %85 = vector.extract_strided_slice %14 {offsets = [0, 24], sizes = [8, 8], strides = [1, 1]} : vector<8x32xf32> to vector<8x8xf32>
    %86 = vector.extract_strided_slice %19 {offsets = [0, 24], sizes = [16, 8], strides = [1, 1]} : vector<16x32xf32> to vector<16x8xf32>
    %87 = vector.extract_strided_slice %24 {offsets = [0, 24], sizes = [16, 8], strides = [1, 1]} : vector<16x32xf32> to vector<16x8xf32>
    %cst_45 = arith.constant dense<0.000000e+00> : vector<8x16xf32>
    %88 = tpu.matmul %85, %86, %cst_45 {dimension_numbers = #tpu.dot_dimension_numbers<[1], [1], [0], [0], [0, 0, 1, 0], [], []>} : vector<8x8xf32>, vector<16x8xf32>, vector<8x16xf32> -> vector<8x16xf32>
    %cst_46 = arith.constant 0.353553385 : f32
    %89 = vector.broadcast %cst_46 : f32 to vector<8x16xf32>
    %90 = arith.mulf %88, %89 : vector<8x16xf32>
    %cst_47 = arith.constant dense<0xFF800000> : vector<8xf32>
    %91 = vector.multi_reduction <maximumf>, %90, %cst_47 [1] : vector<8x16xf32> to vector<8xf32>
    %92 = vector.shape_cast %91 : vector<8xf32> to vector<8x1xf32>
    %93 = vector.broadcast %92 : vector<8x1xf32> to vector<8x16xf32>
    %94 = arith.subf %90, %93 : vector<8x16xf32>
    %95 = math.exp %94 : vector<8x16xf32>
    %cst_48 = arith.constant dense<0.000000e+00> : vector<8xf32>
    %96 = vector.multi_reduction <add>, %95, %cst_48 [1] : vector<8x16xf32> to vector<8xf32>
    %97 = vector.shape_cast %96 : vector<8xf32> to vector<8x1xf32>
    %cst_49 = arith.constant dense<0.000000e+00> : vector<8x8xf32>
    %98 = tpu.matmul %95, %87, %cst_49 {dimension_numbers = #tpu.dot_dimension_numbers<[1], [0], [0], [1], [0, 0, 1, 1], [], []>} : vector<8x16xf32>, vector<16x8xf32>, vector<8x8xf32> -> vector<8x8xf32>
    %99 = tpu.reciprocal %97 {approx = true} : vector<8x1xf32> -> vector<8x1xf32>
    %100 = vector.broadcast %99 : vector<8x1xf32> to vector<8x8xf32>
    %101 = arith.mulf %98, %100 : vector<8x8xf32>
    %102 = vector.extract_strided_slice %25 {offsets = [24, 0], sizes = [8, 32], strides = [1, 1]} : vector<32x32xf32> to vector<8x32xf32>
    %cst_50 = arith.constant dense<0.000000e+00> : vector<8x32xf32>
    %103 = tpu.matmul %101, %102, %cst_50 {dimension_numbers = #tpu.dot_dimension_numbers<[1], [0], [0], [1], [0, 0, 1, 1], [], []>} : vector<8x8xf32>, vector<8x32xf32>, vector<8x32xf32> -> vector<8x32xf32>
    %104 = arith.addf %84, %103 : vector<8x32xf32>
    %105 = arith.addf %1, %104 : vector<8x32xf32>
    %c0_51 = arith.constant 0 : index
    %c0_52 = arith.constant 0 : index
    %106 = vector.load %arg12[%c0_51, %c0_52] : memref<1x32xf32, #tpu.memory_space<vmem>>, vector<1x32xf32>
    %107 = vector.broadcast %106 : vector<1x32xf32> to vector<8x32xf32>
    %108 = arith.addf %105, %107 : vector<8x32xf32>
    %c0_53 = arith.constant 0 : index
    %c0_54 = arith.constant 0 : index
    %109 = vector.load %arg13[%c0_53, %c0_54] : memref<1x32xf32, #tpu.memory_space<vmem>>, vector<1x32xf32>
    %c0_55 = arith.constant 0 : index
    %c0_56 = arith.constant 0 : index
    %110 = vector.load %arg14[%c0_55, %c0_56] : memref<1x32xf32, #tpu.memory_space<vmem>>, vector<1x32xf32>
    %cst_57 = arith.constant dense<0.000000e+00> : vector<8xf32>
    %111 = vector.multi_reduction <add>, %108, %cst_57 [1] : vector<8x32xf32> to vector<8xf32>
    %112 = vector.shape_cast %111 : vector<8xf32> to vector<8x1xf32>
    %cst_58 = arith.constant 3.200000e+01 : f32
    %113 = vector.broadcast %cst_58 : f32 to vector<8x1xf32>
    %114 = arith.divf %112, %113 : vector<8x1xf32>
    %115 = vector.broadcast %114 : vector<8x1xf32> to vector<8x32xf32>
    %116 = arith.subf %108, %115 : vector<8x32xf32>
    %117 = arith.mulf %116, %116 : vector<8x32xf32>
    %cst_59 = arith.constant dense<0.000000e+00> : vector<8xf32>
    %118 = vector.multi_reduction <add>, %117, %cst_59 [1] : vector<8x32xf32> to vector<8xf32>
    %119 = vector.shape_cast %118 : vector<8xf32> to vector<8x1xf32>
    %cst_60 = arith.constant 3.200000e+01 : f32
    %120 = vector.broadcast %cst_60 : f32 to vector<8x1xf32>
    %121 = arith.divf %119, %120 : vector<8x1xf32>
    %122 = vector.broadcast %114 : vector<8x1xf32> to vector<8x32xf32>
    %123 = arith.subf %108, %122 : vector<8x32xf32>
    %cst_61 = arith.constant 9.99999974E-6 : f32
    %124 = vector.broadcast %cst_61 : f32 to vector<8x1xf32>
    %125 = arith.addf %121, %124 : vector<8x1xf32>
    %126 = math.rsqrt %125 : vector<8x1xf32>
    %127 = vector.broadcast %126 : vector<8x1xf32> to vector<8x32xf32>
    %128 = arith.mulf %123, %127 : vector<8x32xf32>
    %129 = vector.broadcast %109 : vector<1x32xf32> to vector<8x32xf32>
    %130 = arith.mulf %128, %129 : vector<8x32xf32>
    %131 = vector.broadcast %110 : vector<1x32xf32> to vector<8x32xf32>
    %132 = arith.addf %130, %131 : vector<8x32xf32>
    %c0_62 = arith.constant 0 : index
    %c0_63 = arith.constant 0 : index
    %c0_64 = arith.constant 0 : index
    %133 = vector.load %arg15[%c0_62, %c0_63, %c0_64] : memref<1x8x32xf32, #tpu.memory_space<vmem>>, vector<1x8x32xf32>
    %134 = vector.shape_cast %133 : vector<1x8x32xf32> to vector<8x32xf32>
    %135 = vector.shape_cast %132 : vector<8x32xf32> to vector<1x8x32xf32>
    tpu.vector_store %arg15[%c0_62, %c0_63, %c0_64], %135 {strides = array<i32>} : memref<1x8x32xf32, #tpu.memory_space<vmem>>, vector<1x8x32xf32>,
    return
  }
  func.func @transform_0(%arg0: i32) -> (i32, i32, i32) {
    %c0_i32 = arith.constant 0 : i32
    %c0_i32_0 = arith.constant 0 : i32
    %c0_i32_1 = arith.constant 0 : i32
    return %arg0, %c0_i32, %c0_i32_0 : i32, i32, i32
  }
  func.func @transform_1(%arg0: i32) -> (i32, i32, i32) {
    %c0_i32 = arith.constant 0 : i32
    %c0_i32_0 = arith.constant 0 : i32
    %c0_i32_1 = arith.constant 0 : i32
    return %arg0, %c0_i32, %c0_i32_0 : i32, i32, i32
  }
  func.func @transform_2(%arg0: i32) -> (i32, i32, i32) {
    %c0_i32 = arith.constant 0 : i32
    %c0_i32_0 = arith.constant 0 : i32
    %c0_i32_1 = arith.constant 0 : i32
    return %arg0, %c0_i32, %c0_i32_0 : i32, i32, i32
  }
  func.func @transform_3(%arg0: i32) -> (i32, i32, i32) {
    %c0_i32 = arith.constant 0 : i32
    %c0_i32_0 = arith.constant 0 : i32
    %c0_i32_1 = arith.constant 0 : i32
    return %arg0, %c0_i32, %c0_i32_0 : i32, i32, i32
  }
  func.func @transform_4(%arg0: i32) -> (i32, i32) {
    %c0_i32 = arith.constant 0 : i32
    %c0_i32_0 = arith.constant 0 : i32
    %c0_i32_1 = arith.constant 0 : i32
    return %c0_i32, %c0_i32_0 : i32, i32
  }
  func.func @transform_5(%arg0: i32) -> (i32, i32) {
    %c0_i32 = arith.constant 0 : i32
    %c0_i32_0 = arith.constant 0 : i32
    %c0_i32_1 = arith.constant 0 : i32
    return %c0_i32, %c0_i32_0 : i32, i32
  }
  func.func @transform_6(%arg0: i32) -> (i32, i32) {
    %c0_i32 = arith.constant 0 : i32
    %c0_i32_0 = arith.constant 0 : i32
    %c0_i32_1 = arith.constant 0 : i32
    return %c0_i32, %c0_i32_0 : i32, i32
  }
  func.func @transform_7(%arg0: i32) -> (i32, i32) {
    %c0_i32 = arith.constant 0 : i32
    %c0_i32_0 = arith.constant 0 : i32
    %c0_i32_1 = arith.constant 0 : i32
    return %c0_i32, %c0_i32_0 : i32, i32
  }
  func.func @transform_8(%arg0: i32) -> (i32, i32) {
    %c0_i32 = arith.constant 0 : i32
    %c0_i32_0 = arith.constant 0 : i32
    %c0_i32_1 = arith.constant 0 : i32
    return %c0_i32, %c0_i32_0 : i32, i32
  }
  func.func @transform_9(%arg0: i32) -> (i32, i32) {
    %c0_i32 = arith.constant 0 : i32
    %c0_i32_0 = arith.constant 0 : i32
    %c0_i32_1 = arith.constant 0 : i32
    return %c0_i32, %c0_i32_0 : i32, i32
  }
  func.func @transform_10(%arg0: i32) -> (i32, i32) {
    %c0_i32 = arith.constant 0 : i32
    %c0_i32_0 = arith.constant 0 : i32
    %c0_i32_1 = arith.constant 0 : i32
    return %c0_i32, %c0_i32_0 : i32, i32
  }
  func.func @transform_11(%arg0: i32) -> (i32, i32) {
    %c0_i32 = arith.constant 0 : i32
    %c0_i32_0 = arith.constant 0 : i32
    %c0_i32_1 = arith.constant 0 : i32
    return %c0_i32, %c0_i32_0 : i32, i32
  }
  func.func @transform_12(%arg0: i32) -> (i32, i32) {
    %c0_i32 = arith.constant 0 : i32
    %c0_i32_0 = arith.constant 0 : i32
    %c0_i32_1 = arith.constant 0 : i32
    return %c0_i32, %c0_i32_0 : i32, i32
  }
  func.func @transform_13(%arg0: i32) -> (i32, i32) {
    %c0_i32 = arith.constant 0 : i32
    %c0_i32_0 = arith.constant 0 : i32
    %c0_i32_1 = arith.constant 0 : i32
    return %c0_i32, %c0_i32_0 : i32, i32
  }
  func.func @transform_14(%arg0: i32) -> (i32, i32, i32) {
    %c0_i32 = arith.constant 0 : i32
    %c0_i32_0 = arith.constant 0 : i32
    %c0_i32_1 = arith.constant 0 : i32
    return %arg0, %c0_i32, %c0_i32_0 : i32, i32, i32
  }
}

module attributes {stable_mosaic.version = 11 : i64} {
  func.func @_fused_attn_kernel(%arg0: i32, %arg1: memref<1x8x32xf32, #tpu.memory_space<vmem>>, %arg2: memref<1x8x32xf32, #tpu.memory_space<vmem>>, %arg3: memref<1x8x32xf32, #tpu.memory_space<vmem>>, %arg4: memref<1x8x32xf32, #tpu.memory_space<vmem>>, %arg5: memref<32x32xf32, #tpu.memory_space<vmem>>, %arg6: memref<1x32xf32, #tpu.memory_space<vmem>>, %arg7: memref<32x32xf32, #tpu.memory_space<vmem>>, %arg8: memref<1x32xf32, #tpu.memory_space<vmem>>, %arg9: memref<32x32xf32, #tpu.memory_space<vmem>>, %arg10: memref<1x32xf32, #tpu.memory_space<vmem>>, %arg11: memref<32x32xf32, #tpu.memory_space<vmem>>, %arg12: memref<1x32xf32, #tpu.memory_space<vmem>>, %arg13: memref<1x32xf32, #tpu.memory_space<vmem>>, %arg14: memref<1x32xf32, #tpu.memory_space<vmem>>, %arg15: memref<1x8x32xf32, #tpu.memory_space<vmem>>) attributes {dimension_semantics = [#tpu.dimension_semantics<parallel>], iteration_bounds = array<i64: 2>, scalar_prefetch = 0 : i64, scratch_operands = 0 : i64, tpu.core_type = #tpu.core_type<tc>, window_params = [{transform_indices = @transform_0, window_bounds = array<i64: 1, 8, 32>}, {transform_indices = @transform_1, window_bounds = array<i64: 1, 8, 32>}, {transform_indices = @transform_2, window_bounds = array<i64: 1, 8, 32>}, {transform_indices = @transform_3, window_bounds = array<i64: 1, 8, 32>}, {pipeline_mode = #tpu.pipeline_mode<synchronous>, transform_indices = @transform_4, window_bounds = array<i64: 32, 32>}, {pipeline_mode = #tpu.pipeline_mode<synchronous>, transform_indices = @transform_5, window_bounds = array<i64: 1, 32>}, {pipeline_mode = #tpu.pipeline_mode<synchronous>, transform_indices = @transform_6, window_bounds = array<i64: 32, 32>}, {pipeline_mode = #tpu.pipeline_mode<synchronous>, transform_indices = @transform_7, window_bounds = array<i64: 1, 32>}, {pipeline_mode = #tpu.pipeline_mode<synchronous>, transform_indices = @transform_8, window_bounds = array<i64: 32, 32>}, {pipeline_mode = #tpu.pipeline_mode<synchronous>, transform_indices = @transform_9, window_bounds = array<i64: 1, 32>}, {pipeline_mode = #tpu.pipeline_mode<synchronous>, transform_indices = @transform_10, window_bounds = array<i64: 32, 32>}, {pipeline_mode = #tpu.pipeline_mode<synchronous>, transform_indices = @transform_11, window_bounds = array<i64: 1, 32>}, {pipeline_mode = #tpu.pipeline_mode<synchronous>, transform_indices = @transform_12, window_bounds = array<i64: 1, 32>}, {pipeline_mode = #tpu.pipeline_mode<synchronous>, transform_indices = @transform_13, window_bounds = array<i64: 1, 32>}, {transform_indices = @transform_14, window_bounds = array<i64: 1, 8, 32>}]} {
    %c0 = arith.constant 0 : index
    %c0_0 = arith.constant 0 : index
    %c0_1 = arith.constant 0 : index
    %0 = vector.load %arg1[%c0, %c0_0, %c0_1] : memref<1x8x32xf32, #tpu.memory_space<vmem>>, vector<1x8x32xf32>
    %1 = vector.shape_cast %0 : vector<1x8x32xf32> to vector<8x32xf32>
    %c0_2 = arith.constant 0 : index
    %c0_3 = arith.constant 0 : index
    %c0_4 = arith.constant 0 : index
    %2 = vector.load %arg2[%c0_2, %c0_3, %c0_4] : memref<1x8x32xf32, #tpu.memory_space<vmem>>, vector<1x8x32xf32>
    %3 = vector.shape_cast %2 : vector<1x8x32xf32> to vector<8x32xf32>
    %4 = arith.addf %1, %3 : vector<8x32xf32>
    %c0_5 = arith.constant 0 : index
    %c0_6 = arith.constant 0 : index
    %c0_7 = arith.constant 0 : index
    %5 = vector.load %arg3[%c0_5, %c0_6, %c0_7] : memref<1x8x32xf32, #tpu.memory_space<vmem>>, vector<1x8x32xf32>
    %6 = vector.shape_cast %5 : vector<1x8x32xf32> to vector<8x32xf32>
    %c0_8 = arith.constant 0 : index
    %c0_9 = arith.constant 0 : index
    %c0_10 = arith.constant 0 : index
    %7 = vector.load %arg4[%c0_8, %c0_9, %c0_10] : memref<1x8x32xf32, #tpu.memory_space<vmem>>, vector<1x8x32xf32>
    %8 = vector.shape_cast %7 : vector<1x8x32xf32> to vector<8x32xf32>
    %9 = arith.addf %6, %8 : vector<8x32xf32>
    %c0_11 = arith.constant 0 : index
    %c0_12 = arith.constant 0 : index
    %10 = vector.load %arg5[%c0_11, %c0_12] : memref<32x32xf32, #tpu.memory_space<vmem>>, vector<32x32xf32>
    %cst = arith.constant dense<0.000000e+00> : vector<8x32xf32>
    %11 = tpu.matmul %4, %10, %cst {dimension_numbers = #tpu.dot_dimension_numbers<[1], [0], [0], [1], [0, 0, 1, 1], [], []>} : vector<8x32xf32>, vector<32x32xf32>, vector<8x32xf32> -> vector<8x32xf32>
    %c0_13 = arith.constant 0 : index
    %c0_14 = arith.constant 0 : index
    %12 = vector.load %arg6[%c0_13, %c0_14] : memref<1x32xf32, #tpu.memory_space<vmem>>, vector<1x32xf32>
    %13 = vector.broadcast %12 : vector<1x32xf32> to vector<8x32xf32>
    %14 = arith.addf %11, %13 : vector<8x32xf32>
    %c0_15 = arith.constant 0 : index
    %c0_16 = arith.constant 0 : index
    %15 = vector.load %arg7[%c0_15, %c0_16] : memref<32x32xf32, #tpu.memory_space<vmem>>, vector<32x32xf32>
    %cst_17 = arith.constant dense<0.000000e+00> : vector<8x32xf32>
    %16 = tpu.matmul %9, %15, %cst_17 {dimension_numbers = #tpu.dot_dimension_numbers<[1], [0], [0], [1], [0, 0, 1, 1], [], []>} : vector<8x32xf32>, vector<32x32xf32>, vector<8x32xf32> -> vector<8x32xf32>
    %c0_18 = arith.constant 0 : index
    %c0_19 = arith.constant 0 : index
    %17 = vector.load %arg8[%c0_18, %c0_19] : memref<1x32xf32, #tpu.memory_space<vmem>>, vector<1x32xf32>
    %18 = vector.broadcast %17 : vector<1x32xf32> to vector<8x32xf32>
    %19 = arith.addf %16, %18 : vector<8x32xf32>
    %c0_20 = arith.constant 0 : index
    %c0_21 = arith.constant 0 : index
    %20 = vector.load %arg9[%c0_20, %c0_21] : memref<32x32xf32, #tpu.memory_space<vmem>>, vector<32x32xf32>
    %cst_22 = arith.constant dense<0.000000e+00> : vector<8x32xf32>
    %21 = tpu.matmul %6, %20, %cst_22 {dimension_numbers = #tpu.dot_dimension_numbers<[1], [0], [0], [1], [0, 0, 1, 1], [], []>} : vector<8x32xf32>, vector<32x32xf32>, vector<8x32xf32> -> vector<8x32xf32>
    %c0_23 = arith.constant 0 : index
    %c0_24 = arith.constant 0 : index
    %22 = vector.load %arg10[%c0_23, %c0_24] : memref<1x32xf32, #tpu.memory_space<vmem>>, vector<1x32xf32>
    %23 = vector.broadcast %22 : vector<1x32xf32> to vector<8x32xf32>
    %24 = arith.addf %21, %23 : vector<8x32xf32>
    %c0_25 = arith.constant 0 : index
    %c0_26 = arith.constant 0 : index
    %25 = vector.load %arg11[%c0_25, %c0_26] : memref<32x32xf32, #tpu.memory_space<vmem>>, vector<32x32xf32>
    %26 = vector.extract_strided_slice %14 {offsets = [0, 0], sizes = [8, 8], strides = [1, 1]} : vector<8x32xf32> to vector<8x8xf32>
    %27 = vector.extract_strided_slice %19 {offsets = [0, 0], sizes = [8, 8], strides = [1, 1]} : vector<8x32xf32> to vector<8x8xf32>
    %28 = vector.extract_strided_slice %24 {offsets = [0, 0], sizes = [8, 8], strides = [1, 1]} : vector<8x32xf32> to vector<8x8xf32>
    %cst_27 = arith.constant dense<0.000000e+00> : vector<8x8xf32>
    %29 = tpu.matmul %26, %27, %cst_27 {dimension_numbers = #tpu.dot_dimension_numbers<[1], [1], [0], [0], [0, 0, 1, 0], [], []>} : vector<8x8xf32>, vector<8x8xf32>, vector<8x8xf32> -> vector<8x8xf32>
    %cst_28 = arith.constant 0.353553385 : f32
    %30 = vector.broadcast %cst_28 : f32 to vector<8x8xf32>
    %31 = arith.mulf %29, %30 : vector<8x8xf32>
    %cst_29 = arith.constant dense<0xFF800000> : vector<8xf32>
    %32 = vector.multi_reduction <maximumf>, %31, %cst_29 [1] : vector<8x8xf32> to vector<8xf32>
    %33 = vector.shape_cast %32 : vector<8xf32> to vector<8x1xf32>
    %34 = vector.broadcast %33 : vector<8x1xf32> to vector<8x8xf32>
    %35 = arith.subf %31, %34 : vector<8x8xf32>
    %36 = math.exp %35 : vector<8x8xf32>
    %cst_30 = arith.constant dense<0.000000e+00> : vector<8xf32>
    %37 = vector.multi_reduction <add>, %36, %cst_30 [1] : vector<8x8xf32> to vector<8xf32>
    %38 = vector.shape_cast %37 : vector<8xf32> to vector<8x1xf32>
    %cst_31 = arith.constant dense<0.000000e+00> : vector<8x8xf32>
    %39 = tpu.matmul %36, %28, %cst_31 {dimension_numbers = #tpu.dot_dimension_numbers<[1], [0], [0], [1], [0, 0, 1, 1], [], []>} : vector<8x8xf32>, vector<8x8xf32>, vector<8x8xf32> -> vector<8x8xf32>
    %40 = tpu.reciprocal %38 {approx = true} : vector<8x1xf32> -> vector<8x1xf32>
    %41 = vector.broadcast %40 : vector<8x1xf32> to vector<8x8xf32>
    %42 = arith.mulf %39, %41 : vector<8x8xf32>
    %43 = vector.extract_strided_slice %25 {offsets = [0, 0], sizes = [8, 32], strides = [1, 1]} : vector<32x32xf32> to vector<8x32xf32>
    %cst_32 = arith.constant dense<0.000000e+00> : vector<8x32xf32>
    %44 = tpu.matmul %42, %43, %cst_32 {dimension_numbers = #tpu.dot_dimension_numbers<[1], [0], [0], [1], [0, 0, 1, 1], [], []>} : vector<8x8xf32>, vector<8x32xf32>, vector<8x32xf32> -> vector<8x32xf32>
    %45 = vector.extract_strided_slice %14 {offsets = [0, 8], sizes = [8, 8], strides = [1, 1]} : vector<8x32xf32> to vector<8x8xf32>
    %46 = vector.extract_strided_slice %19 {offsets = [0, 8], sizes = [8, 8], strides = [1, 1]} : vector<8x32xf32> to vector<8x8xf32>
    %47 = vector.extract_strided_slice %24 {offsets = [0, 8], sizes = [8, 8], strides = [1, 1]} : vector<8x32xf32> to vector<8x8xf32>
    %cst_33 = arith.constant dense<0.000000e+00> : vector<8x8xf32>
    %48 = tpu.matmul %45, %46, %cst_33 {dimension_numbers = #tpu.dot_dimension_numbers<[1], [1], [0], [0], [0, 0, 1, 0], [], []>} : vector<8x8xf32>, vector<8x8xf32>, vector<8x8xf32> -> vector<8x8xf32>
    %cst_34 = arith.constant 0.353553385 : f32
    %49 = vector.broadcast %cst_34 : f32 to vector<8x8xf32>
    %50 = arith.mulf %48, %49 : vector<8x8xf32>
    %cst_35 = arith.constant dense<0xFF800000> : vector<8xf32>
    %51 = vector.multi_reduction <maximumf>, %50, %cst_35 [1] : vector<8x8xf32> to vector<8xf32>
    %52 = vector.shape_cast %51 : vector<8xf32> to vector<8x1xf32>
    %53 = vector.broadcast %52 : vector<8x1xf32> to vector<8x8xf32>
    %54 = arith.subf %50, %53 : vector<8x8xf32>
    %55 = math.exp %54 : vector<8x8xf32>
    %cst_36 = arith.constant dense<0.000000e+00> : vector<8xf32>
    %56 = vector.multi_reduction <add>, %55, %cst_36 [1] : vector<8x8xf32> to vector<8xf32>
    %57 = vector.shape_cast %56 : vector<8xf32> to vector<8x1xf32>
    %cst_37 = arith.constant dense<0.000000e+00> : vector<8x8xf32>
    %58 = tpu.matmul %55, %47, %cst_37 {dimension_numbers = #tpu.dot_dimension_numbers<[1], [0], [0], [1], [0, 0, 1, 1], [], []>} : vector<8x8xf32>, vector<8x8xf32>, vector<8x8xf32> -> vector<8x8xf32>
    %59 = tpu.reciprocal %57 {approx = true} : vector<8x1xf32> -> vector<8x1xf32>
    %60 = vector.broadcast %59 : vector<8x1xf32> to vector<8x8xf32>
    %61 = arith.mulf %58, %60 : vector<8x8xf32>
    %62 = vector.extract_strided_slice %25 {offsets = [8, 0], sizes = [8, 32], strides = [1, 1]} : vector<32x32xf32> to vector<8x32xf32>
    %cst_38 = arith.constant dense<0.000000e+00> : vector<8x32xf32>
    %63 = tpu.matmul %61, %62, %cst_38 {dimension_numbers = #tpu.dot_dimension_numbers<[1], [0], [0], [1], [0, 0, 1, 1], [], []>} : vector<8x8xf32>, vector<8x32xf32>, vector<8x32xf32> -> vector<8x32xf32>
    %64 = arith.addf %44, %63 : vector<8x32xf32>
    %65 = vector.extract_strided_slice %14 {offsets = [0, 16], sizes = [8, 8], strides = [1, 1]} : vector<8x32xf32> to vector<8x8xf32>
    %66 = vector.extract_strided_slice %19 {offsets = [0, 16], sizes = [8, 8], strides = [1, 1]} : vector<8x32xf32> to vector<8x8xf32>
    %67 = vector.extract_strided_slice %24 {offsets = [0, 16], sizes = [8, 8], strides = [1, 1]} : vector<8x32xf32> to vector<8x8xf32>
    %cst_39 = arith.constant dense<0.000000e+00> : vector<8x8xf32>
    %68 = tpu.matmul %65, %66, %cst_39 {dimension_numbers = #tpu.dot_dimension_numbers<[1], [1], [0], [0], [0, 0, 1, 0], [], []>} : vector<8x8xf32>, vector<8x8xf32>, vector<8x8xf32> -> vector<8x8xf32>
    %cst_40 = arith.constant 0.353553385 : f32
    %69 = vector.broadcast %cst_40 : f32 to vector<8x8xf32>
    %70 = arith.mulf %68, %69 : vector<8x8xf32>
    %cst_41 = arith.constant dense<0xFF800000> : vector<8xf32>
    %71 = vector.multi_reduction <maximumf>, %70, %cst_41 [1] : vector<8x8xf32> to vector<8xf32>
    %72 = vector.shape_cast %71 : vector<8xf32> to vector<8x1xf32>
    %73 = vector.broadcast %72 : vector<8x1xf32> to vector<8x8xf32>
    %74 = arith.subf %70, %73 : vector<8x8xf32>
    %75 = math.exp %74 : vector<8x8xf32>
    %cst_42 = arith.constant dense<0.000000e+00> : vector<8xf32>
    %76 = vector.multi_reduction <add>, %75, %cst_42 [1] : vector<8x8xf32> to vector<8xf32>
    %77 = vector.shape_cast %76 : vector<8xf32> to vector<8x1xf32>
    %cst_43 = arith.constant dense<0.000000e+00> : vector<8x8xf32>
    %78 = tpu.matmul %75, %67, %cst_43 {dimension_numbers = #tpu.dot_dimension_numbers<[1], [0], [0], [1], [0, 0, 1, 1], [], []>} : vector<8x8xf32>, vector<8x8xf32>, vector<8x8xf32> -> vector<8x8xf32>
    %79 = tpu.reciprocal %77 {approx = true} : vector<8x1xf32> -> vector<8x1xf32>
    %80 = vector.broadcast %79 : vector<8x1xf32> to vector<8x8xf32>
    %81 = arith.mulf %78, %80 : vector<8x8xf32>
    %82 = vector.extract_strided_slice %25 {offsets = [16, 0], sizes = [8, 32], strides = [1, 1]} : vector<32x32xf32> to vector<8x32xf32>
    %cst_44 = arith.constant dense<0.000000e+00> : vector<8x32xf32>
    %83 = tpu.matmul %81, %82, %cst_44 {dimension_numbers = #tpu.dot_dimension_numbers<[1], [0], [0], [1], [0, 0, 1, 1], [], []>} : vector<8x8xf32>, vector<8x32xf32>, vector<8x32xf32> -> vector<8x32xf32>
    %84 = arith.addf %64, %83 : vector<8x32xf32>
    %85 = vector.extract_strided_slice %14 {offsets = [0, 24], sizes = [8, 8], strides = [1, 1]} : vector<8x32xf32> to vector<8x8xf32>
    %86 = vector.extract_strided_slice %19 {offsets = [0, 24], sizes = [8, 8], strides = [1, 1]} : vector<8x32xf32> to vector<8x8xf32>
    %87 = vector.extract_strided_slice %24 {offsets = [0, 24], sizes = [8, 8], strides = [1, 1]} : vector<8x32xf32> to vector<8x8xf32>
    %cst_45 = arith.constant dense<0.000000e+00> : vector<8x8xf32>
    %88 = tpu.matmul %85, %86, %cst_45 {dimension_numbers = #tpu.dot_dimension_numbers<[1], [1], [0], [0], [0, 0, 1, 0], [], []>} : vector<8x8xf32>, vector<8x8xf32>, vector<8x8xf32> -> vector<8x8xf32>
    %cst_46 = arith.constant 0.353553385 : f32
    %89 = vector.broadcast %cst_46 : f32 to vector<8x8xf32>
    %90 = arith.mulf %88, %89 : vector<8x8xf32>
    %cst_47 = arith.constant dense<0xFF800000> : vector<8xf32>
    %91 = vector.multi_reduction <maximumf>, %90, %cst_47 [1] : vector<8x8xf32> to vector<8xf32>
    %92 = vector.shape_cast %91 : vector<8xf32> to vector<8x1xf32>
    %93 = vector.broadcast %92 : vector<8x1xf32> to vector<8x8xf32>
    %94 = arith.subf %90, %93 : vector<8x8xf32>
    %95 = math.exp %94 : vector<8x8xf32>
    %cst_48 = arith.constant dense<0.000000e+00> : vector<8xf32>
    %96 = vector.multi_reduction <add>, %95, %cst_48 [1] : vector<8x8xf32> to vector<8xf32>
    %97 = vector.shape_cast %96 : vector<8xf32> to vector<8x1xf32>
    %cst_49 = arith.constant dense<0.000000e+00> : vector<8x8xf32>
    %98 = tpu.matmul %95, %87, %cst_49 {dimension_numbers = #tpu.dot_dimension_numbers<[1], [0], [0], [1], [0, 0, 1, 1], [], []>} : vector<8x8xf32>, vector<8x8xf32>, vector<8x8xf32> -> vector<8x8xf32>
    %99 = tpu.reciprocal %97 {approx = true} : vector<8x1xf32> -> vector<8x1xf32>
    %100 = vector.broadcast %99 : vector<8x1xf32> to vector<8x8xf32>
    %101 = arith.mulf %98, %100 : vector<8x8xf32>
    %102 = vector.extract_strided_slice %25 {offsets = [24, 0], sizes = [8, 32], strides = [1, 1]} : vector<32x32xf32> to vector<8x32xf32>
    %cst_50 = arith.constant dense<0.000000e+00> : vector<8x32xf32>
    %103 = tpu.matmul %101, %102, %cst_50 {dimension_numbers = #tpu.dot_dimension_numbers<[1], [0], [0], [1], [0, 0, 1, 1], [], []>} : vector<8x8xf32>, vector<8x32xf32>, vector<8x32xf32> -> vector<8x32xf32>
    %104 = arith.addf %84, %103 : vector<8x32xf32>
    %105 = arith.addf %1, %104 : vector<8x32xf32>
    %c0_51 = arith.constant 0 : index
    %c0_52 = arith.constant 0 : index
    %106 = vector.load %arg12[%c0_51, %c0_52] : memref<1x32xf32, #tpu.memory_space<vmem>>, vector<1x32xf32>
    %107 = vector.broadcast %106 : vector<1x32xf32> to vector<8x32xf32>
    %108 = arith.addf %105, %107 : vector<8x32xf32>
    %c0_53 = arith.constant 0 : index
    %c0_54 = arith.constant 0 : index
    %109 = vector.load %arg13[%c0_53, %c0_54] : memref<1x32xf32, #tpu.memory_space<vmem>>, vector<1x32xf32>
    %c0_55 = arith.constant 0 : index
    %c0_56 = arith.constant 0 : index
    %110 = vector.load %arg14[%c0_55, %c0_56] : memref<1x32xf32, #tpu.memory_space<vmem>>, vector<1x32xf32>
    %cst_57 = arith.constant dense<0.000000e+00> : vector<8xf32>
    %111 = vector.multi_reduction <add>, %108, %cst_57 [1] : vector<8x32xf32> to vector<8xf32>
    %112 = vector.shape_cast %111 : vector<8xf32> to vector<8x1xf32>
    %cst_58 = arith.constant 3.200000e+01 : f32
    %113 = vector.broadcast %cst_58 : f32 to vector<8x1xf32>
    %114 = arith.divf %112, %113 : vector<8x1xf32>
    %115 = vector.broadcast %114 : vector<8x1xf32> to vector<8x32xf32>
    %116 = arith.subf %108, %115 : vector<8x32xf32>
    %117 = arith.mulf %116, %116 : vector<8x32xf32>
    %cst_59 = arith.constant dense<0.000000e+00> : vector<8xf32>
    %118 = vector.multi_reduction <add>, %117, %cst_59 [1] : vector<8x32xf32> to vector<8xf32>
    %119 = vector.shape_cast %118 : vector<8xf32> to vector<8x1xf32>
    %cst_60 = arith.constant 3.200000e+01 : f32
    %120 = vector.broadcast %cst_60 : f32 to vector<8x1xf32>
    %121 = arith.divf %119, %120 : vector<8x1xf32>
    %122 = vector.broadcast %114 : vector<8x1xf32> to vector<8x32xf32>
    %123 = arith.subf %108, %122 : vector<8x32xf32>
    %cst_61 = arith.constant 9.99999974E-6 : f32
    %124 = vector.broadcast %cst_61 : f32 to vector<8x1xf32>
    %125 = arith.addf %121, %124 : vector<8x1xf32>
    %126 = math.rsqrt %125 : vector<8x1xf32>
    %127 = vector.broadcast %126 : vector<8x1xf32> to vector<8x32xf32>
    %128 = arith.mulf %123, %127 : vector<8x32xf32>
    %129 = vector.broadcast %109 : vector<1x32xf32> to vector<8x32xf32>
    %130 = arith.mulf %128, %129 : vector<8x32xf32>
    %131 = vector.broadcast %110 : vector<1x32xf32> to vector<8x32xf32>
    %132 = arith.addf %130, %131 : vector<8x32xf32>
    %c0_62 = arith.constant 0 : index
    %c0_63 = arith.constant 0 : index
    %c0_64 = arith.constant 0 : index
    %133 = vector.load %arg15[%c0_62, %c0_63, %c0_64] : memref<1x8x32xf32, #tpu.memory_space<vmem>>, vector<1x8x32xf32>
    %134 = vector.shape_cast %133 : vector<1x8x32xf32> to vector<8x32xf32>
    %135 = vector.shape_cast %132 : vector<8x32xf32> to vector<1x8x32xf32>
    tpu.vector_store %arg15[%c0_62, %c0_63, %c0_64], %135 {strides = array<i32>} : memref<1x8x32xf32, #tpu.memory_space<vmem>>, vector<1x8x32xf32>,
    return
  }
  func.func @transform_0(%arg0: i32) -> (i32, i32, i32) {
    %c0_i32 = arith.constant 0 : i32
    %c0_i32_0 = arith.constant 0 : i32
    %c0_i32_1 = arith.constant 0 : i32
    return %arg0, %c0_i32, %c0_i32_0 : i32, i32, i32
  }
  func.func @transform_1(%arg0: i32) -> (i32, i32, i32) {
    %c0_i32 = arith.constant 0 : i32
    %c0_i32_0 = arith.constant 0 : i32
    %c0_i32_1 = arith.constant 0 : i32
    return %arg0, %c0_i32, %c0_i32_0 : i32, i32, i32
  }
  func.func @transform_2(%arg0: i32) -> (i32, i32, i32) {
    %c0_i32 = arith.constant 0 : i32
    %c0_i32_0 = arith.constant 0 : i32
    %c0_i32_1 = arith.constant 0 : i32
    return %arg0, %c0_i32, %c0_i32_0 : i32, i32, i32
  }
  func.func @transform_3(%arg0: i32) -> (i32, i32, i32) {
    %c0_i32 = arith.constant 0 : i32
    %c0_i32_0 = arith.constant 0 : i32
    %c0_i32_1 = arith.constant 0 : i32
    return %arg0, %c0_i32, %c0_i32_0 : i32, i32, i32
  }
  func.func @transform_4(%arg0: i32) -> (i32, i32) {
    %c0_i32 = arith.constant 0 : i32
    %c0_i32_0 = arith.constant 0 : i32
    %c0_i32_1 = arith.constant 0 : i32
    return %c0_i32, %c0_i32_0 : i32, i32
  }
  func.func @transform_5(%arg0: i32) -> (i32, i32) {
    %c0_i32 = arith.constant 0 : i32
    %c0_i32_0 = arith.constant 0 : i32
    %c0_i32_1 = arith.constant 0 : i32
    return %c0_i32, %c0_i32_0 : i32, i32
  }
  func.func @transform_6(%arg0: i32) -> (i32, i32) {
    %c0_i32 = arith.constant 0 : i32
    %c0_i32_0 = arith.constant 0 : i32
    %c0_i32_1 = arith.constant 0 : i32
    return %c0_i32, %c0_i32_0 : i32, i32
  }
  func.func @transform_7(%arg0: i32) -> (i32, i32) {
    %c0_i32 = arith.constant 0 : i32
    %c0_i32_0 = arith.constant 0 : i32
    %c0_i32_1 = arith.constant 0 : i32
    return %c0_i32, %c0_i32_0 : i32, i32
  }
  func.func @transform_8(%arg0: i32) -> (i32, i32) {
    %c0_i32 = arith.constant 0 : i32
    %c0_i32_0 = arith.constant 0 : i32
    %c0_i32_1 = arith.constant 0 : i32
    return %c0_i32, %c0_i32_0 : i32, i32
  }
  func.func @transform_9(%arg0: i32) -> (i32, i32) {
    %c0_i32 = arith.constant 0 : i32
    %c0_i32_0 = arith.constant 0 : i32
    %c0_i32_1 = arith.constant 0 : i32
    return %c0_i32, %c0_i32_0 : i32, i32
  }
  func.func @transform_10(%arg0: i32) -> (i32, i32) {
    %c0_i32 = arith.constant 0 : i32
    %c0_i32_0 = arith.constant 0 : i32
    %c0_i32_1 = arith.constant 0 : i32
    return %c0_i32, %c0_i32_0 : i32, i32
  }
  func.func @transform_11(%arg0: i32) -> (i32, i32) {
    %c0_i32 = arith.constant 0 : i32
    %c0_i32_0 = arith.constant 0 : i32
    %c0_i32_1 = arith.constant 0 : i32
    return %c0_i32, %c0_i32_0 : i32, i32
  }
  func.func @transform_12(%arg0: i32) -> (i32, i32) {
    %c0_i32 = arith.constant 0 : i32
    %c0_i32_0 = arith.constant 0 : i32
    %c0_i32_1 = arith.constant 0 : i32
    return %c0_i32, %c0_i32_0 : i32, i32
  }
  func.func @transform_13(%arg0: i32) -> (i32, i32) {
    %c0_i32 = arith.constant 0 : i32
    %c0_i32_0 = arith.constant 0 : i32
    %c0_i32_1 = arith.constant 0 : i32
    return %c0_i32, %c0_i32_0 : i32, i32
  }
  func.func @transform_14(%arg0: i32) -> (i32, i32, i32) {
    %c0_i32 = arith.constant 0 : i32
    %c0_i32_0 = arith.constant 0 : i32
    %c0_i32_1 = arith.constant 0 : i32
    return %arg0, %c0_i32, %c0_i32_0 : i32, i32, i32
  }
}

module attributes {stable_mosaic.version = 11 : i64} {
  func.func @_fused_ffn_kernel(%arg0: i32, %arg1: memref<1x8x32xf32, #tpu.memory_space<vmem>>, %arg2: memref<32x64xf32, #tpu.memory_space<vmem>>, %arg3: memref<1x64xf32, #tpu.memory_space<vmem>>, %arg4: memref<64x32xf32, #tpu.memory_space<vmem>>, %arg5: memref<1x32xf32, #tpu.memory_space<vmem>>, %arg6: memref<1x32xf32, #tpu.memory_space<vmem>>, %arg7: memref<1x32xf32, #tpu.memory_space<vmem>>, %arg8: memref<1x32xf32, #tpu.memory_space<vmem>>, %arg9: memref<1x32xf32, #tpu.memory_space<vmem>>, %arg10: memref<1x8x32xf32, #tpu.memory_space<vmem>>, %arg11: memref<1x8x32xf32, #tpu.memory_space<vmem>>) attributes {dimension_semantics = [#tpu.dimension_semantics<parallel>], iteration_bounds = array<i64: 2>, scalar_prefetch = 0 : i64, scratch_operands = 0 : i64, tpu.core_type = #tpu.core_type<tc>, window_params = [{transform_indices = @transform_0, window_bounds = array<i64: 1, 8, 32>}, {pipeline_mode = #tpu.pipeline_mode<synchronous>, transform_indices = @transform_1, window_bounds = array<i64: 32, 64>}, {pipeline_mode = #tpu.pipeline_mode<synchronous>, transform_indices = @transform_2, window_bounds = array<i64: 1, 64>}, {pipeline_mode = #tpu.pipeline_mode<synchronous>, transform_indices = @transform_3, window_bounds = array<i64: 64, 32>}, {pipeline_mode = #tpu.pipeline_mode<synchronous>, transform_indices = @transform_4, window_bounds = array<i64: 1, 32>}, {pipeline_mode = #tpu.pipeline_mode<synchronous>, transform_indices = @transform_5, window_bounds = array<i64: 1, 32>}, {pipeline_mode = #tpu.pipeline_mode<synchronous>, transform_indices = @transform_6, window_bounds = array<i64: 1, 32>}, {pipeline_mode = #tpu.pipeline_mode<synchronous>, transform_indices = @transform_7, window_bounds = array<i64: 1, 32>}, {pipeline_mode = #tpu.pipeline_mode<synchronous>, transform_indices = @transform_8, window_bounds = array<i64: 1, 32>}, {transform_indices = @transform_9, window_bounds = array<i64: 1, 8, 32>}, {transform_indices = @transform_10, window_bounds = array<i64: 1, 8, 32>}]} {
    %c0 = arith.constant 0 : index
    %c0_0 = arith.constant 0 : index
    %c0_1 = arith.constant 0 : index
    %0 = vector.load %arg1[%c0, %c0_0, %c0_1] : memref<1x8x32xf32, #tpu.memory_space<vmem>>, vector<1x8x32xf32>
    %1 = vector.shape_cast %0 : vector<1x8x32xf32> to vector<8x32xf32>
    %c0_2 = arith.constant 0 : index
    %c0_3 = arith.constant 0 : index
    %2 = vector.load %arg2[%c0_2, %c0_3] : memref<32x64xf32, #tpu.memory_space<vmem>>, vector<32x64xf32>
    %cst = arith.constant dense<0.000000e+00> : vector<8x64xf32>
    %3 = tpu.matmul %1, %2, %cst {dimension_numbers = #tpu.dot_dimension_numbers<[1], [0], [0], [1], [0, 0, 1, 1], [], []>} : vector<8x32xf32>, vector<32x64xf32>, vector<8x64xf32> -> vector<8x64xf32>
    %c0_4 = arith.constant 0 : index
    %c0_5 = arith.constant 0 : index
    %4 = vector.load %arg3[%c0_4, %c0_5] : memref<1x64xf32, #tpu.memory_space<vmem>>, vector<1x64xf32>
    %5 = vector.broadcast %4 : vector<1x64xf32> to vector<8x64xf32>
    %6 = arith.addf %3, %5 : vector<8x64xf32>
    %cst_6 = arith.constant 0.000000e+00 : f32
    %7 = vector.broadcast %cst_6 : f32 to vector<8x64xf32>
    %8 = arith.maximumf %6, %7 : vector<8x64xf32>
    %c0_7 = arith.constant 0 : index
    %c0_8 = arith.constant 0 : index
    %9 = vector.load %arg4[%c0_7, %c0_8] : memref<64x32xf32, #tpu.memory_space<vmem>>, vector<64x32xf32>
    %cst_9 = arith.constant dense<0.000000e+00> : vector<8x32xf32>
    %10 = tpu.matmul %8, %9, %cst_9 {dimension_numbers = #tpu.dot_dimension_numbers<[1], [0], [0], [1], [0, 0, 1, 1], [], []>} : vector<8x64xf32>, vector<64x32xf32>, vector<8x32xf32> -> vector<8x32xf32>
    %c0_10 = arith.constant 0 : index
    %c0_11 = arith.constant 0 : index
    %11 = vector.load %arg5[%c0_10, %c0_11] : memref<1x32xf32, #tpu.memory_space<vmem>>, vector<1x32xf32>
    %12 = vector.broadcast %11 : vector<1x32xf32> to vector<8x32xf32>
    %13 = arith.addf %10, %12 : vector<8x32xf32>
    %14 = arith.addf %1, %13 : vector<8x32xf32>
    %c0_12 = arith.constant 0 : index
    %c0_13 = arith.constant 0 : index
    %15 = vector.load %arg6[%c0_12, %c0_13] : memref<1x32xf32, #tpu.memory_space<vmem>>, vector<1x32xf32>
    %c0_14 = arith.constant 0 : index
    %c0_15 = arith.constant 0 : index
    %16 = vector.load %arg7[%c0_14, %c0_15] : memref<1x32xf32, #tpu.memory_space<vmem>>, vector<1x32xf32>
    %cst_16 = arith.constant dense<0.000000e+00> : vector<8xf32>
    %17 = vector.multi_reduction <add>, %14, %cst_16 [1] : vector<8x32xf32> to vector<8xf32>
    %18 = vector.shape_cast %17 : vector<8xf32> to vector<8x1xf32>
    %cst_17 = arith.constant 3.200000e+01 : f32
    %19 = vector.broadcast %cst_17 : f32 to vector<8x1xf32>
    %20 = arith.divf %18, %19 : vector<8x1xf32>
    %21 = vector.broadcast %20 : vector<8x1xf32> to vector<8x32xf32>
    %22 = arith.subf %14, %21 : vector<8x32xf32>
    %23 = arith.mulf %22, %22 : vector<8x32xf32>
    %cst_18 = arith.constant dense<0.000000e+00> : vector<8xf32>
    %24 = vector.multi_reduction <add>, %23, %cst_18 [1] : vector<8x32xf32> to vector<8xf32>
    %25 = vector.shape_cast %24 : vector<8xf32> to vector<8x1xf32>
    %cst_19 = arith.constant 3.200000e+01 : f32
    %26 = vector.broadcast %cst_19 : f32 to vector<8x1xf32>
    %27 = arith.divf %25, %26 : vector<8x1xf32>
    %28 = vector.broadcast %20 : vector<8x1xf32> to vector<8x32xf32>
    %29 = arith.subf %14, %28 : vector<8x32xf32>
    %cst_20 = arith.constant 9.99999974E-6 : f32
    %30 = vector.broadcast %cst_20 : f32 to vector<8x1xf32>
    %31 = arith.addf %27, %30 : vector<8x1xf32>
    %32 = math.rsqrt %31 : vector<8x1xf32>
    %33 = vector.broadcast %32 : vector<8x1xf32> to vector<8x32xf32>
    %34 = arith.mulf %29, %33 : vector<8x32xf32>
    %35 = vector.broadcast %15 : vector<1x32xf32> to vector<8x32xf32>
    %36 = arith.mulf %34, %35 : vector<8x32xf32>
    %37 = vector.broadcast %16 : vector<1x32xf32> to vector<8x32xf32>
    %38 = arith.addf %36, %37 : vector<8x32xf32>
    %c0_21 = arith.constant 0 : index
    %c0_22 = arith.constant 0 : index
    %c0_23 = arith.constant 0 : index
    %39 = vector.load %arg10[%c0_21, %c0_22, %c0_23] : memref<1x8x32xf32, #tpu.memory_space<vmem>>, vector<1x8x32xf32>
    %40 = vector.shape_cast %39 : vector<1x8x32xf32> to vector<8x32xf32>
    %41 = vector.shape_cast %38 : vector<8x32xf32> to vector<1x8x32xf32>
    tpu.vector_store %arg10[%c0_21, %c0_22, %c0_23], %41 {strides = array<i32>} : memref<1x8x32xf32, #tpu.memory_space<vmem>>, vector<1x8x32xf32>,
    %c0_24 = arith.constant 0 : index
    %c0_25 = arith.constant 0 : index
    %42 = vector.load %arg8[%c0_24, %c0_25] : memref<1x32xf32, #tpu.memory_space<vmem>>, vector<1x32xf32>
    %c0_26 = arith.constant 0 : index
    %c0_27 = arith.constant 0 : index
    %43 = vector.load %arg9[%c0_26, %c0_27] : memref<1x32xf32, #tpu.memory_space<vmem>>, vector<1x32xf32>
    %cst_28 = arith.constant dense<0.000000e+00> : vector<8xf32>
    %44 = vector.multi_reduction <add>, %38, %cst_28 [1] : vector<8x32xf32> to vector<8xf32>
    %45 = vector.shape_cast %44 : vector<8xf32> to vector<8x1xf32>
    %cst_29 = arith.constant 3.200000e+01 : f32
    %46 = vector.broadcast %cst_29 : f32 to vector<8x1xf32>
    %47 = arith.divf %45, %46 : vector<8x1xf32>
    %48 = vector.broadcast %47 : vector<8x1xf32> to vector<8x32xf32>
    %49 = arith.subf %38, %48 : vector<8x32xf32>
    %50 = arith.mulf %49, %49 : vector<8x32xf32>
    %cst_30 = arith.constant dense<0.000000e+00> : vector<8xf32>
    %51 = vector.multi_reduction <add>, %50, %cst_30 [1] : vector<8x32xf32> to vector<8xf32>
    %52 = vector.shape_cast %51 : vector<8xf32> to vector<8x1xf32>
    %cst_31 = arith.constant 3.200000e+01 : f32
    %53 = vector.broadcast %cst_31 : f32 to vector<8x1xf32>
    %54 = arith.divf %52, %53 : vector<8x1xf32>
    %55 = vector.broadcast %47 : vector<8x1xf32> to vector<8x32xf32>
    %56 = arith.subf %38, %55 : vector<8x32xf32>
    %cst_32 = arith.constant 9.99999974E-6 : f32
    %57 = vector.broadcast %cst_32 : f32 to vector<8x1xf32>
    %58 = arith.addf %54, %57 : vector<8x1xf32>
    %59 = math.rsqrt %58 : vector<8x1xf32>
    %60 = vector.broadcast %59 : vector<8x1xf32> to vector<8x32xf32>
    %61 = arith.mulf %56, %60 : vector<8x32xf32>
    %62 = vector.broadcast %42 : vector<1x32xf32> to vector<8x32xf32>
    %63 = arith.mulf %61, %62 : vector<8x32xf32>
    %64 = vector.broadcast %43 : vector<1x32xf32> to vector<8x32xf32>
    %65 = arith.addf %63, %64 : vector<8x32xf32>
    %c0_33 = arith.constant 0 : index
    %c0_34 = arith.constant 0 : index
    %c0_35 = arith.constant 0 : index
    %66 = vector.load %arg11[%c0_33, %c0_34, %c0_35] : memref<1x8x32xf32, #tpu.memory_space<vmem>>, vector<1x8x32xf32>
    %67 = vector.shape_cast %66 : vector<1x8x32xf32> to vector<8x32xf32>
    %68 = vector.shape_cast %65 : vector<8x32xf32> to vector<1x8x32xf32>
    tpu.vector_store %arg11[%c0_33, %c0_34, %c0_35], %68 {strides = array<i32>} : memref<1x8x32xf32, #tpu.memory_space<vmem>>, vector<1x8x32xf32>,
    return
  }
  func.func @transform_0(%arg0: i32) -> (i32, i32, i32) {
    %c0_i32 = arith.constant 0 : i32
    %c0_i32_0 = arith.constant 0 : i32
    %c0_i32_1 = arith.constant 0 : i32
    return %arg0, %c0_i32, %c0_i32_0 : i32, i32, i32
  }
  func.func @transform_1(%arg0: i32) -> (i32, i32) {
    %c0_i32 = arith.constant 0 : i32
    %c0_i32_0 = arith.constant 0 : i32
    %c0_i32_1 = arith.constant 0 : i32
    return %c0_i32, %c0_i32_0 : i32, i32
  }
  func.func @transform_2(%arg0: i32) -> (i32, i32) {
    %c0_i32 = arith.constant 0 : i32
    %c0_i32_0 = arith.constant 0 : i32
    %c0_i32_1 = arith.constant 0 : i32
    return %c0_i32, %c0_i32_0 : i32, i32
  }
  func.func @transform_3(%arg0: i32) -> (i32, i32) {
    %c0_i32 = arith.constant 0 : i32
    %c0_i32_0 = arith.constant 0 : i32
    %c0_i32_1 = arith.constant 0 : i32
    return %c0_i32, %c0_i32_0 : i32, i32
  }
  func.func @transform_4(%arg0: i32) -> (i32, i32) {
    %c0_i32 = arith.constant 0 : i32
    %c0_i32_0 = arith.constant 0 : i32
    %c0_i32_1 = arith.constant 0 : i32
    return %c0_i32, %c0_i32_0 : i32, i32
  }
  func.func @transform_5(%arg0: i32) -> (i32, i32) {
    %c0_i32 = arith.constant 0 : i32
    %c0_i32_0 = arith.constant 0 : i32
    %c0_i32_1 = arith.constant 0 : i32
    return %c0_i32, %c0_i32_0 : i32, i32
  }
  func.func @transform_6(%arg0: i32) -> (i32, i32) {
    %c0_i32 = arith.constant 0 : i32
    %c0_i32_0 = arith.constant 0 : i32
    %c0_i32_1 = arith.constant 0 : i32
    return %c0_i32, %c0_i32_0 : i32, i32
  }
  func.func @transform_7(%arg0: i32) -> (i32, i32) {
    %c0_i32 = arith.constant 0 : i32
    %c0_i32_0 = arith.constant 0 : i32
    %c0_i32_1 = arith.constant 0 : i32
    return %c0_i32, %c0_i32_0 : i32, i32
  }
  func.func @transform_8(%arg0: i32) -> (i32, i32) {
    %c0_i32 = arith.constant 0 : i32
    %c0_i32_0 = arith.constant 0 : i32
    %c0_i32_1 = arith.constant 0 : i32
    return %c0_i32, %c0_i32_0 : i32, i32
  }
  func.func @transform_9(%arg0: i32) -> (i32, i32, i32) {
    %c0_i32 = arith.constant 0 : i32
    %c0_i32_0 = arith.constant 0 : i32
    %c0_i32_1 = arith.constant 0 : i32
    return %arg0, %c0_i32, %c0_i32_0 : i32, i32, i32
  }
  func.func @transform_10(%arg0: i32) -> (i32, i32, i32) {
    %c0_i32 = arith.constant 0 : i32
    %c0_i32_0 = arith.constant 0 : i32
    %c0_i32_1 = arith.constant 0 : i32
    return %arg0, %c0_i32, %c0_i32_0 : i32, i32, i32
  }
}

module attributes {stable_mosaic.version = 11 : i64} {
  func.func @_fused_attn_kernel(%arg0: i32, %arg1: memref<1x8x32xf32, #tpu.memory_space<vmem>>, %arg2: memref<1x8x32xf32, #tpu.memory_space<vmem>>, %arg3: memref<1x8x32xf32, #tpu.memory_space<vmem>>, %arg4: memref<1x8x32xf32, #tpu.memory_space<vmem>>, %arg5: memref<32x32xf32, #tpu.memory_space<vmem>>, %arg6: memref<1x32xf32, #tpu.memory_space<vmem>>, %arg7: memref<32x32xf32, #tpu.memory_space<vmem>>, %arg8: memref<1x32xf32, #tpu.memory_space<vmem>>, %arg9: memref<32x32xf32, #tpu.memory_space<vmem>>, %arg10: memref<1x32xf32, #tpu.memory_space<vmem>>, %arg11: memref<32x32xf32, #tpu.memory_space<vmem>>, %arg12: memref<1x32xf32, #tpu.memory_space<vmem>>, %arg13: memref<1x32xf32, #tpu.memory_space<vmem>>, %arg14: memref<1x32xf32, #tpu.memory_space<vmem>>, %arg15: memref<1x8x32xf32, #tpu.memory_space<vmem>>) attributes {dimension_semantics = [#tpu.dimension_semantics<parallel>], iteration_bounds = array<i64: 2>, scalar_prefetch = 0 : i64, scratch_operands = 0 : i64, tpu.core_type = #tpu.core_type<tc>, window_params = [{transform_indices = @transform_0, window_bounds = array<i64: 1, 8, 32>}, {transform_indices = @transform_1, window_bounds = array<i64: 1, 8, 32>}, {transform_indices = @transform_2, window_bounds = array<i64: 1, 8, 32>}, {transform_indices = @transform_3, window_bounds = array<i64: 1, 8, 32>}, {pipeline_mode = #tpu.pipeline_mode<synchronous>, transform_indices = @transform_4, window_bounds = array<i64: 32, 32>}, {pipeline_mode = #tpu.pipeline_mode<synchronous>, transform_indices = @transform_5, window_bounds = array<i64: 1, 32>}, {pipeline_mode = #tpu.pipeline_mode<synchronous>, transform_indices = @transform_6, window_bounds = array<i64: 32, 32>}, {pipeline_mode = #tpu.pipeline_mode<synchronous>, transform_indices = @transform_7, window_bounds = array<i64: 1, 32>}, {pipeline_mode = #tpu.pipeline_mode<synchronous>, transform_indices = @transform_8, window_bounds = array<i64: 32, 32>}, {pipeline_mode = #tpu.pipeline_mode<synchronous>, transform_indices = @transform_9, window_bounds = array<i64: 1, 32>}, {pipeline_mode = #tpu.pipeline_mode<synchronous>, transform_indices = @transform_10, window_bounds = array<i64: 32, 32>}, {pipeline_mode = #tpu.pipeline_mode<synchronous>, transform_indices = @transform_11, window_bounds = array<i64: 1, 32>}, {pipeline_mode = #tpu.pipeline_mode<synchronous>, transform_indices = @transform_12, window_bounds = array<i64: 1, 32>}, {pipeline_mode = #tpu.pipeline_mode<synchronous>, transform_indices = @transform_13, window_bounds = array<i64: 1, 32>}, {transform_indices = @transform_14, window_bounds = array<i64: 1, 8, 32>}]} {
    %c0 = arith.constant 0 : index
    %c0_0 = arith.constant 0 : index
    %c0_1 = arith.constant 0 : index
    %0 = vector.load %arg1[%c0, %c0_0, %c0_1] : memref<1x8x32xf32, #tpu.memory_space<vmem>>, vector<1x8x32xf32>
    %1 = vector.shape_cast %0 : vector<1x8x32xf32> to vector<8x32xf32>
    %c0_2 = arith.constant 0 : index
    %c0_3 = arith.constant 0 : index
    %c0_4 = arith.constant 0 : index
    %2 = vector.load %arg2[%c0_2, %c0_3, %c0_4] : memref<1x8x32xf32, #tpu.memory_space<vmem>>, vector<1x8x32xf32>
    %3 = vector.shape_cast %2 : vector<1x8x32xf32> to vector<8x32xf32>
    %4 = arith.addf %1, %3 : vector<8x32xf32>
    %c0_5 = arith.constant 0 : index
    %c0_6 = arith.constant 0 : index
    %c0_7 = arith.constant 0 : index
    %5 = vector.load %arg3[%c0_5, %c0_6, %c0_7] : memref<1x8x32xf32, #tpu.memory_space<vmem>>, vector<1x8x32xf32>
    %6 = vector.shape_cast %5 : vector<1x8x32xf32> to vector<8x32xf32>
    %c0_8 = arith.constant 0 : index
    %c0_9 = arith.constant 0 : index
    %c0_10 = arith.constant 0 : index
    %7 = vector.load %arg4[%c0_8, %c0_9, %c0_10] : memref<1x8x32xf32, #tpu.memory_space<vmem>>, vector<1x8x32xf32>
    %8 = vector.shape_cast %7 : vector<1x8x32xf32> to vector<8x32xf32>
    %9 = arith.addf %6, %8 : vector<8x32xf32>
    %c0_11 = arith.constant 0 : index
    %c0_12 = arith.constant 0 : index
    %10 = vector.load %arg5[%c0_11, %c0_12] : memref<32x32xf32, #tpu.memory_space<vmem>>, vector<32x32xf32>
    %cst = arith.constant dense<0.000000e+00> : vector<8x32xf32>
    %11 = tpu.matmul %4, %10, %cst {dimension_numbers = #tpu.dot_dimension_numbers<[1], [0], [0], [1], [0, 0, 1, 1], [], []>} : vector<8x32xf32>, vector<32x32xf32>, vector<8x32xf32> -> vector<8x32xf32>
    %c0_13 = arith.constant 0 : index
    %c0_14 = arith.constant 0 : index
    %12 = vector.load %arg6[%c0_13, %c0_14] : memref<1x32xf32, #tpu.memory_space<vmem>>, vector<1x32xf32>
    %13 = vector.broadcast %12 : vector<1x32xf32> to vector<8x32xf32>
    %14 = arith.addf %11, %13 : vector<8x32xf32>
    %c0_15 = arith.constant 0 : index
    %c0_16 = arith.constant 0 : index
    %15 = vector.load %arg7[%c0_15, %c0_16] : memref<32x32xf32, #tpu.memory_space<vmem>>, vector<32x32xf32>
    %cst_17 = arith.constant dense<0.000000e+00> : vector<8x32xf32>
    %16 = tpu.matmul %9, %15, %cst_17 {dimension_numbers = #tpu.dot_dimension_numbers<[1], [0], [0], [1], [0, 0, 1, 1], [], []>} : vector<8x32xf32>, vector<32x32xf32>, vector<8x32xf32> -> vector<8x32xf32>
    %c0_18 = arith.constant 0 : index
    %c0_19 = arith.constant 0 : index
    %17 = vector.load %arg8[%c0_18, %c0_19] : memref<1x32xf32, #tpu.memory_space<vmem>>, vector<1x32xf32>
    %18 = vector.broadcast %17 : vector<1x32xf32> to vector<8x32xf32>
    %19 = arith.addf %16, %18 : vector<8x32xf32>
    %c0_20 = arith.constant 0 : index
    %c0_21 = arith.constant 0 : index
    %20 = vector.load %arg9[%c0_20, %c0_21] : memref<32x32xf32, #tpu.memory_space<vmem>>, vector<32x32xf32>
    %cst_22 = arith.constant dense<0.000000e+00> : vector<8x32xf32>
    %21 = tpu.matmul %6, %20, %cst_22 {dimension_numbers = #tpu.dot_dimension_numbers<[1], [0], [0], [1], [0, 0, 1, 1], [], []>} : vector<8x32xf32>, vector<32x32xf32>, vector<8x32xf32> -> vector<8x32xf32>
    %c0_23 = arith.constant 0 : index
    %c0_24 = arith.constant 0 : index
    %22 = vector.load %arg10[%c0_23, %c0_24] : memref<1x32xf32, #tpu.memory_space<vmem>>, vector<1x32xf32>
    %23 = vector.broadcast %22 : vector<1x32xf32> to vector<8x32xf32>
    %24 = arith.addf %21, %23 : vector<8x32xf32>
    %c0_25 = arith.constant 0 : index
    %c0_26 = arith.constant 0 : index
    %25 = vector.load %arg11[%c0_25, %c0_26] : memref<32x32xf32, #tpu.memory_space<vmem>>, vector<32x32xf32>
    %26 = vector.extract_strided_slice %14 {offsets = [0, 0], sizes = [8, 8], strides = [1, 1]} : vector<8x32xf32> to vector<8x8xf32>
    %27 = vector.extract_strided_slice %19 {offsets = [0, 0], sizes = [8, 8], strides = [1, 1]} : vector<8x32xf32> to vector<8x8xf32>
    %28 = vector.extract_strided_slice %24 {offsets = [0, 0], sizes = [8, 8], strides = [1, 1]} : vector<8x32xf32> to vector<8x8xf32>
    %cst_27 = arith.constant dense<0.000000e+00> : vector<8x8xf32>
    %29 = tpu.matmul %26, %27, %cst_27 {dimension_numbers = #tpu.dot_dimension_numbers<[1], [1], [0], [0], [0, 0, 1, 0], [], []>} : vector<8x8xf32>, vector<8x8xf32>, vector<8x8xf32> -> vector<8x8xf32>
    %cst_28 = arith.constant 0.353553385 : f32
    %30 = vector.broadcast %cst_28 : f32 to vector<8x8xf32>
    %31 = arith.mulf %29, %30 : vector<8x8xf32>
    %cst_29 = arith.constant dense<0xFF800000> : vector<8xf32>
    %32 = vector.multi_reduction <maximumf>, %31, %cst_29 [1] : vector<8x8xf32> to vector<8xf32>
    %33 = vector.shape_cast %32 : vector<8xf32> to vector<8x1xf32>
    %34 = vector.broadcast %33 : vector<8x1xf32> to vector<8x8xf32>
    %35 = arith.subf %31, %34 : vector<8x8xf32>
    %36 = math.exp %35 : vector<8x8xf32>
    %cst_30 = arith.constant dense<0.000000e+00> : vector<8xf32>
    %37 = vector.multi_reduction <add>, %36, %cst_30 [1] : vector<8x8xf32> to vector<8xf32>
    %38 = vector.shape_cast %37 : vector<8xf32> to vector<8x1xf32>
    %cst_31 = arith.constant dense<0.000000e+00> : vector<8x8xf32>
    %39 = tpu.matmul %36, %28, %cst_31 {dimension_numbers = #tpu.dot_dimension_numbers<[1], [0], [0], [1], [0, 0, 1, 1], [], []>} : vector<8x8xf32>, vector<8x8xf32>, vector<8x8xf32> -> vector<8x8xf32>
    %40 = tpu.reciprocal %38 {approx = true} : vector<8x1xf32> -> vector<8x1xf32>
    %41 = vector.broadcast %40 : vector<8x1xf32> to vector<8x8xf32>
    %42 = arith.mulf %39, %41 : vector<8x8xf32>
    %43 = vector.extract_strided_slice %25 {offsets = [0, 0], sizes = [8, 32], strides = [1, 1]} : vector<32x32xf32> to vector<8x32xf32>
    %cst_32 = arith.constant dense<0.000000e+00> : vector<8x32xf32>
    %44 = tpu.matmul %42, %43, %cst_32 {dimension_numbers = #tpu.dot_dimension_numbers<[1], [0], [0], [1], [0, 0, 1, 1], [], []>} : vector<8x8xf32>, vector<8x32xf32>, vector<8x32xf32> -> vector<8x32xf32>
    %45 = vector.extract_strided_slice %14 {offsets = [0, 8], sizes = [8, 8], strides = [1, 1]} : vector<8x32xf32> to vector<8x8xf32>
    %46 = vector.extract_strided_slice %19 {offsets = [0, 8], sizes = [8, 8], strides = [1, 1]} : vector<8x32xf32> to vector<8x8xf32>
    %47 = vector.extract_strided_slice %24 {offsets = [0, 8], sizes = [8, 8], strides = [1, 1]} : vector<8x32xf32> to vector<8x8xf32>
    %cst_33 = arith.constant dense<0.000000e+00> : vector<8x8xf32>
    %48 = tpu.matmul %45, %46, %cst_33 {dimension_numbers = #tpu.dot_dimension_numbers<[1], [1], [0], [0], [0, 0, 1, 0], [], []>} : vector<8x8xf32>, vector<8x8xf32>, vector<8x8xf32> -> vector<8x8xf32>
    %cst_34 = arith.constant 0.353553385 : f32
    %49 = vector.broadcast %cst_34 : f32 to vector<8x8xf32>
    %50 = arith.mulf %48, %49 : vector<8x8xf32>
    %cst_35 = arith.constant dense<0xFF800000> : vector<8xf32>
    %51 = vector.multi_reduction <maximumf>, %50, %cst_35 [1] : vector<8x8xf32> to vector<8xf32>
    %52 = vector.shape_cast %51 : vector<8xf32> to vector<8x1xf32>
    %53 = vector.broadcast %52 : vector<8x1xf32> to vector<8x8xf32>
    %54 = arith.subf %50, %53 : vector<8x8xf32>
    %55 = math.exp %54 : vector<8x8xf32>
    %cst_36 = arith.constant dense<0.000000e+00> : vector<8xf32>
    %56 = vector.multi_reduction <add>, %55, %cst_36 [1] : vector<8x8xf32> to vector<8xf32>
    %57 = vector.shape_cast %56 : vector<8xf32> to vector<8x1xf32>
    %cst_37 = arith.constant dense<0.000000e+00> : vector<8x8xf32>
    %58 = tpu.matmul %55, %47, %cst_37 {dimension_numbers = #tpu.dot_dimension_numbers<[1], [0], [0], [1], [0, 0, 1, 1], [], []>} : vector<8x8xf32>, vector<8x8xf32>, vector<8x8xf32> -> vector<8x8xf32>
    %59 = tpu.reciprocal %57 {approx = true} : vector<8x1xf32> -> vector<8x1xf32>
    %60 = vector.broadcast %59 : vector<8x1xf32> to vector<8x8xf32>
    %61 = arith.mulf %58, %60 : vector<8x8xf32>
    %62 = vector.extract_strided_slice %25 {offsets = [8, 0], sizes = [8, 32], strides = [1, 1]} : vector<32x32xf32> to vector<8x32xf32>
    %cst_38 = arith.constant dense<0.000000e+00> : vector<8x32xf32>
    %63 = tpu.matmul %61, %62, %cst_38 {dimension_numbers = #tpu.dot_dimension_numbers<[1], [0], [0], [1], [0, 0, 1, 1], [], []>} : vector<8x8xf32>, vector<8x32xf32>, vector<8x32xf32> -> vector<8x32xf32>
    %64 = arith.addf %44, %63 : vector<8x32xf32>
    %65 = vector.extract_strided_slice %14 {offsets = [0, 16], sizes = [8, 8], strides = [1, 1]} : vector<8x32xf32> to vector<8x8xf32>
    %66 = vector.extract_strided_slice %19 {offsets = [0, 16], sizes = [8, 8], strides = [1, 1]} : vector<8x32xf32> to vector<8x8xf32>
    %67 = vector.extract_strided_slice %24 {offsets = [0, 16], sizes = [8, 8], strides = [1, 1]} : vector<8x32xf32> to vector<8x8xf32>
    %cst_39 = arith.constant dense<0.000000e+00> : vector<8x8xf32>
    %68 = tpu.matmul %65, %66, %cst_39 {dimension_numbers = #tpu.dot_dimension_numbers<[1], [1], [0], [0], [0, 0, 1, 0], [], []>} : vector<8x8xf32>, vector<8x8xf32>, vector<8x8xf32> -> vector<8x8xf32>
    %cst_40 = arith.constant 0.353553385 : f32
    %69 = vector.broadcast %cst_40 : f32 to vector<8x8xf32>
    %70 = arith.mulf %68, %69 : vector<8x8xf32>
    %cst_41 = arith.constant dense<0xFF800000> : vector<8xf32>
    %71 = vector.multi_reduction <maximumf>, %70, %cst_41 [1] : vector<8x8xf32> to vector<8xf32>
    %72 = vector.shape_cast %71 : vector<8xf32> to vector<8x1xf32>
    %73 = vector.broadcast %72 : vector<8x1xf32> to vector<8x8xf32>
    %74 = arith.subf %70, %73 : vector<8x8xf32>
    %75 = math.exp %74 : vector<8x8xf32>
    %cst_42 = arith.constant dense<0.000000e+00> : vector<8xf32>
    %76 = vector.multi_reduction <add>, %75, %cst_42 [1] : vector<8x8xf32> to vector<8xf32>
    %77 = vector.shape_cast %76 : vector<8xf32> to vector<8x1xf32>
    %cst_43 = arith.constant dense<0.000000e+00> : vector<8x8xf32>
    %78 = tpu.matmul %75, %67, %cst_43 {dimension_numbers = #tpu.dot_dimension_numbers<[1], [0], [0], [1], [0, 0, 1, 1], [], []>} : vector<8x8xf32>, vector<8x8xf32>, vector<8x8xf32> -> vector<8x8xf32>
    %79 = tpu.reciprocal %77 {approx = true} : vector<8x1xf32> -> vector<8x1xf32>
    %80 = vector.broadcast %79 : vector<8x1xf32> to vector<8x8xf32>
    %81 = arith.mulf %78, %80 : vector<8x8xf32>
    %82 = vector.extract_strided_slice %25 {offsets = [16, 0], sizes = [8, 32], strides = [1, 1]} : vector<32x32xf32> to vector<8x32xf32>
    %cst_44 = arith.constant dense<0.000000e+00> : vector<8x32xf32>
    %83 = tpu.matmul %81, %82, %cst_44 {dimension_numbers = #tpu.dot_dimension_numbers<[1], [0], [0], [1], [0, 0, 1, 1], [], []>} : vector<8x8xf32>, vector<8x32xf32>, vector<8x32xf32> -> vector<8x32xf32>
    %84 = arith.addf %64, %83 : vector<8x32xf32>
    %85 = vector.extract_strided_slice %14 {offsets = [0, 24], sizes = [8, 8], strides = [1, 1]} : vector<8x32xf32> to vector<8x8xf32>
    %86 = vector.extract_strided_slice %19 {offsets = [0, 24], sizes = [8, 8], strides = [1, 1]} : vector<8x32xf32> to vector<8x8xf32>
    %87 = vector.extract_strided_slice %24 {offsets = [0, 24], sizes = [8, 8], strides = [1, 1]} : vector<8x32xf32> to vector<8x8xf32>
    %cst_45 = arith.constant dense<0.000000e+00> : vector<8x8xf32>
    %88 = tpu.matmul %85, %86, %cst_45 {dimension_numbers = #tpu.dot_dimension_numbers<[1], [1], [0], [0], [0, 0, 1, 0], [], []>} : vector<8x8xf32>, vector<8x8xf32>, vector<8x8xf32> -> vector<8x8xf32>
    %cst_46 = arith.constant 0.353553385 : f32
    %89 = vector.broadcast %cst_46 : f32 to vector<8x8xf32>
    %90 = arith.mulf %88, %89 : vector<8x8xf32>
    %cst_47 = arith.constant dense<0xFF800000> : vector<8xf32>
    %91 = vector.multi_reduction <maximumf>, %90, %cst_47 [1] : vector<8x8xf32> to vector<8xf32>
    %92 = vector.shape_cast %91 : vector<8xf32> to vector<8x1xf32>
    %93 = vector.broadcast %92 : vector<8x1xf32> to vector<8x8xf32>
    %94 = arith.subf %90, %93 : vector<8x8xf32>
    %95 = math.exp %94 : vector<8x8xf32>
    %cst_48 = arith.constant dense<0.000000e+00> : vector<8xf32>
    %96 = vector.multi_reduction <add>, %95, %cst_48 [1] : vector<8x8xf32> to vector<8xf32>
    %97 = vector.shape_cast %96 : vector<8xf32> to vector<8x1xf32>
    %cst_49 = arith.constant dense<0.000000e+00> : vector<8x8xf32>
    %98 = tpu.matmul %95, %87, %cst_49 {dimension_numbers = #tpu.dot_dimension_numbers<[1], [0], [0], [1], [0, 0, 1, 1], [], []>} : vector<8x8xf32>, vector<8x8xf32>, vector<8x8xf32> -> vector<8x8xf32>
    %99 = tpu.reciprocal %97 {approx = true} : vector<8x1xf32> -> vector<8x1xf32>
    %100 = vector.broadcast %99 : vector<8x1xf32> to vector<8x8xf32>
    %101 = arith.mulf %98, %100 : vector<8x8xf32>
    %102 = vector.extract_strided_slice %25 {offsets = [24, 0], sizes = [8, 32], strides = [1, 1]} : vector<32x32xf32> to vector<8x32xf32>
    %cst_50 = arith.constant dense<0.000000e+00> : vector<8x32xf32>
    %103 = tpu.matmul %101, %102, %cst_50 {dimension_numbers = #tpu.dot_dimension_numbers<[1], [0], [0], [1], [0, 0, 1, 1], [], []>} : vector<8x8xf32>, vector<8x32xf32>, vector<8x32xf32> -> vector<8x32xf32>
    %104 = arith.addf %84, %103 : vector<8x32xf32>
    %105 = arith.addf %1, %104 : vector<8x32xf32>
    %c0_51 = arith.constant 0 : index
    %c0_52 = arith.constant 0 : index
    %106 = vector.load %arg12[%c0_51, %c0_52] : memref<1x32xf32, #tpu.memory_space<vmem>>, vector<1x32xf32>
    %107 = vector.broadcast %106 : vector<1x32xf32> to vector<8x32xf32>
    %108 = arith.addf %105, %107 : vector<8x32xf32>
    %c0_53 = arith.constant 0 : index
    %c0_54 = arith.constant 0 : index
    %109 = vector.load %arg13[%c0_53, %c0_54] : memref<1x32xf32, #tpu.memory_space<vmem>>, vector<1x32xf32>
    %c0_55 = arith.constant 0 : index
    %c0_56 = arith.constant 0 : index
    %110 = vector.load %arg14[%c0_55, %c0_56] : memref<1x32xf32, #tpu.memory_space<vmem>>, vector<1x32xf32>
    %cst_57 = arith.constant dense<0.000000e+00> : vector<8xf32>
    %111 = vector.multi_reduction <add>, %108, %cst_57 [1] : vector<8x32xf32> to vector<8xf32>
    %112 = vector.shape_cast %111 : vector<8xf32> to vector<8x1xf32>
    %cst_58 = arith.constant 3.200000e+01 : f32
    %113 = vector.broadcast %cst_58 : f32 to vector<8x1xf32>
    %114 = arith.divf %112, %113 : vector<8x1xf32>
    %115 = vector.broadcast %114 : vector<8x1xf32> to vector<8x32xf32>
    %116 = arith.subf %108, %115 : vector<8x32xf32>
    %117 = arith.mulf %116, %116 : vector<8x32xf32>
    %cst_59 = arith.constant dense<0.000000e+00> : vector<8xf32>
    %118 = vector.multi_reduction <add>, %117, %cst_59 [1] : vector<8x32xf32> to vector<8xf32>
    %119 = vector.shape_cast %118 : vector<8xf32> to vector<8x1xf32>
    %cst_60 = arith.constant 3.200000e+01 : f32
    %120 = vector.broadcast %cst_60 : f32 to vector<8x1xf32>
    %121 = arith.divf %119, %120 : vector<8x1xf32>
    %122 = vector.broadcast %114 : vector<8x1xf32> to vector<8x32xf32>
    %123 = arith.subf %108, %122 : vector<8x32xf32>
    %cst_61 = arith.constant 9.99999974E-6 : f32
    %124 = vector.broadcast %cst_61 : f32 to vector<8x1xf32>
    %125 = arith.addf %121, %124 : vector<8x1xf32>
    %126 = math.rsqrt %125 : vector<8x1xf32>
    %127 = vector.broadcast %126 : vector<8x1xf32> to vector<8x32xf32>
    %128 = arith.mulf %123, %127 : vector<8x32xf32>
    %129 = vector.broadcast %109 : vector<1x32xf32> to vector<8x32xf32>
    %130 = arith.mulf %128, %129 : vector<8x32xf32>
    %131 = vector.broadcast %110 : vector<1x32xf32> to vector<8x32xf32>
    %132 = arith.addf %130, %131 : vector<8x32xf32>
    %c0_62 = arith.constant 0 : index
    %c0_63 = arith.constant 0 : index
    %c0_64 = arith.constant 0 : index
    %133 = vector.load %arg15[%c0_62, %c0_63, %c0_64] : memref<1x8x32xf32, #tpu.memory_space<vmem>>, vector<1x8x32xf32>
    %134 = vector.shape_cast %133 : vector<1x8x32xf32> to vector<8x32xf32>
    %135 = vector.shape_cast %132 : vector<8x32xf32> to vector<1x8x32xf32>
    tpu.vector_store %arg15[%c0_62, %c0_63, %c0_64], %135 {strides = array<i32>} : memref<1x8x32xf32, #tpu.memory_space<vmem>>, vector<1x8x32xf32>,
    return
  }
  func.func @transform_0(%arg0: i32) -> (i32, i32, i32) {
    %c0_i32 = arith.constant 0 : i32
    %c0_i32_0 = arith.constant 0 : i32
    %c0_i32_1 = arith.constant 0 : i32
    return %arg0, %c0_i32, %c0_i32_0 : i32, i32, i32
  }
  func.func @transform_1(%arg0: i32) -> (i32, i32, i32) {
    %c0_i32 = arith.constant 0 : i32
    %c0_i32_0 = arith.constant 0 : i32
    %c0_i32_1 = arith.constant 0 : i32
    return %arg0, %c0_i32, %c0_i32_0 : i32, i32, i32
  }
  func.func @transform_2(%arg0: i32) -> (i32, i32, i32) {
    %c0_i32 = arith.constant 0 : i32
    %c0_i32_0 = arith.constant 0 : i32
    %c0_i32_1 = arith.constant 0 : i32
    return %arg0, %c0_i32, %c0_i32_0 : i32, i32, i32
  }
  func.func @transform_3(%arg0: i32) -> (i32, i32, i32) {
    %c0_i32 = arith.constant 0 : i32
    %c0_i32_0 = arith.constant 0 : i32
    %c0_i32_1 = arith.constant 0 : i32
    return %arg0, %c0_i32, %c0_i32_0 : i32, i32, i32
  }
  func.func @transform_4(%arg0: i32) -> (i32, i32) {
    %c0_i32 = arith.constant 0 : i32
    %c0_i32_0 = arith.constant 0 : i32
    %c0_i32_1 = arith.constant 0 : i32
    return %c0_i32, %c0_i32_0 : i32, i32
  }
  func.func @transform_5(%arg0: i32) -> (i32, i32) {
    %c0_i32 = arith.constant 0 : i32
    %c0_i32_0 = arith.constant 0 : i32
    %c0_i32_1 = arith.constant 0 : i32
    return %c0_i32, %c0_i32_0 : i32, i32
  }
  func.func @transform_6(%arg0: i32) -> (i32, i32) {
    %c0_i32 = arith.constant 0 : i32
    %c0_i32_0 = arith.constant 0 : i32
    %c0_i32_1 = arith.constant 0 : i32
    return %c0_i32, %c0_i32_0 : i32, i32
  }
  func.func @transform_7(%arg0: i32) -> (i32, i32) {
    %c0_i32 = arith.constant 0 : i32
    %c0_i32_0 = arith.constant 0 : i32
    %c0_i32_1 = arith.constant 0 : i32
    return %c0_i32, %c0_i32_0 : i32, i32
  }
  func.func @transform_8(%arg0: i32) -> (i32, i32) {
    %c0_i32 = arith.constant 0 : i32
    %c0_i32_0 = arith.constant 0 : i32
    %c0_i32_1 = arith.constant 0 : i32
    return %c0_i32, %c0_i32_0 : i32, i32
  }
  func.func @transform_9(%arg0: i32) -> (i32, i32) {
    %c0_i32 = arith.constant 0 : i32
    %c0_i32_0 = arith.constant 0 : i32
    %c0_i32_1 = arith.constant 0 : i32
    return %c0_i32, %c0_i32_0 : i32, i32
  }
  func.func @transform_10(%arg0: i32) -> (i32, i32) {
    %c0_i32 = arith.constant 0 : i32
    %c0_i32_0 = arith.constant 0 : i32
    %c0_i32_1 = arith.constant 0 : i32
    return %c0_i32, %c0_i32_0 : i32, i32
  }
  func.func @transform_11(%arg0: i32) -> (i32, i32) {
    %c0_i32 = arith.constant 0 : i32
    %c0_i32_0 = arith.constant 0 : i32
    %c0_i32_1 = arith.constant 0 : i32
    return %c0_i32, %c0_i32_0 : i32, i32
  }
  func.func @transform_12(%arg0: i32) -> (i32, i32) {
    %c0_i32 = arith.constant 0 : i32
    %c0_i32_0 = arith.constant 0 : i32
    %c0_i32_1 = arith.constant 0 : i32
    return %c0_i32, %c0_i32_0 : i32, i32
  }
  func.func @transform_13(%arg0: i32) -> (i32, i32) {
    %c0_i32 = arith.constant 0 : i32
    %c0_i32_0 = arith.constant 0 : i32
    %c0_i32_1 = arith.constant 0 : i32
    return %c0_i32, %c0_i32_0 : i32, i32
  }
  func.func @transform_14(%arg0: i32) -> (i32, i32, i32) {
    %c0_i32 = arith.constant 0 : i32
    %c0_i32_0 = arith.constant 0 : i32
    %c0_i32_1 = arith.constant 0 : i32
    return %arg0, %c0_i32, %c0_i32_0 : i32, i32, i32
  }
}

module attributes {stable_mosaic.version = 11 : i64} {
  func.func @_fused_attn_kernel(%arg0: i32, %arg1: memref<1x8x32xf32, #tpu.memory_space<vmem>>, %arg2: memref<1x8x32xf32, #tpu.memory_space<vmem>>, %arg3: memref<1x16x32xf32, #tpu.memory_space<vmem>>, %arg4: memref<1x16x32xf32, #tpu.memory_space<vmem>>, %arg5: memref<32x32xf32, #tpu.memory_space<vmem>>, %arg6: memref<1x32xf32, #tpu.memory_space<vmem>>, %arg7: memref<32x32xf32, #tpu.memory_space<vmem>>, %arg8: memref<1x32xf32, #tpu.memory_space<vmem>>, %arg9: memref<32x32xf32, #tpu.memory_space<vmem>>, %arg10: memref<1x32xf32, #tpu.memory_space<vmem>>, %arg11: memref<32x32xf32, #tpu.memory_space<vmem>>, %arg12: memref<1x32xf32, #tpu.memory_space<vmem>>, %arg13: memref<1x32xf32, #tpu.memory_space<vmem>>, %arg14: memref<1x32xf32, #tpu.memory_space<vmem>>, %arg15: memref<1x8x32xf32, #tpu.memory_space<vmem>>) attributes {dimension_semantics = [#tpu.dimension_semantics<parallel>], iteration_bounds = array<i64: 2>, scalar_prefetch = 0 : i64, scratch_operands = 0 : i64, tpu.core_type = #tpu.core_type<tc>, window_params = [{transform_indices = @transform_0, window_bounds = array<i64: 1, 8, 32>}, {transform_indices = @transform_1, window_bounds = array<i64: 1, 8, 32>}, {transform_indices = @transform_2, window_bounds = array<i64: 1, 16, 32>}, {transform_indices = @transform_3, window_bounds = array<i64: 1, 16, 32>}, {pipeline_mode = #tpu.pipeline_mode<synchronous>, transform_indices = @transform_4, window_bounds = array<i64: 32, 32>}, {pipeline_mode = #tpu.pipeline_mode<synchronous>, transform_indices = @transform_5, window_bounds = array<i64: 1, 32>}, {pipeline_mode = #tpu.pipeline_mode<synchronous>, transform_indices = @transform_6, window_bounds = array<i64: 32, 32>}, {pipeline_mode = #tpu.pipeline_mode<synchronous>, transform_indices = @transform_7, window_bounds = array<i64: 1, 32>}, {pipeline_mode = #tpu.pipeline_mode<synchronous>, transform_indices = @transform_8, window_bounds = array<i64: 32, 32>}, {pipeline_mode = #tpu.pipeline_mode<synchronous>, transform_indices = @transform_9, window_bounds = array<i64: 1, 32>}, {pipeline_mode = #tpu.pipeline_mode<synchronous>, transform_indices = @transform_10, window_bounds = array<i64: 32, 32>}, {pipeline_mode = #tpu.pipeline_mode<synchronous>, transform_indices = @transform_11, window_bounds = array<i64: 1, 32>}, {pipeline_mode = #tpu.pipeline_mode<synchronous>, transform_indices = @transform_12, window_bounds = array<i64: 1, 32>}, {pipeline_mode = #tpu.pipeline_mode<synchronous>, transform_indices = @transform_13, window_bounds = array<i64: 1, 32>}, {transform_indices = @transform_14, window_bounds = array<i64: 1, 8, 32>}]} {
    %c0 = arith.constant 0 : index
    %c0_0 = arith.constant 0 : index
    %c0_1 = arith.constant 0 : index
    %0 = vector.load %arg1[%c0, %c0_0, %c0_1] : memref<1x8x32xf32, #tpu.memory_space<vmem>>, vector<1x8x32xf32>
    %1 = vector.shape_cast %0 : vector<1x8x32xf32> to vector<8x32xf32>
    %c0_2 = arith.constant 0 : index
    %c0_3 = arith.constant 0 : index
    %c0_4 = arith.constant 0 : index
    %2 = vector.load %arg2[%c0_2, %c0_3, %c0_4] : memref<1x8x32xf32, #tpu.memory_space<vmem>>, vector<1x8x32xf32>
    %3 = vector.shape_cast %2 : vector<1x8x32xf32> to vector<8x32xf32>
    %4 = arith.addf %1, %3 : vector<8x32xf32>
    %c0_5 = arith.constant 0 : index
    %c0_6 = arith.constant 0 : index
    %c0_7 = arith.constant 0 : index
    %5 = vector.load %arg3[%c0_5, %c0_6, %c0_7] : memref<1x16x32xf32, #tpu.memory_space<vmem>>, vector<1x16x32xf32>
    %6 = vector.shape_cast %5 : vector<1x16x32xf32> to vector<16x32xf32>
    %c0_8 = arith.constant 0 : index
    %c0_9 = arith.constant 0 : index
    %c0_10 = arith.constant 0 : index
    %7 = vector.load %arg4[%c0_8, %c0_9, %c0_10] : memref<1x16x32xf32, #tpu.memory_space<vmem>>, vector<1x16x32xf32>
    %8 = vector.shape_cast %7 : vector<1x16x32xf32> to vector<16x32xf32>
    %9 = arith.addf %6, %8 : vector<16x32xf32>
    %c0_11 = arith.constant 0 : index
    %c0_12 = arith.constant 0 : index
    %10 = vector.load %arg5[%c0_11, %c0_12] : memref<32x32xf32, #tpu.memory_space<vmem>>, vector<32x32xf32>
    %cst = arith.constant dense<0.000000e+00> : vector<8x32xf32>
    %11 = tpu.matmul %4, %10, %cst {dimension_numbers = #tpu.dot_dimension_numbers<[1], [0], [0], [1], [0, 0, 1, 1], [], []>} : vector<8x32xf32>, vector<32x32xf32>, vector<8x32xf32> -> vector<8x32xf32>
    %c0_13 = arith.constant 0 : index
    %c0_14 = arith.constant 0 : index
    %12 = vector.load %arg6[%c0_13, %c0_14] : memref<1x32xf32, #tpu.memory_space<vmem>>, vector<1x32xf32>
    %13 = vector.broadcast %12 : vector<1x32xf32> to vector<8x32xf32>
    %14 = arith.addf %11, %13 : vector<8x32xf32>
    %c0_15 = arith.constant 0 : index
    %c0_16 = arith.constant 0 : index
    %15 = vector.load %arg7[%c0_15, %c0_16] : memref<32x32xf32, #tpu.memory_space<vmem>>, vector<32x32xf32>
    %cst_17 = arith.constant dense<0.000000e+00> : vector<16x32xf32>
    %16 = tpu.matmul %9, %15, %cst_17 {dimension_numbers = #tpu.dot_dimension_numbers<[1], [0], [0], [1], [0, 0, 1, 1], [], []>} : vector<16x32xf32>, vector<32x32xf32>, vector<16x32xf32> -> vector<16x32xf32>
    %c0_18 = arith.constant 0 : index
    %c0_19 = arith.constant 0 : index
    %17 = vector.load %arg8[%c0_18, %c0_19] : memref<1x32xf32, #tpu.memory_space<vmem>>, vector<1x32xf32>
    %18 = vector.broadcast %17 : vector<1x32xf32> to vector<16x32xf32>
    %19 = arith.addf %16, %18 : vector<16x32xf32>
    %c0_20 = arith.constant 0 : index
    %c0_21 = arith.constant 0 : index
    %20 = vector.load %arg9[%c0_20, %c0_21] : memref<32x32xf32, #tpu.memory_space<vmem>>, vector<32x32xf32>
    %cst_22 = arith.constant dense<0.000000e+00> : vector<16x32xf32>
    %21 = tpu.matmul %6, %20, %cst_22 {dimension_numbers = #tpu.dot_dimension_numbers<[1], [0], [0], [1], [0, 0, 1, 1], [], []>} : vector<16x32xf32>, vector<32x32xf32>, vector<16x32xf32> -> vector<16x32xf32>
    %c0_23 = arith.constant 0 : index
    %c0_24 = arith.constant 0 : index
    %22 = vector.load %arg10[%c0_23, %c0_24] : memref<1x32xf32, #tpu.memory_space<vmem>>, vector<1x32xf32>
    %23 = vector.broadcast %22 : vector<1x32xf32> to vector<16x32xf32>
    %24 = arith.addf %21, %23 : vector<16x32xf32>
    %c0_25 = arith.constant 0 : index
    %c0_26 = arith.constant 0 : index
    %25 = vector.load %arg11[%c0_25, %c0_26] : memref<32x32xf32, #tpu.memory_space<vmem>>, vector<32x32xf32>
    %26 = vector.extract_strided_slice %14 {offsets = [0, 0], sizes = [8, 8], strides = [1, 1]} : vector<8x32xf32> to vector<8x8xf32>
    %27 = vector.extract_strided_slice %19 {offsets = [0, 0], sizes = [16, 8], strides = [1, 1]} : vector<16x32xf32> to vector<16x8xf32>
    %28 = vector.extract_strided_slice %24 {offsets = [0, 0], sizes = [16, 8], strides = [1, 1]} : vector<16x32xf32> to vector<16x8xf32>
    %cst_27 = arith.constant dense<0.000000e+00> : vector<8x16xf32>
    %29 = tpu.matmul %26, %27, %cst_27 {dimension_numbers = #tpu.dot_dimension_numbers<[1], [1], [0], [0], [0, 0, 1, 0], [], []>} : vector<8x8xf32>, vector<16x8xf32>, vector<8x16xf32> -> vector<8x16xf32>
    %cst_28 = arith.constant 0.353553385 : f32
    %30 = vector.broadcast %cst_28 : f32 to vector<8x16xf32>
    %31 = arith.mulf %29, %30 : vector<8x16xf32>
    %cst_29 = arith.constant dense<0xFF800000> : vector<8xf32>
    %32 = vector.multi_reduction <maximumf>, %31, %cst_29 [1] : vector<8x16xf32> to vector<8xf32>
    %33 = vector.shape_cast %32 : vector<8xf32> to vector<8x1xf32>
    %34 = vector.broadcast %33 : vector<8x1xf32> to vector<8x16xf32>
    %35 = arith.subf %31, %34 : vector<8x16xf32>
    %36 = math.exp %35 : vector<8x16xf32>
    %cst_30 = arith.constant dense<0.000000e+00> : vector<8xf32>
    %37 = vector.multi_reduction <add>, %36, %cst_30 [1] : vector<8x16xf32> to vector<8xf32>
    %38 = vector.shape_cast %37 : vector<8xf32> to vector<8x1xf32>
    %cst_31 = arith.constant dense<0.000000e+00> : vector<8x8xf32>
    %39 = tpu.matmul %36, %28, %cst_31 {dimension_numbers = #tpu.dot_dimension_numbers<[1], [0], [0], [1], [0, 0, 1, 1], [], []>} : vector<8x16xf32>, vector<16x8xf32>, vector<8x8xf32> -> vector<8x8xf32>
    %40 = tpu.reciprocal %38 {approx = true} : vector<8x1xf32> -> vector<8x1xf32>
    %41 = vector.broadcast %40 : vector<8x1xf32> to vector<8x8xf32>
    %42 = arith.mulf %39, %41 : vector<8x8xf32>
    %43 = vector.extract_strided_slice %25 {offsets = [0, 0], sizes = [8, 32], strides = [1, 1]} : vector<32x32xf32> to vector<8x32xf32>
    %cst_32 = arith.constant dense<0.000000e+00> : vector<8x32xf32>
    %44 = tpu.matmul %42, %43, %cst_32 {dimension_numbers = #tpu.dot_dimension_numbers<[1], [0], [0], [1], [0, 0, 1, 1], [], []>} : vector<8x8xf32>, vector<8x32xf32>, vector<8x32xf32> -> vector<8x32xf32>
    %45 = vector.extract_strided_slice %14 {offsets = [0, 8], sizes = [8, 8], strides = [1, 1]} : vector<8x32xf32> to vector<8x8xf32>
    %46 = vector.extract_strided_slice %19 {offsets = [0, 8], sizes = [16, 8], strides = [1, 1]} : vector<16x32xf32> to vector<16x8xf32>
    %47 = vector.extract_strided_slice %24 {offsets = [0, 8], sizes = [16, 8], strides = [1, 1]} : vector<16x32xf32> to vector<16x8xf32>
    %cst_33 = arith.constant dense<0.000000e+00> : vector<8x16xf32>
    %48 = tpu.matmul %45, %46, %cst_33 {dimension_numbers = #tpu.dot_dimension_numbers<[1], [1], [0], [0], [0, 0, 1, 0], [], []>} : vector<8x8xf32>, vector<16x8xf32>, vector<8x16xf32> -> vector<8x16xf32>
    %cst_34 = arith.constant 0.353553385 : f32
    %49 = vector.broadcast %cst_34 : f32 to vector<8x16xf32>
    %50 = arith.mulf %48, %49 : vector<8x16xf32>
    %cst_35 = arith.constant dense<0xFF800000> : vector<8xf32>
    %51 = vector.multi_reduction <maximumf>, %50, %cst_35 [1] : vector<8x16xf32> to vector<8xf32>
    %52 = vector.shape_cast %51 : vector<8xf32> to vector<8x1xf32>
    %53 = vector.broadcast %52 : vector<8x1xf32> to vector<8x16xf32>
    %54 = arith.subf %50, %53 : vector<8x16xf32>
    %55 = math.exp %54 : vector<8x16xf32>
    %cst_36 = arith.constant dense<0.000000e+00> : vector<8xf32>
    %56 = vector.multi_reduction <add>, %55, %cst_36 [1] : vector<8x16xf32> to vector<8xf32>
    %57 = vector.shape_cast %56 : vector<8xf32> to vector<8x1xf32>
    %cst_37 = arith.constant dense<0.000000e+00> : vector<8x8xf32>
    %58 = tpu.matmul %55, %47, %cst_37 {dimension_numbers = #tpu.dot_dimension_numbers<[1], [0], [0], [1], [0, 0, 1, 1], [], []>} : vector<8x16xf32>, vector<16x8xf32>, vector<8x8xf32> -> vector<8x8xf32>
    %59 = tpu.reciprocal %57 {approx = true} : vector<8x1xf32> -> vector<8x1xf32>
    %60 = vector.broadcast %59 : vector<8x1xf32> to vector<8x8xf32>
    %61 = arith.mulf %58, %60 : vector<8x8xf32>
    %62 = vector.extract_strided_slice %25 {offsets = [8, 0], sizes = [8, 32], strides = [1, 1]} : vector<32x32xf32> to vector<8x32xf32>
    %cst_38 = arith.constant dense<0.000000e+00> : vector<8x32xf32>
    %63 = tpu.matmul %61, %62, %cst_38 {dimension_numbers = #tpu.dot_dimension_numbers<[1], [0], [0], [1], [0, 0, 1, 1], [], []>} : vector<8x8xf32>, vector<8x32xf32>, vector<8x32xf32> -> vector<8x32xf32>
    %64 = arith.addf %44, %63 : vector<8x32xf32>
    %65 = vector.extract_strided_slice %14 {offsets = [0, 16], sizes = [8, 8], strides = [1, 1]} : vector<8x32xf32> to vector<8x8xf32>
    %66 = vector.extract_strided_slice %19 {offsets = [0, 16], sizes = [16, 8], strides = [1, 1]} : vector<16x32xf32> to vector<16x8xf32>
    %67 = vector.extract_strided_slice %24 {offsets = [0, 16], sizes = [16, 8], strides = [1, 1]} : vector<16x32xf32> to vector<16x8xf32>
    %cst_39 = arith.constant dense<0.000000e+00> : vector<8x16xf32>
    %68 = tpu.matmul %65, %66, %cst_39 {dimension_numbers = #tpu.dot_dimension_numbers<[1], [1], [0], [0], [0, 0, 1, 0], [], []>} : vector<8x8xf32>, vector<16x8xf32>, vector<8x16xf32> -> vector<8x16xf32>
    %cst_40 = arith.constant 0.353553385 : f32
    %69 = vector.broadcast %cst_40 : f32 to vector<8x16xf32>
    %70 = arith.mulf %68, %69 : vector<8x16xf32>
    %cst_41 = arith.constant dense<0xFF800000> : vector<8xf32>
    %71 = vector.multi_reduction <maximumf>, %70, %cst_41 [1] : vector<8x16xf32> to vector<8xf32>
    %72 = vector.shape_cast %71 : vector<8xf32> to vector<8x1xf32>
    %73 = vector.broadcast %72 : vector<8x1xf32> to vector<8x16xf32>
    %74 = arith.subf %70, %73 : vector<8x16xf32>
    %75 = math.exp %74 : vector<8x16xf32>
    %cst_42 = arith.constant dense<0.000000e+00> : vector<8xf32>
    %76 = vector.multi_reduction <add>, %75, %cst_42 [1] : vector<8x16xf32> to vector<8xf32>
    %77 = vector.shape_cast %76 : vector<8xf32> to vector<8x1xf32>
    %cst_43 = arith.constant dense<0.000000e+00> : vector<8x8xf32>
    %78 = tpu.matmul %75, %67, %cst_43 {dimension_numbers = #tpu.dot_dimension_numbers<[1], [0], [0], [1], [0, 0, 1, 1], [], []>} : vector<8x16xf32>, vector<16x8xf32>, vector<8x8xf32> -> vector<8x8xf32>
    %79 = tpu.reciprocal %77 {approx = true} : vector<8x1xf32> -> vector<8x1xf32>
    %80 = vector.broadcast %79 : vector<8x1xf32> to vector<8x8xf32>
    %81 = arith.mulf %78, %80 : vector<8x8xf32>
    %82 = vector.extract_strided_slice %25 {offsets = [16, 0], sizes = [8, 32], strides = [1, 1]} : vector<32x32xf32> to vector<8x32xf32>
    %cst_44 = arith.constant dense<0.000000e+00> : vector<8x32xf32>
    %83 = tpu.matmul %81, %82, %cst_44 {dimension_numbers = #tpu.dot_dimension_numbers<[1], [0], [0], [1], [0, 0, 1, 1], [], []>} : vector<8x8xf32>, vector<8x32xf32>, vector<8x32xf32> -> vector<8x32xf32>
    %84 = arith.addf %64, %83 : vector<8x32xf32>
    %85 = vector.extract_strided_slice %14 {offsets = [0, 24], sizes = [8, 8], strides = [1, 1]} : vector<8x32xf32> to vector<8x8xf32>
    %86 = vector.extract_strided_slice %19 {offsets = [0, 24], sizes = [16, 8], strides = [1, 1]} : vector<16x32xf32> to vector<16x8xf32>
    %87 = vector.extract_strided_slice %24 {offsets = [0, 24], sizes = [16, 8], strides = [1, 1]} : vector<16x32xf32> to vector<16x8xf32>
    %cst_45 = arith.constant dense<0.000000e+00> : vector<8x16xf32>
    %88 = tpu.matmul %85, %86, %cst_45 {dimension_numbers = #tpu.dot_dimension_numbers<[1], [1], [0], [0], [0, 0, 1, 0], [], []>} : vector<8x8xf32>, vector<16x8xf32>, vector<8x16xf32> -> vector<8x16xf32>
    %cst_46 = arith.constant 0.353553385 : f32
    %89 = vector.broadcast %cst_46 : f32 to vector<8x16xf32>
    %90 = arith.mulf %88, %89 : vector<8x16xf32>
    %cst_47 = arith.constant dense<0xFF800000> : vector<8xf32>
    %91 = vector.multi_reduction <maximumf>, %90, %cst_47 [1] : vector<8x16xf32> to vector<8xf32>
    %92 = vector.shape_cast %91 : vector<8xf32> to vector<8x1xf32>
    %93 = vector.broadcast %92 : vector<8x1xf32> to vector<8x16xf32>
    %94 = arith.subf %90, %93 : vector<8x16xf32>
    %95 = math.exp %94 : vector<8x16xf32>
    %cst_48 = arith.constant dense<0.000000e+00> : vector<8xf32>
    %96 = vector.multi_reduction <add>, %95, %cst_48 [1] : vector<8x16xf32> to vector<8xf32>
    %97 = vector.shape_cast %96 : vector<8xf32> to vector<8x1xf32>
    %cst_49 = arith.constant dense<0.000000e+00> : vector<8x8xf32>
    %98 = tpu.matmul %95, %87, %cst_49 {dimension_numbers = #tpu.dot_dimension_numbers<[1], [0], [0], [1], [0, 0, 1, 1], [], []>} : vector<8x16xf32>, vector<16x8xf32>, vector<8x8xf32> -> vector<8x8xf32>
    %99 = tpu.reciprocal %97 {approx = true} : vector<8x1xf32> -> vector<8x1xf32>
    %100 = vector.broadcast %99 : vector<8x1xf32> to vector<8x8xf32>
    %101 = arith.mulf %98, %100 : vector<8x8xf32>
    %102 = vector.extract_strided_slice %25 {offsets = [24, 0], sizes = [8, 32], strides = [1, 1]} : vector<32x32xf32> to vector<8x32xf32>
    %cst_50 = arith.constant dense<0.000000e+00> : vector<8x32xf32>
    %103 = tpu.matmul %101, %102, %cst_50 {dimension_numbers = #tpu.dot_dimension_numbers<[1], [0], [0], [1], [0, 0, 1, 1], [], []>} : vector<8x8xf32>, vector<8x32xf32>, vector<8x32xf32> -> vector<8x32xf32>
    %104 = arith.addf %84, %103 : vector<8x32xf32>
    %105 = arith.addf %1, %104 : vector<8x32xf32>
    %c0_51 = arith.constant 0 : index
    %c0_52 = arith.constant 0 : index
    %106 = vector.load %arg12[%c0_51, %c0_52] : memref<1x32xf32, #tpu.memory_space<vmem>>, vector<1x32xf32>
    %107 = vector.broadcast %106 : vector<1x32xf32> to vector<8x32xf32>
    %108 = arith.addf %105, %107 : vector<8x32xf32>
    %c0_53 = arith.constant 0 : index
    %c0_54 = arith.constant 0 : index
    %109 = vector.load %arg13[%c0_53, %c0_54] : memref<1x32xf32, #tpu.memory_space<vmem>>, vector<1x32xf32>
    %c0_55 = arith.constant 0 : index
    %c0_56 = arith.constant 0 : index
    %110 = vector.load %arg14[%c0_55, %c0_56] : memref<1x32xf32, #tpu.memory_space<vmem>>, vector<1x32xf32>
    %cst_57 = arith.constant dense<0.000000e+00> : vector<8xf32>
    %111 = vector.multi_reduction <add>, %108, %cst_57 [1] : vector<8x32xf32> to vector<8xf32>
    %112 = vector.shape_cast %111 : vector<8xf32> to vector<8x1xf32>
    %cst_58 = arith.constant 3.200000e+01 : f32
    %113 = vector.broadcast %cst_58 : f32 to vector<8x1xf32>
    %114 = arith.divf %112, %113 : vector<8x1xf32>
    %115 = vector.broadcast %114 : vector<8x1xf32> to vector<8x32xf32>
    %116 = arith.subf %108, %115 : vector<8x32xf32>
    %117 = arith.mulf %116, %116 : vector<8x32xf32>
    %cst_59 = arith.constant dense<0.000000e+00> : vector<8xf32>
    %118 = vector.multi_reduction <add>, %117, %cst_59 [1] : vector<8x32xf32> to vector<8xf32>
    %119 = vector.shape_cast %118 : vector<8xf32> to vector<8x1xf32>
    %cst_60 = arith.constant 3.200000e+01 : f32
    %120 = vector.broadcast %cst_60 : f32 to vector<8x1xf32>
    %121 = arith.divf %119, %120 : vector<8x1xf32>
    %122 = vector.broadcast %114 : vector<8x1xf32> to vector<8x32xf32>
    %123 = arith.subf %108, %122 : vector<8x32xf32>
    %cst_61 = arith.constant 9.99999974E-6 : f32
    %124 = vector.broadcast %cst_61 : f32 to vector<8x1xf32>
    %125 = arith.addf %121, %124 : vector<8x1xf32>
    %126 = math.rsqrt %125 : vector<8x1xf32>
    %127 = vector.broadcast %126 : vector<8x1xf32> to vector<8x32xf32>
    %128 = arith.mulf %123, %127 : vector<8x32xf32>
    %129 = vector.broadcast %109 : vector<1x32xf32> to vector<8x32xf32>
    %130 = arith.mulf %128, %129 : vector<8x32xf32>
    %131 = vector.broadcast %110 : vector<1x32xf32> to vector<8x32xf32>
    %132 = arith.addf %130, %131 : vector<8x32xf32>
    %c0_62 = arith.constant 0 : index
    %c0_63 = arith.constant 0 : index
    %c0_64 = arith.constant 0 : index
    %133 = vector.load %arg15[%c0_62, %c0_63, %c0_64] : memref<1x8x32xf32, #tpu.memory_space<vmem>>, vector<1x8x32xf32>
    %134 = vector.shape_cast %133 : vector<1x8x32xf32> to vector<8x32xf32>
    %135 = vector.shape_cast %132 : vector<8x32xf32> to vector<1x8x32xf32>
    tpu.vector_store %arg15[%c0_62, %c0_63, %c0_64], %135 {strides = array<i32>} : memref<1x8x32xf32, #tpu.memory_space<vmem>>, vector<1x8x32xf32>,
    return
  }
  func.func @transform_0(%arg0: i32) -> (i32, i32, i32) {
    %c0_i32 = arith.constant 0 : i32
    %c0_i32_0 = arith.constant 0 : i32
    %c0_i32_1 = arith.constant 0 : i32
    return %arg0, %c0_i32, %c0_i32_0 : i32, i32, i32
  }
  func.func @transform_1(%arg0: i32) -> (i32, i32, i32) {
    %c0_i32 = arith.constant 0 : i32
    %c0_i32_0 = arith.constant 0 : i32
    %c0_i32_1 = arith.constant 0 : i32
    return %arg0, %c0_i32, %c0_i32_0 : i32, i32, i32
  }
  func.func @transform_2(%arg0: i32) -> (i32, i32, i32) {
    %c0_i32 = arith.constant 0 : i32
    %c0_i32_0 = arith.constant 0 : i32
    %c0_i32_1 = arith.constant 0 : i32
    return %arg0, %c0_i32, %c0_i32_0 : i32, i32, i32
  }
  func.func @transform_3(%arg0: i32) -> (i32, i32, i32) {
    %c0_i32 = arith.constant 0 : i32
    %c0_i32_0 = arith.constant 0 : i32
    %c0_i32_1 = arith.constant 0 : i32
    return %arg0, %c0_i32, %c0_i32_0 : i32, i32, i32
  }
  func.func @transform_4(%arg0: i32) -> (i32, i32) {
    %c0_i32 = arith.constant 0 : i32
    %c0_i32_0 = arith.constant 0 : i32
    %c0_i32_1 = arith.constant 0 : i32
    return %c0_i32, %c0_i32_0 : i32, i32
  }
  func.func @transform_5(%arg0: i32) -> (i32, i32) {
    %c0_i32 = arith.constant 0 : i32
    %c0_i32_0 = arith.constant 0 : i32
    %c0_i32_1 = arith.constant 0 : i32
    return %c0_i32, %c0_i32_0 : i32, i32
  }
  func.func @transform_6(%arg0: i32) -> (i32, i32) {
    %c0_i32 = arith.constant 0 : i32
    %c0_i32_0 = arith.constant 0 : i32
    %c0_i32_1 = arith.constant 0 : i32
    return %c0_i32, %c0_i32_0 : i32, i32
  }
  func.func @transform_7(%arg0: i32) -> (i32, i32) {
    %c0_i32 = arith.constant 0 : i32
    %c0_i32_0 = arith.constant 0 : i32
    %c0_i32_1 = arith.constant 0 : i32
    return %c0_i32, %c0_i32_0 : i32, i32
  }
  func.func @transform_8(%arg0: i32) -> (i32, i32) {
    %c0_i32 = arith.constant 0 : i32
    %c0_i32_0 = arith.constant 0 : i32
    %c0_i32_1 = arith.constant 0 : i32
    return %c0_i32, %c0_i32_0 : i32, i32
  }
  func.func @transform_9(%arg0: i32) -> (i32, i32) {
    %c0_i32 = arith.constant 0 : i32
    %c0_i32_0 = arith.constant 0 : i32
    %c0_i32_1 = arith.constant 0 : i32
    return %c0_i32, %c0_i32_0 : i32, i32
  }
  func.func @transform_10(%arg0: i32) -> (i32, i32) {
    %c0_i32 = arith.constant 0 : i32
    %c0_i32_0 = arith.constant 0 : i32
    %c0_i32_1 = arith.constant 0 : i32
    return %c0_i32, %c0_i32_0 : i32, i32
  }
  func.func @transform_11(%arg0: i32) -> (i32, i32) {
    %c0_i32 = arith.constant 0 : i32
    %c0_i32_0 = arith.constant 0 : i32
    %c0_i32_1 = arith.constant 0 : i32
    return %c0_i32, %c0_i32_0 : i32, i32
  }
  func.func @transform_12(%arg0: i32) -> (i32, i32) {
    %c0_i32 = arith.constant 0 : i32
    %c0_i32_0 = arith.constant 0 : i32
    %c0_i32_1 = arith.constant 0 : i32
    return %c0_i32, %c0_i32_0 : i32, i32
  }
  func.func @transform_13(%arg0: i32) -> (i32, i32) {
    %c0_i32 = arith.constant 0 : i32
    %c0_i32_0 = arith.constant 0 : i32
    %c0_i32_1 = arith.constant 0 : i32
    return %c0_i32, %c0_i32_0 : i32, i32
  }
  func.func @transform_14(%arg0: i32) -> (i32, i32, i32) {
    %c0_i32 = arith.constant 0 : i32
    %c0_i32_0 = arith.constant 0 : i32
    %c0_i32_1 = arith.constant 0 : i32
    return %arg0, %c0_i32, %c0_i32_0 : i32, i32, i32
  }
}

module attributes {stable_mosaic.version = 11 : i64} {
  func.func @_fused_ffn_kernel(%arg0: i32, %arg1: memref<1x8x32xf32, #tpu.memory_space<vmem>>, %arg2: memref<32x64xf32, #tpu.memory_space<vmem>>, %arg3: memref<1x64xf32, #tpu.memory_space<vmem>>, %arg4: memref<64x32xf32, #tpu.memory_space<vmem>>, %arg5: memref<1x32xf32, #tpu.memory_space<vmem>>, %arg6: memref<1x32xf32, #tpu.memory_space<vmem>>, %arg7: memref<1x32xf32, #tpu.memory_space<vmem>>, %arg8: memref<1x32xf32, #tpu.memory_space<vmem>>, %arg9: memref<1x32xf32, #tpu.memory_space<vmem>>, %arg10: memref<1x8x32xf32, #tpu.memory_space<vmem>>, %arg11: memref<1x8x32xf32, #tpu.memory_space<vmem>>) attributes {dimension_semantics = [#tpu.dimension_semantics<parallel>], iteration_bounds = array<i64: 2>, scalar_prefetch = 0 : i64, scratch_operands = 0 : i64, tpu.core_type = #tpu.core_type<tc>, window_params = [{transform_indices = @transform_0, window_bounds = array<i64: 1, 8, 32>}, {pipeline_mode = #tpu.pipeline_mode<synchronous>, transform_indices = @transform_1, window_bounds = array<i64: 32, 64>}, {pipeline_mode = #tpu.pipeline_mode<synchronous>, transform_indices = @transform_2, window_bounds = array<i64: 1, 64>}, {pipeline_mode = #tpu.pipeline_mode<synchronous>, transform_indices = @transform_3, window_bounds = array<i64: 64, 32>}, {pipeline_mode = #tpu.pipeline_mode<synchronous>, transform_indices = @transform_4, window_bounds = array<i64: 1, 32>}, {pipeline_mode = #tpu.pipeline_mode<synchronous>, transform_indices = @transform_5, window_bounds = array<i64: 1, 32>}, {pipeline_mode = #tpu.pipeline_mode<synchronous>, transform_indices = @transform_6, window_bounds = array<i64: 1, 32>}, {pipeline_mode = #tpu.pipeline_mode<synchronous>, transform_indices = @transform_7, window_bounds = array<i64: 1, 32>}, {pipeline_mode = #tpu.pipeline_mode<synchronous>, transform_indices = @transform_8, window_bounds = array<i64: 1, 32>}, {transform_indices = @transform_9, window_bounds = array<i64: 1, 8, 32>}, {transform_indices = @transform_10, window_bounds = array<i64: 1, 8, 32>}]} {
    %c0 = arith.constant 0 : index
    %c0_0 = arith.constant 0 : index
    %c0_1 = arith.constant 0 : index
    %0 = vector.load %arg1[%c0, %c0_0, %c0_1] : memref<1x8x32xf32, #tpu.memory_space<vmem>>, vector<1x8x32xf32>
    %1 = vector.shape_cast %0 : vector<1x8x32xf32> to vector<8x32xf32>
    %c0_2 = arith.constant 0 : index
    %c0_3 = arith.constant 0 : index
    %2 = vector.load %arg2[%c0_2, %c0_3] : memref<32x64xf32, #tpu.memory_space<vmem>>, vector<32x64xf32>
    %cst = arith.constant dense<0.000000e+00> : vector<8x64xf32>
    %3 = tpu.matmul %1, %2, %cst {dimension_numbers = #tpu.dot_dimension_numbers<[1], [0], [0], [1], [0, 0, 1, 1], [], []>} : vector<8x32xf32>, vector<32x64xf32>, vector<8x64xf32> -> vector<8x64xf32>
    %c0_4 = arith.constant 0 : index
    %c0_5 = arith.constant 0 : index
    %4 = vector.load %arg3[%c0_4, %c0_5] : memref<1x64xf32, #tpu.memory_space<vmem>>, vector<1x64xf32>
    %5 = vector.broadcast %4 : vector<1x64xf32> to vector<8x64xf32>
    %6 = arith.addf %3, %5 : vector<8x64xf32>
    %cst_6 = arith.constant 0.000000e+00 : f32
    %7 = vector.broadcast %cst_6 : f32 to vector<8x64xf32>
    %8 = arith.maximumf %6, %7 : vector<8x64xf32>
    %c0_7 = arith.constant 0 : index
    %c0_8 = arith.constant 0 : index
    %9 = vector.load %arg4[%c0_7, %c0_8] : memref<64x32xf32, #tpu.memory_space<vmem>>, vector<64x32xf32>
    %cst_9 = arith.constant dense<0.000000e+00> : vector<8x32xf32>
    %10 = tpu.matmul %8, %9, %cst_9 {dimension_numbers = #tpu.dot_dimension_numbers<[1], [0], [0], [1], [0, 0, 1, 1], [], []>} : vector<8x64xf32>, vector<64x32xf32>, vector<8x32xf32> -> vector<8x32xf32>
    %c0_10 = arith.constant 0 : index
    %c0_11 = arith.constant 0 : index
    %11 = vector.load %arg5[%c0_10, %c0_11] : memref<1x32xf32, #tpu.memory_space<vmem>>, vector<1x32xf32>
    %12 = vector.broadcast %11 : vector<1x32xf32> to vector<8x32xf32>
    %13 = arith.addf %10, %12 : vector<8x32xf32>
    %14 = arith.addf %1, %13 : vector<8x32xf32>
    %c0_12 = arith.constant 0 : index
    %c0_13 = arith.constant 0 : index
    %15 = vector.load %arg6[%c0_12, %c0_13] : memref<1x32xf32, #tpu.memory_space<vmem>>, vector<1x32xf32>
    %c0_14 = arith.constant 0 : index
    %c0_15 = arith.constant 0 : index
    %16 = vector.load %arg7[%c0_14, %c0_15] : memref<1x32xf32, #tpu.memory_space<vmem>>, vector<1x32xf32>
    %cst_16 = arith.constant dense<0.000000e+00> : vector<8xf32>
    %17 = vector.multi_reduction <add>, %14, %cst_16 [1] : vector<8x32xf32> to vector<8xf32>
    %18 = vector.shape_cast %17 : vector<8xf32> to vector<8x1xf32>
    %cst_17 = arith.constant 3.200000e+01 : f32
    %19 = vector.broadcast %cst_17 : f32 to vector<8x1xf32>
    %20 = arith.divf %18, %19 : vector<8x1xf32>
    %21 = vector.broadcast %20 : vector<8x1xf32> to vector<8x32xf32>
    %22 = arith.subf %14, %21 : vector<8x32xf32>
    %23 = arith.mulf %22, %22 : vector<8x32xf32>
    %cst_18 = arith.constant dense<0.000000e+00> : vector<8xf32>
    %24 = vector.multi_reduction <add>, %23, %cst_18 [1] : vector<8x32xf32> to vector<8xf32>
    %25 = vector.shape_cast %24 : vector<8xf32> to vector<8x1xf32>
    %cst_19 = arith.constant 3.200000e+01 : f32
    %26 = vector.broadcast %cst_19 : f32 to vector<8x1xf32>
    %27 = arith.divf %25, %26 : vector<8x1xf32>
    %28 = vector.broadcast %20 : vector<8x1xf32> to vector<8x32xf32>
    %29 = arith.subf %14, %28 : vector<8x32xf32>
    %cst_20 = arith.constant 9.99999974E-6 : f32
    %30 = vector.broadcast %cst_20 : f32 to vector<8x1xf32>
    %31 = arith.addf %27, %30 : vector<8x1xf32>
    %32 = math.rsqrt %31 : vector<8x1xf32>
    %33 = vector.broadcast %32 : vector<8x1xf32> to vector<8x32xf32>
    %34 = arith.mulf %29, %33 : vector<8x32xf32>
    %35 = vector.broadcast %15 : vector<1x32xf32> to vector<8x32xf32>
    %36 = arith.mulf %34, %35 : vector<8x32xf32>
    %37 = vector.broadcast %16 : vector<1x32xf32> to vector<8x32xf32>
    %38 = arith.addf %36, %37 : vector<8x32xf32>
    %c0_21 = arith.constant 0 : index
    %c0_22 = arith.constant 0 : index
    %c0_23 = arith.constant 0 : index
    %39 = vector.load %arg10[%c0_21, %c0_22, %c0_23] : memref<1x8x32xf32, #tpu.memory_space<vmem>>, vector<1x8x32xf32>
    %40 = vector.shape_cast %39 : vector<1x8x32xf32> to vector<8x32xf32>
    %41 = vector.shape_cast %38 : vector<8x32xf32> to vector<1x8x32xf32>
    tpu.vector_store %arg10[%c0_21, %c0_22, %c0_23], %41 {strides = array<i32>} : memref<1x8x32xf32, #tpu.memory_space<vmem>>, vector<1x8x32xf32>,
    %c0_24 = arith.constant 0 : index
    %c0_25 = arith.constant 0 : index
    %42 = vector.load %arg8[%c0_24, %c0_25] : memref<1x32xf32, #tpu.memory_space<vmem>>, vector<1x32xf32>
    %c0_26 = arith.constant 0 : index
    %c0_27 = arith.constant 0 : index
    %43 = vector.load %arg9[%c0_26, %c0_27] : memref<1x32xf32, #tpu.memory_space<vmem>>, vector<1x32xf32>
    %cst_28 = arith.constant dense<0.000000e+00> : vector<8xf32>
    %44 = vector.multi_reduction <add>, %38, %cst_28 [1] : vector<8x32xf32> to vector<8xf32>
    %45 = vector.shape_cast %44 : vector<8xf32> to vector<8x1xf32>
    %cst_29 = arith.constant 3.200000e+01 : f32
    %46 = vector.broadcast %cst_29 : f32 to vector<8x1xf32>
    %47 = arith.divf %45, %46 : vector<8x1xf32>
    %48 = vector.broadcast %47 : vector<8x1xf32> to vector<8x32xf32>
    %49 = arith.subf %38, %48 : vector<8x32xf32>
    %50 = arith.mulf %49, %49 : vector<8x32xf32>
    %cst_30 = arith.constant dense<0.000000e+00> : vector<8xf32>
    %51 = vector.multi_reduction <add>, %50, %cst_30 [1] : vector<8x32xf32> to vector<8xf32>
    %52 = vector.shape_cast %51 : vector<8xf32> to vector<8x1xf32>
    %cst_31 = arith.constant 3.200000e+01 : f32
    %53 = vector.broadcast %cst_31 : f32 to vector<8x1xf32>
    %54 = arith.divf %52, %53 : vector<8x1xf32>
    %55 = vector.broadcast %47 : vector<8x1xf32> to vector<8x32xf32>
    %56 = arith.subf %38, %55 : vector<8x32xf32>
    %cst_32 = arith.constant 9.99999974E-6 : f32
    %57 = vector.broadcast %cst_32 : f32 to vector<8x1xf32>
    %58 = arith.addf %54, %57 : vector<8x1xf32>
    %59 = math.rsqrt %58 : vector<8x1xf32>
    %60 = vector.broadcast %59 : vector<8x1xf32> to vector<8x32xf32>
    %61 = arith.mulf %56, %60 : vector<8x32xf32>
    %62 = vector.broadcast %42 : vector<1x32xf32> to vector<8x32xf32>
    %63 = arith.mulf %61, %62 : vector<8x32xf32>
    %64 = vector.broadcast %43 : vector<1x32xf32> to vector<8x32xf32>
    %65 = arith.addf %63, %64 : vector<8x32xf32>
    %c0_33 = arith.constant 0 : index
    %c0_34 = arith.constant 0 : index
    %c0_35 = arith.constant 0 : index
    %66 = vector.load %arg11[%c0_33, %c0_34, %c0_35] : memref<1x8x32xf32, #tpu.memory_space<vmem>>, vector<1x8x32xf32>
    %67 = vector.shape_cast %66 : vector<1x8x32xf32> to vector<8x32xf32>
    %68 = vector.shape_cast %65 : vector<8x32xf32> to vector<1x8x32xf32>
    tpu.vector_store %arg11[%c0_33, %c0_34, %c0_35], %68 {strides = array<i32>} : memref<1x8x32xf32, #tpu.memory_space<vmem>>, vector<1x8x32xf32>,
    return
  }
  func.func @transform_0(%arg0: i32) -> (i32, i32, i32) {
    %c0_i32 = arith.constant 0 : i32
    %c0_i32_0 = arith.constant 0 : i32
    %c0_i32_1 = arith.constant 0 : i32
    return %arg0, %c0_i32, %c0_i32_0 : i32, i32, i32
  }
  func.func @transform_1(%arg0: i32) -> (i32, i32) {
    %c0_i32 = arith.constant 0 : i32
    %c0_i32_0 = arith.constant 0 : i32
    %c0_i32_1 = arith.constant 0 : i32
    return %c0_i32, %c0_i32_0 : i32, i32
  }
  func.func @transform_2(%arg0: i32) -> (i32, i32) {
    %c0_i32 = arith.constant 0 : i32
    %c0_i32_0 = arith.constant 0 : i32
    %c0_i32_1 = arith.constant 0 : i32
    return %c0_i32, %c0_i32_0 : i32, i32
  }
  func.func @transform_3(%arg0: i32) -> (i32, i32) {
    %c0_i32 = arith.constant 0 : i32
    %c0_i32_0 = arith.constant 0 : i32
    %c0_i32_1 = arith.constant 0 : i32
    return %c0_i32, %c0_i32_0 : i32, i32
  }
  func.func @transform_4(%arg0: i32) -> (i32, i32) {
    %c0_i32 = arith.constant 0 : i32
    %c0_i32_0 = arith.constant 0 : i32
    %c0_i32_1 = arith.constant 0 : i32
    return %c0_i32, %c0_i32_0 : i32, i32
  }
  func.func @transform_5(%arg0: i32) -> (i32, i32) {
    %c0_i32 = arith.constant 0 : i32
    %c0_i32_0 = arith.constant 0 : i32
    %c0_i32_1 = arith.constant 0 : i32
    return %c0_i32, %c0_i32_0 : i32, i32
  }
  func.func @transform_6(%arg0: i32) -> (i32, i32) {
    %c0_i32 = arith.constant 0 : i32
    %c0_i32_0 = arith.constant 0 : i32
    %c0_i32_1 = arith.constant 0 : i32
    return %c0_i32, %c0_i32_0 : i32, i32
  }
  func.func @transform_7(%arg0: i32) -> (i32, i32) {
    %c0_i32 = arith.constant 0 : i32
    %c0_i32_0 = arith.constant 0 : i32
    %c0_i32_1 = arith.constant 0 : i32
    return %c0_i32, %c0_i32_0 : i32, i32
  }
  func.func @transform_8(%arg0: i32) -> (i32, i32) {
    %c0_i32 = arith.constant 0 : i32
    %c0_i32_0 = arith.constant 0 : i32
    %c0_i32_1 = arith.constant 0 : i32
    return %c0_i32, %c0_i32_0 : i32, i32
  }
  func.func @transform_9(%arg0: i32) -> (i32, i32, i32) {
    %c0_i32 = arith.constant 0 : i32
    %c0_i32_0 = arith.constant 0 : i32
    %c0_i32_1 = arith.constant 0 : i32
    return %arg0, %c0_i32, %c0_i32_0 : i32, i32, i32
  }
  func.func @transform_10(%arg0: i32) -> (i32, i32, i32) {
    %c0_i32 = arith.constant 0 : i32
    %c0_i32_0 = arith.constant 0 : i32
    %c0_i32_1 = arith.constant 0 : i32
    return %arg0, %c0_i32, %c0_i32_0 : i32, i32, i32
  }
}

</mosaic_0001>

<bundles_post_ra>
// kernel: transformer_decoder.8
= control target key start
LH: loop header
LB: loop body
LE: loop exit
PB: predicated region body
PF: predicated region fallthrough
CT: control target
= control target key end

     0   :  { %16 = vsyncpa [#allocation3], 0  ;;  %s772_s13 = smov 0   ;;  %s849_s0 = inlined_call_operand.vmem [shape: f32[2,8,32], index: 0, kind: input, shape index: {}]   ;;  %s850_s1 = inlined_call_operand.hbm [shape: f32[32,64], index: 1, kind: input, shape index: {}]   ;;  %s851_s2 = inlined_call_operand.vmem [shape: f32[1,64], index: 2, kind: input, shape index: {}]   ;;  %s852_s3 = inlined_call_operand.vmem [shape: f32[64,32], index: 3, kind: input, shape index: {}]   ;;  %s853_s4 = inlined_call_operand.vmem [shape: f32[1,32], index: 4, kind: input, shape index: {}]   ;;  %s854_s5 = inlined_call_operand.vmem [shape: f32[1,32], index: 5, kind: input, shape index: {}]   ;;  %s855_s6 = inlined_call_operand.vmem [shape: f32[1,32], index: 6, kind: input, shape index: {}]   ;;  %s856_s7 = inlined_call_operand.vmem [shape: f32[1,32], index: 7, kind: input, shape index: {}]   ;;  %s857_s8 = inlined_call_operand.vmem [shape: f32[1,32], index: 8, kind: input, shape index: {}]   ;;  %s858_s9 = inlined_call_operand.vmem [shape: f32[2,8,32], index: 9, kind: output, shape index: {0}]   ;;  %s859_s10 = inlined_call_operand.vmem [shape: f32[2,8,32], index: 10, kind: output, shape index: {1}]  }
   0x1 LB: > { %s284_s16 = sshll.u32 %s850_s1, 4  ;;  %s623_s17 = sadd.s32 4294967295, %s711_s13   ;;  %s711_s13 = sphi %s772_s13, %s22_s13   ;;  %s285_s16 = int_to_ptr.hbm [resolvable:$true] %s284_s16 }
   0x2   : > { %p625_p0 = scmp.ge.s32.totalorder %s711_s13, 1  ;;  %p273_p1 = scmp.lt.s32.totalorder %s711_s13, 3 }
   0x3   : > { %p645_p2 = scmp.eq.s32.totalorder %s623_s17, 0  ;;  %s713_s18 = smov [#allocation2]  }
   0x4   : > { %p274_p3 = pnand %p625_p0, %p273_p1  ;;  %s286_s19 = sshll.u32 %s713_s18, 4  ;;  %s287_s19 = int_to_ptr.vmem [resolvable:$true] %s286_s19 }
   0x5   : > { %s714_s20 = smov 128   ;;  %s715_s21 = smov 8  }
   0x6   : > { %p641_p4 = pneg %p274_p3  ;;  %330 = sbr.rel (%p274_p3) target bundleno = 817 (0x331), region = 56 }
   0x8   : > { %p642_p5 = pnand %p645_p2, %p641_p4 }
   0xa   : > { %644 = dma.hbm_to_vmem [thread:$0]  (!%p642_p5), %s285_s16, 512, %s287_s19, [#allocation3], %s714_s20, %s714_s20, %s715_s21  }
   0xb   : > { %706 = dma.done.wait (%p645_p2), [#allocation3], 512  }
   0xc   : > { %708 = vsyncadd (%p645_p2), [#allocation3], 4294966784  ;;  %p371_p6 = scmp.lt.s32.totalorder %s623_s17, 1  ;;  %v387_v0 = vld [vmem:[#allocation2 + $0x18] sm:$0xff]  ;;  %v386_v1 = vld [vmem:[#allocation2 + $0x10] sm:$0xff]  ;;  %vm392_vm0 = vcmask 261120  }
   0xd   : > { %408 = vmatpush.msra.mxu0 %v387_v0  ;;  %v424_v2 = vld [vmem:[%s852_s3 + $0x38] sm:$0xff]  ;;  %v385_v3 = vld [vmem:[#allocation2 + $0x8] sm:$0xff]  ;;  %v384_v4 = vld [vmem:[#allocation2] sm:$0xff]  ;;  %vm429_vm1 = vcmask 523264   ;;  %v716_v22 = vmov 32.0  }
   0xe   : > { %s861_s17 = smov (!%p371_p6, %s623_s17), 1  ;;  %441 = vmatpush.msra.mxu1 %v424_v2  ;;  %v423_v5 = vld [vmem:[%s852_s3 + $0x30] sm:$0xff]  ;;  %v422_v7 = vld [vmem:[%s852_s3 + $0x28] sm:$0xff]  ;;  %v421_v8 = vld [vmem:[%s852_s3 + $0x20] sm:$0xff]  ;;  %665 = vrcp.f32 %v716_v22 }
   0xf   : > { %s783_s22 = sshll.u32 %s861_s17, 3  ;;  %409 = vmatpush.msra.mxu0 %v386_v1  ;;  %v420_v9 = vld [vmem:[%s852_s3 + $0x18] sm:$0xff]  ;;  %v419_v10 = vld [vmem:[%s852_s3 + $0x10] sm:$0xff]  ;;  %v418_v11 = vld [vmem:[%s852_s3 + $0x8] sm:$0xff] }
  0x10   : > { %s374_s25 = scalar_lea.vmem %s849_s0, %s783_s22  ;;  %442 = vmatpush.msra.mxu1 %v423_v5  ;;  %v417_v12 = vld [vmem:[%s852_s3] sm:$0xff]  ;;  %s378_s15 = scalar_lea.vmem %s858_s9, %s783_s22 }
  0x11   : > { %v383_v6 = vld [vmem:[%s374_s25] sm:$0xff]  ;;  %410 = vmatpush.msra.mxu0 %v385_v3  ;;  %s382_s23 = scalar_lea.vmem %s859_s10, %s783_s22 }
  0x12   : > { %443 = vmatpush.msra.mxu1 %v422_v7  ;;  %v659_v13 = vld [vmem:[%s851_s2] ss:$0 sm:$0xff] }
  0x13   : > { %411 = vmatpush.msra.mxu0 %v384_v4  ;;  %v660_v17 = vld [vmem:[%s853_s4] ss:$0 sm:$0xff] }
  0x14   : > { %633 = vmatmul.msk.f32.vlgmr.msra.gmra.mxu0 %vm392_vm0, %v383_v6  ;;  %444 = vmatpush.msra.mxu1 %v421_v8  ;;  %v666_v23 = vpop.eup %665  ;;  %v661_v43 = vld [vmem:[%s854_s5] ss:$0 sm:$0xff] }
  0x15   : > { %v460_v24 = vmul.f32 32.0, %v666_v23  ;;  %vm464_vm2 = vweird.f32 %v666_v23  ;;  %v662_v46 = vld [vmem:[%s855_s6] ss:$0 sm:$0xff] }
  0x16   : > { %445 = vmatpush.msra.mxu1 %v420_v9  ;;  %v663_v0 = vld [vmem:[%s856_s7] ss:$0 sm:$0xff] }
  0x17   : > { %v461_v25 = vsub.f32 1.0, %v460_v24  ;;  %v664_v2 = vld [vmem:[%s857_s8] ss:$0 sm:$0xff] }
  0x18   : > { %446 = vmatpush.msra.mxu1 %v419_v10 }
  0x19   : > { %v462_v26 = vmul.f32 %v666_v23, %v461_v25 }
  0x1a   : > { %447 = vmatpush.msra.mxu1 %v418_v11 }
  0x1b   : > { %v463_v27 = vadd.f32 %v666_v23, %v462_v26 }
  0x1c   : > { %448 = vmatpush.msra.mxu1 %v417_v12 }
  0x1d   : > { %v465_v28 = vsel %vm464_vm2, %v666_v23, %v463_v27 }
  0x91   : > { %v413_v14 = vpop.f32.mrf.mxu0 }
  0x92   : > { %v414_v15 = vadd.f32 %v659_v13, %v413_v14 }
  0x94   : > { %v416_v16 = vmax.f32 %v414_v15, 0.0 }
  0x96   : > { %634 = vmatmul.msk.f32.vlgmr.msra.gmra.mxu1 %vm429_vm1, %v416_v16 }
 0x113   : > { %v450_v18 = vpop.f32.mrf.mxu1 }
 0x114   : > { %v451_v19 = vadd.f32 %v660_v17, %v450_v18 }
 0x116   : > { %v453_v20 = vadd.f32 %v451_v19, %v383_v6 }
 0x118   : > { %v456_v21 = vsel %vm392_vm0, %v453_v20, 0.0 }
 0x119   : > { %457 = vadd.xlane.f32.xlu0 %v456_v21 }
 0x18c   : > { %v458_v29 = vpop.xlane.xlu0 %457 }
 0x18d   : > { %v466_v30 = vmul.f32 %v465_v28, %v458_v29 }
 0x18f   : > { %v467_v31 = vsub.f32 %v453_v20, %v466_v30 }
 0x191   : > { %v468_v32 = vmul.f32 %v467_v31, %v467_v31 }
 0x193   : > { %v469_v33 = vsel %vm392_vm0, %v468_v32, 0.0 }
 0x194   : > { %470 = vadd.xlane.f32.xlu0 %v469_v33 }
 0x207   : > { %v471_v34 = vpop.xlane.xlu0 %470 }
 0x208   : > { %v472_v35 = vmul.f32 %v471_v34, %v465_v28 }
 0x20a   : > { %v473_v36 = vadd.f32 1e-05, %v472_v35 }
 0x20c   : > { %667 = vrsqrt.f32 %v473_v36  ;;  %vm480_vm4 = vweird.f32 %v473_v36 }
 0x212   : > { %v668_v37 = vpop.eup %667 }
 0x213   : > { %v475_v38 = vmul.f32 %v668_v37, %v473_v36  ;;  %vm481_vm3 = vweird.f32 %v668_v37 }
 0x214   : > { %vm482_vm5 = vmor %vm480_vm4, %vm481_vm3 }
 0x215   : > { %v476_v39 = vmul.f32 %v668_v37, %v475_v38 }
 0x217   : > { %v477_v40 = vmul.f32 0.5, %v476_v39 }
 0x219   : > { %v478_v41 = vsub.f32 1.5, %v477_v40 }
 0x21b   : > { %v479_v42 = vmul.f32 %v668_v37, %v478_v41 }
 0x21d   : > { %v483_v44 = vsel %vm482_vm5, %v668_v37, %v479_v42 }
 0x21e   : > { %v484_v45 = vmul.f32 %v483_v44, %v467_v31 }
 0x220   : > { %v488_v47 = vmul.f32 %v661_v43, %v484_v45 }
 0x222   : > { %v492_v48 = vadd.f32 %v662_v46, %v488_v47 }
 0x224   : > { %v496_v49 = vsel %vm392_vm0, %v492_v48, 0.0  ;;  %493 = vst.msk [vmem:[%s378_s15] sm:$0xff] %vm392_vm0, %v492_v48 }
 0x225   : > { %497 = vadd.xlane.f32.xlu1 %v496_v49 }
 0x298   : > { %v498_v50 = vpop.xlane.xlu1 %497 }
 0x299   : > { %v499_v51 = vmul.f32 %v498_v50, %v465_v28 }
 0x29b   : > { %v500_v52 = vsub.f32 %v492_v48, %v499_v51 }
 0x29d   : > { %v501_v53 = vmul.f32 %v500_v52, %v500_v52 }
 0x29f   : > { %v502_v54 = vsel %vm392_vm0, %v501_v53, 0.0 }
 0x2a0   : > { %503 = vadd.xlane.f32.xlu1 %v502_v54 }
 0x313   : > { %v504_v55 = vpop.xlane.xlu1 %503 }
 0x314   : > { %v505_v56 = vmul.f32 %v504_v55, %v465_v28 }
 0x316   : > { %v506_v57 = vadd.f32 1e-05, %v505_v56 }
 0x318   : > { %669 = vrsqrt.f32 %v506_v57  ;;  %vm513_vm7 = vweird.f32 %v506_v57 }
 0x31e   : > { %v670_v58 = vpop.eup %669 }
 0x31f   : > { %v508_v59 = vmul.f32 %v670_v58, %v506_v57  ;;  %vm514_vm6 = vweird.f32 %v670_v58 }
 0x320   : > { %vm515_vm8 = vmor %vm513_vm7, %vm514_vm6 }
 0x321   : > { %v509_v60 = vmul.f32 %v670_v58, %v508_v59 }
 0x323   : > { %v510_v61 = vmul.f32 0.5, %v509_v60 }
 0x325   : > { %v511_v62 = vsub.f32 1.5, %v510_v61 }
 0x327   : > { %v512_v63 = vmul.f32 %v670_v58, %v511_v62 }
 0x329   : > { %v516_v1 = vsel %vm515_vm8, %v670_v58, %v512_v63 }
 0x32a   : > { %v517_v3 = vmul.f32 %v516_v1, %v500_v52 }
 0x32c   : > { %v521_v4 = vmul.f32 %v663_v0, %v517_v3 }
 0x32e   : > { %v525_v5 = vadd.f32 %v664_v2, %v521_v4 }
 0x330   : > { %526 = vst.msk [vmem:[%s382_s23] sm:$0xff] %vm392_vm0, %v525_v5 }
 0x331 PF: > { %s22_s13 = sadd.s32 1, %s711_s13  }
 0x332   : > { %p19_p7 = scmp.ge.s32.totalorder %s22_s13, 4  }
 0x334   :  { %21 = sbr.rel (!%p19_p7) target bundleno = 1 (0x1), region = 103 }
 0x339   :  { %560 = vsyncpa [#allocation3], 1 }
 0x33a   :  { %562 = vsyncpa [#allocation3 + $0x1], 1 }

// kernel: transformer_decoder.6
= control target key start
LH: loop header
LB: loop body
LE: loop exit
PB: predicated region body
PF: predicated region fallthrough
CT: control target
= control target key end

     0   :  { %s1478_s0 = inlined_call_operand.vmem [shape: f32[2,8,32], index: 0, kind: input, shape index: {}, may-alias: {0,2}]   ;;  %s1479_s1 = inlined_call_operand.vmem [shape: f32[2,8,32], index: 1, kind: input, shape index: {}, may-alias: {1,3}]   ;;  %s1480_s2 = inlined_call_operand.vmem [shape: f32[2,8,32], index: 2, kind: input, shape index: {}, may-alias: {0,2}]   ;;  %s1481_s3 = inlined_call_operand.vmem [shape: f32[2,8,32], index: 3, kind: input, shape index: {}, may-alias: {1,3}]   ;;  %s1482_s4 = inlined_call_operand.vmem [shape: f32[32,32], index: 4, kind: input, shape index: {}]   ;;  %s1483_s5 = inlined_call_operand.vmem [shape: f32[1,32], index: 5, kind: input, shape index: {}]   ;;  %s1484_s6 = inlined_call_operand.vmem [shape: f32[32,32], index: 6, kind: input, shape index: {}]   ;;  %s1485_s7 = inlined_call_operand.vmem [shape: f32[1,32], index: 7, kind: input, shape index: {}]   ;;  %s1486_s8 = inlined_call_operand.vmem [shape: f32[32,32], index: 8, kind: input, shape index: {}]   ;;  %s1487_s9 = inlined_call_operand.vmem [shape: f32[1,32], index: 9, kind: input, shape index: {}]   ;;  %s1488_s10 = inlined_call_operand.hbm [shape: f32[32,32], index: 10, kind: input, shape index: {}]   ;;  %s1489_s11 = inlined_call_operand.vmem [shape: f32[1,32], index: 11, kind: input, shape index: {}]   ;;  %s1490_s12 = inlined_call_operand.vmem [shape: f32[1,32], index: 12, kind: input, shape index: {}]   ;;  %s1491_s13 = inlined_call_operand.vmem [shape: f32[1,32], index: 13, kind: input, shape index: {}]   ;;  %s1492_s14 = inlined_call_operand.vmem [shape: f32[2,8,32], index: 14, kind: output, shape index: {}]  }
   0x1   :  { %1493 = sst [smem:[#allocation5_spill]] %s1480_s2 }
   0x2   :  { %19 = vsyncpa [#allocation3], 0  ;;  %s1345_s29 = smov 0  }
   0x3 LB: > { %s399_s16 = sshll.u32 %s1488_s10, 4  ;;  %s1137_s17 = sadd.s32 4294967295, %s1261_s29   ;;  %s1261_s29 = sphi %s1345_s29, %s25_s29   ;;  %s400_s16 = int_to_ptr.hbm [resolvable:$true] %s399_s16 }
   0x4   : > { %p1139_p0 = scmp.ge.s32.totalorder %s1261_s29, 1  ;;  %p370_p1 = scmp.lt.s32.totalorder %s1261_s29, 3 }
   0x5   : > { %p1178_p2 = scmp.eq.s32.totalorder %s1137_s17, 0  ;;  %s1263_s18 = smov [#allocation2]  }
   0x6   : > { %p371_p3 = pnand %p1139_p0, %p370_p1  ;;  %s401_s19 = sshll.u32 %s1263_s18, 4  ;;  %s402_s19 = int_to_ptr.vmem [resolvable:$true] %s401_s19 }
   0x7   : > { %s1264_s20 = smov 128   ;;  %s1265_s21 = smov 8  }
   0x8   : > { %p1174_p4 = pneg %p371_p3  ;;  %454 = sbr.rel (%p371_p3) target bundleno = 1353 (0x549), region = 76 }
   0xa   : > { %p1175_p5 = pnand %p1178_p2, %p1174_p4 }
   0xc   : > { %1177 = dma.hbm_to_vmem [thread:$0]  (!%p1175_p5), %s400_s16, 512, %s402_s19, [#allocation3], %s1264_s20, %s1264_s20, %s1265_s21  }
   0xd   : > { %1256 = dma.done.wait (%p1178_p2), [#allocation3], 512  }
   0xe   : > { %1258 = vsyncadd (%p1178_p2), [#allocation3], 4294966784  ;;  %p511_p6 = scmp.lt.s32.totalorder %s1137_s17, 1  ;;  %s1494_s2 = sld [smem:[#allocation5_spill]]  ;;  %v572_v0 = vld [vmem:[%s1484_s6 + $0x18] sm:$0xff]  ;;  %v571_v1 = vld [vmem:[%s1484_s6 + $0x10] sm:$0xff] }
   0xf   : > { %v540_v2 = vld [vmem:[%s1482_s4 + $0x18] sm:$0xff]  ;;  %592 = vmatpush.msra.mxu1 %v572_v0  ;;  %v570_v3 = vld [vmem:[%s1484_s6 + $0x8] sm:$0xff]  ;;  %v539_v4 = vld [vmem:[%s1482_s4 + $0x10] sm:$0xff]  ;;  %vm545_vm0 = vcmask 261120   ;;  %vm635_vm1 = vcmask 64512   ;;  %s1267_s27 = smov 120  }
  0x10   : > { %s1496_s17 = smov (!%p511_p6, %s1137_s17), 1  ;;  %561 = vmatpush.msra.mxu0 %v540_v2  ;;  %v538_v5 = vld [vmem:[%s1482_s4 + $0x8] sm:$0xff]  ;;  %v569_v8 = vld [vmem:[%s1484_s6] sm:$0xff]  ;;  %s1268_s30 = smov 104   ;;  %v603_v20 = vld [vmem:[%s1486_s8 + $0x18] sm:$0xff] }
  0x11   : > { %s1356_s22 = sshll.u32 %s1496_s17, 3  ;;  %593 = vmatpush.msra.mxu1 %v571_v1  ;;  %v537_v12 = vld [vmem:[%s1482_s4] sm:$0xff]  ;;  %623 = vmatpush.msra.mxu2 %v603_v20  ;;  %v602_v21 = vld [vmem:[%s1486_s8 + $0x10] sm:$0xff]  ;;  %v601_v22 = vld [vmem:[%s1486_s8 + $0x8] sm:$0xff] }
  0x12   : > { %s526_s28 = scalar_lea.vmem %s1481_s3, %s1356_s22  ;;  %s514_s23 = scalar_lea.vmem %s1478_s0, %s1356_s22  ;;  %562 = vmatpush.msra.mxu0 %v539_v4  ;;  %v1195_v14 = vld [vmem:[%s1485_s7] ss:$0 sm:$0xff]  ;;  %v632_v56 = vld [vmem:[#allocation2 + $0x8] sm:$0xff] }
  0x13   : > { %s518_s26 = scalar_lea.vmem %s1479_s1, %s1356_s22  ;;  %v535_v7 = vld [vmem:[%s526_s28] sm:$0xff]  ;;  %594 = vmatpush.msra.mxu1 %v570_v3  ;;  %624 = vmatpush.msra.mxu2 %v602_v21  ;;  %s530_s17 = scalar_lea.vmem %s1492_s14, %s1356_s22 }
  0x14   : > { %s522_s25 = scalar_lea.vmem %s1494_s2, %s1356_s22  ;;  %v1395_v9 = vld [vmem:[%s514_s23] sm:$0xff]  ;;  %563 = vmatpush.msra.mxu0 %v538_v5 }
  0x15   : > { %v534_v6 = vld [vmem:[%s522_s25] sm:$0xff]  ;;  %595 = vmatpush.msra.mxu1 %v569_v8  ;;  %625 = vmatpush.msra.mxu2 %v601_v22 }
  0x16   : > { %v532_v10 = vld [vmem:[%s518_s26] sm:$0xff]  ;;  %v536_v11 = vadd.f32 %v535_v7, %v534_v6  ;;  %564 = vmatpush.msra.mxu0 %v537_v12  ;;  %s1266_s26 = smov 112  }
  0x17   : > { %v533_v13 = vadd.f32 %v532_v10, %v1395_v9  ;;  %v1196_v15 = vld [vmem:[%s1483_s5] ss:$0 sm:$0xff] }
  0x18   : > { %1150 = vmatmul.msk.f32.vlgmr.msra.gmra.mxu1 %vm545_vm0, %v536_v11  ;;  %v600_v23 = vld [vmem:[%s1486_s8] sm:$0xff] }
  0x19   : > { %1149 = vmatmul.msk.f32.vlgmr.msra.gmra.mxu0 %vm545_vm0, %v533_v13  ;;  %626 = vmatpush.msra.mxu2 %v600_v23  ;;  %v1197_v30 = vld [vmem:[%s1487_s9] ss:$0 sm:$0xff] }
  0x1a   : > { %1151 = vmatmul.msk.f32.vlgmr.msra.gmra.mxu2 %vm545_vm0, %v534_v6  ;;  %v631_v33 = vld [vmem:[#allocation2] sm:$0xff] }
  0x1b   : > { %782 = vmatpush.msrb.mxu2 %v632_v56  ;;  %v1199_v56 = vld [vmem:[%s1490_s12] ss:$0 sm:$0xff] }
  0x95   : > { %v597_v16 = vpop.f32.mrf.mxu1 }
  0x96   : > { %v566_v17 = vpop.f32.mrf.mxu0  ;;  %v598_v18 = vadd.f32 %v1195_v14, %v597_v16  ;;  %v633_v16 = vld [vmem:[#allocation2 + $0x10] sm:$0xff] }
  0x97   : > { %v567_v19 = vadd.f32 %v1196_v15, %v566_v17  ;;  %894 = vmatpush.msra.mxu2 %v633_v16  ;;  %v634_v17 = vld [vmem:[#allocation2 + $0x18] sm:$0xff] }
  0x98   : > { %812 = vrot.lane.b32.xlu2 %v598_v18, %s1266_s26  ;;  %699 = vrot.lane.b32.xlu1 %v598_v18, %s1267_s27 }
  0x99   : > { %1152 = vmatpush.xpose.msk.msra.mxu3 %vm635_vm1, %v598_v18 }
  0x9c   : > { %1153 = vmatmul.msk.f32.vlgmr.msra.gmra.mxu3 %vm635_vm1, %v567_v19 }
  0x9d   : > { %v628_v31 = vpop.f32.mrf.mxu2 }
  0x9e   : > { %v629_v32 = vadd.f32 %v1197_v30, %v628_v31 }
  0xa0   : > { %902 = vrot.lane.b32.xlu2 %v598_v18, %s1268_s30  ;;  %697 = vrot.lane.b32.xlu1 %v567_v19, %s1267_s27 }
  0xa1   : > { %690 = vmatpush.msrb.mxu3 %v629_v32 }
  0xa3   : > { %805 = vmatpush.msra.mxu3 %v631_v33 }
  0xa8   : > { %900 = vrot.lane.b32.xlu1 %v567_v19, %s1268_s30 }
  0xf2   : > { %v813_v25 = vpop.permute.xlu2 %812 }
  0xfa   : > { %v903_v41 = vpop.permute.xlu2 %902 }
 0x10a   : > { %v700_v24 = vpop.permute.xlu1 %699 }
 0x10b   : > { %1155 = vmatpush.xpose.msk.msrb.mxu0 %vm635_vm1, %v700_v24 }
 0x10f   : > { %1160 = vmatpush.xpose.msk.msra.mxu0 %vm635_vm1, %v813_v25 }
 0x112   : > { %v698_v26 = vpop.permute.xlu1 %697 }
 0x113   : > { %1156 = vmatmul.msk.f32.vlgmr.msrb.gmra.mxu0 %vm635_vm1, %v698_v26 }
 0x11a   : > { %v901_v53 = vpop.permute.xlu1 %900 }
 0x11f   : > { %v659_v27 = vpop.f32.mrf.mxu3 }
 0x120   : > { %v662_v28 = vmul.f32 0.35355338, %v659_v27 }
 0x122   : > { %v663_v29 = vsel %vm635_vm1, %v662_v28, -inf }
 0x123   : > { %664 = vmax.xlane.f32.xlu0 %v663_v29 }
 0x190   : > { %v722_v34 = vpop.f32.mrf.mxu0 }
 0x191   : > { %v725_v35 = vmul.f32 0.35355338, %v722_v34 }
 0x193   : > { %v726_v36 = vsel %vm635_vm1, %v725_v35, -inf }
 0x194   : > { %727 = vmax.xlane.f32.xlu2 %v726_v36  ;;  %v1269_v36 = vmov 32.0  }
 0x196   : > { %v665_v37 = vpop.xlane.xlu0 %664 }
 0x197   : > { %v666_v38 = vsub.f32 %v662_v28, %v665_v37 }
 0x199   : > { %v667_v39 = vmul.f32 1.442695, %v666_v38 }
 0x19b   : > { %1201 = vpow2.f32 %v667_v39 }
 0x1a1   : > { %v1202_v40 = vpop.eup %1201 }
 0x1a2   : > { %1154 = vmatmul.msk.f32.vlgmr.msrb.gmra.mxu3 %vm635_vm1, %v1202_v40  ;;  %v669_v42 = vsel %vm635_vm1, %v1202_v40, 0.0 }
 0x1a3   : > { %1164 = vmatpush.xpose.msk.msrb.mxu3 %vm635_vm1, %v903_v41  ;;  %670 = vadd.xlane.f32.xlu0 %v669_v42 }
 0x1ac   : > { %848 = vrot.lane.b32.xlu2 %v629_v32, %s1266_s26 }
 0x1b7   : > { %810 = vrot.lane.b32.xlu0 %v567_v19, %s1266_s26 }
 0x1bf   : > { %736 = vrot.lane.b32.xlu0 %v629_v32, %s1267_s27 }
 0x207   : > { %v728_v43 = vpop.xlane.xlu2 %727 }
 0x208   : > { %v729_v44 = vsub.f32 %v725_v35, %v728_v43 }
 0x20a   : > { %v730_v45 = vmul.f32 1.442695, %v729_v44 }
 0x20c   : > { %1203 = vpow2.f32 %v730_v45 }
 0x20f   : > { %v849_v55 = vpop.permute.xlu2 %848 }
 0x212   : > { %v1204_v46 = vpop.eup %1203 }
 0x213   : > { %v732_v47 = vsel %vm635_vm1, %v1204_v46, 0.0 }
 0x214   : > { %733 = vadd.xlane.f32.xlu2 %v732_v47 }
 0x216   : > { %v671_v48 = vpop.xlane.xlu0 %670 }
 0x217   : > { %1205 = vrcp.f32 %v671_v48 }
 0x21d   : > { %v1206_v49 = vpop.eup %1205 }
 0x225   : > { %v692_v50 = vpop.f32.mrf.mxu3 }
 0x226   : > { %v696_v51 = vmul.f32 %v1206_v49, %v692_v50 }
 0x228   : > { %1159 = vmatmul.msk.f32.vlgmr.msra.gmra.mxu3 %vm635_vm1, %v696_v51 }
 0x229   : > { %v811_v52 = vpop.permute.xlu0 %810 }
 0x22a   : > { %1161 = vmatmul.msk.f32.vlgmr.msra.gmra.mxu0 %vm635_vm1, %v811_v52 }
 0x230   : > { %1165 = vmatmul.msk.f32.vlgmr.msrb.gmra.mxu3 %vm635_vm1, %v901_v53 }
 0x231   : > { %v737_v54 = vpop.permute.xlu0 %736 }
 0x232   : > { %757 = vmatpush.msrb.mxu1 %v737_v54 }
 0x233   : > { %1157 = vmatmul.msk.f32.vlgmr.msrb.gmra.mxu1 %vm635_vm1, %v1204_v46 }
 0x234   : > { %869 = vmatpush.msra.mxu1 %v849_v55 }
 0x236   : > { %984 = vmatpush.msrb.mxu1 %v634_v17 }
 0x287   : > { %v734_v57 = vpop.xlane.xlu2 %733 }
 0x288   : > { %1207 = vrcp.f32 %v734_v57 }
 0x28e   : > { %v1208_v62 = vpop.eup %1207 }
 0x2a7   : > { %v835_v58 = vpop.f32.mrf.mxu0 }
 0x2a8   : > { %v838_v59 = vmul.f32 0.35355338, %v835_v58  ;;  %v1200_v58 = vld [vmem:[%s1491_s13] ss:$0 sm:$0xff] }
 0x2aa   : > { %v839_v60 = vsel %vm635_vm1, %v838_v59, -inf }
 0x2ab   : > { %v807_v61 = vpop.f32.mrf.mxu3  ;;  %840 = vmax.xlane.f32.xlu1 %v839_v60 }
 0x2b0   : > { %v759_v63 = vpop.f32.mrf.mxu1 }
 0x2b1   : > { %v763_v0 = vmul.f32 %v1208_v62, %v759_v63 }
 0x2b3   : > { %1158 = vmatmul.msk.f32.vlgmr.msrb.gmra.mxu2 %vm635_vm1, %v763_v0  ;;  %v925_v1 = vpop.f32.mrf.mxu3 }
 0x2b4   : > { %v928_v2 = vmul.f32 0.35355338, %v925_v1 }
 0x2b6   : > { %v929_v3 = vsel %vm635_vm1, %v928_v2, -inf }
 0x2b7   : > { %930 = vmax.xlane.f32.xlu0 %v929_v3 }
 0x2c4   : > { %938 = vrot.lane.b32.xlu1 %v629_v32, %s1268_s30  ;;  %v1198_v32 = vld [vmem:[%s1489_s11] ss:$0 sm:$0xff] }
 0x31e   : > { %v841_v4 = vpop.xlane.xlu1 %840 }
 0x31f   : > { %v842_v5 = vsub.f32 %v838_v59, %v841_v4 }
 0x321   : > { %v843_v6 = vmul.f32 1.442695, %v842_v5 }
 0x323   : > { %1209 = vpow2.f32 %v843_v6 }
 0x329   : > { %v1210_v7 = vpop.eup %1209 }
 0x32a   : > { %1162 = vmatmul.msk.f32.vlgmr.msra.gmra.mxu1 %vm635_vm1, %v1210_v7  ;;  %v931_v8 = vpop.xlane.xlu0 %930  ;;  %v845_v10 = vsel %vm635_vm1, %v1210_v7, 0.0 }
 0x32b   : > { %v932_v11 = vsub.f32 %v928_v2, %v931_v8  ;;  %846 = vadd.xlane.f32.xlu0 %v845_v10 }
 0x32d   : > { %v933_v12 = vmul.f32 1.442695, %v932_v11 }
 0x32f   : > { %1211 = vpow2.f32 %v933_v12 }
 0x335   : > { %v1212_v13 = vpop.eup %1211 }
 0x336   : > { %v939_v14 = vpop.permute.xlu1 %938  ;;  %v935_v15 = vsel %vm635_vm1, %v1212_v13, 0.0  ;;  %v784_v26 = vpop.f32.mrf.mxu2 }
 0x337   : > { %959 = vmatpush.msrb.mxu0 %v939_v14  ;;  %936 = vadd.xlane.f32.xlu1 %v935_v15  ;;  %v808_v28 = vadd.f32 %v807_v61, %v784_v26 }
 0x338   : > { %1166 = vmatmul.msk.f32.vlgmr.msrb.gmra.mxu0 %vm635_vm1, %v1212_v13 }
 0x39e   : > { %v847_v18 = vpop.xlane.xlu0 %846 }
 0x39f   : > { %1213 = vrcp.f32 %v847_v18 }
 0x3a5   : > { %v1214_v19 = vpop.eup %1213 }
 0x3a7   : > { %v871_v20 = vpop.f32.mrf.mxu1 }
 0x3a8   : > { %v875_v21 = vmul.f32 %v1214_v19, %v871_v20 }
 0x3aa   : > { %1163 = vmatmul.msk.f32.vlgmr.msra.gmra.mxu2 %vm635_vm1, %v875_v21  ;;  %v937_v22 = vpop.xlane.xlu1 %936 }
 0x3ab   : > { %1215 = vrcp.f32 %v937_v22 }
 0x3ac   : > { %1217 = vrcp.f32 %v1269_v36 }
 0x3b1   : > { %v1216_v23 = vpop.eup %1215 }
 0x3b2   : > { %v1218_v37 = vpop.eup %1217 }
 0x3b3   : > { %v1002_v38 = vmul.f32 32.0, %v1218_v37  ;;  %vm1006_vm2 = vweird.f32 %v1218_v37 }
 0x3b5   : > { %v961_v24 = vpop.f32.mrf.mxu0  ;;  %v1003_v39 = vsub.f32 1.0, %v1002_v38 }
 0x3b6   : > { %v965_v25 = vmul.f32 %v1216_v23, %v961_v24 }
 0x3b7   : > { %v1004_v40 = vmul.f32 %v1218_v37, %v1003_v39 }
 0x3b8   : > { %1167 = vmatmul.msk.f32.vlgmr.msrb.gmra.mxu1 %vm635_vm1, %v965_v25 }
 0x3b9   : > { %v1005_v41 = vadd.f32 %v1218_v37, %v1004_v40 }
 0x3bb   : > { %v1007_v42 = vsel %vm1006_vm2, %v1218_v37, %v1005_v41 }
 0x42d   : > { %v896_v27 = vpop.f32.mrf.mxu2 }
 0x42e   : > { %v899_v29 = vadd.f32 %v896_v27, %v808_v28 }
 0x435   : > { %v986_v30 = vpop.f32.mrf.mxu1 }
 0x436   : > { %v989_v31 = vadd.f32 %v986_v30, %v899_v29 }
 0x438   : > { %v990_v33 = vadd.f32 %v989_v31, %v1395_v9 }
 0x43a   : > { %v995_v34 = vadd.f32 %v1198_v32, %v990_v33 }
 0x43c   : > { %v998_v35 = vsel %vm545_vm0, %v995_v34, 0.0 }
 0x43d   : > { %999 = vadd.xlane.f32.xlu0 %v998_v35 }
 0x4b0   : > { %v1000_v43 = vpop.xlane.xlu0 %999 }
 0x4b1   : > { %v1008_v44 = vmul.f32 %v1007_v42, %v1000_v43 }
 0x4b3   : > { %v1009_v45 = vsub.f32 %v995_v34, %v1008_v44 }
 0x4b5   : > { %v1010_v46 = vmul.f32 %v1009_v45, %v1009_v45 }
 0x4b7   : > { %v1011_v47 = vsel %vm545_vm0, %v1010_v46, 0.0 }
 0x4b8   : > { %1012 = vadd.xlane.f32.xlu0 %v1011_v47 }
 0x52b   : > { %v1013_v9 = vpop.xlane.xlu0 %1012 }
 0x52c   : > { %v1014_v48 = vmul.f32 %v1013_v9, %v1007_v42 }
 0x52e   : > { %v1015_v49 = vadd.f32 1e-05, %v1014_v48 }
 0x530   : > { %1219 = vrsqrt.f32 %v1015_v49  ;;  %vm1022_vm4 = vweird.f32 %v1015_v49 }
 0x536   : > { %v1220_v50 = vpop.eup %1219 }
 0x537   : > { %v1017_v51 = vmul.f32 %v1220_v50, %v1015_v49  ;;  %vm1023_vm3 = vweird.f32 %v1220_v50 }
 0x538   : > { %vm1024_vm5 = vmor %vm1022_vm4, %vm1023_vm3 }
 0x539   : > { %v1018_v52 = vmul.f32 %v1220_v50, %v1017_v51 }
 0x53b   : > { %v1019_v53 = vmul.f32 0.5, %v1018_v52 }
 0x53d   : > { %v1020_v54 = vsub.f32 1.5, %v1019_v53 }
 0x53f   : > { %v1021_v55 = vmul.f32 %v1220_v50, %v1020_v54 }
 0x541   : > { %v1025_v57 = vsel %vm1024_vm5, %v1220_v50, %v1021_v55 }
 0x542   : > { %v1026_v59 = vmul.f32 %v1025_v57, %v1009_v45 }
 0x544   : > { %v1030_v60 = vmul.f32 %v1199_v56, %v1026_v59 }
 0x546   : > { %v1034_v61 = vadd.f32 %v1200_v58, %v1030_v60 }
 0x548   : > { %1035 = vst.msk [vmem:[%s530_s17] sm:$0xff] %vm545_vm0, %v1034_v61 }
 0x549 PF: > { %s25_s29 = sadd.s32 1, %s1261_s29  }
 0x54a   : > { %p22_p7 = scmp.ge.s32.totalorder %s25_s29, 4  }
 0x54c   :  { %24 = sbr.rel (!%p22_p7) target bundleno = 3 (0x3), region = 120 }
 0x551   :  { %1055 = vsyncpa [#allocation3], 1 }
 0x552   :  { %1057 = vsyncpa [#allocation3 + $0x1], 1 }

// kernel: transformer_decoder.7
= control target key start
LH: loop header
LB: loop body
LE: loop exit
PB: predicated region body
PF: predicated region fallthrough
CT: control target
= control target key end

     0   :  { %19 = vsyncpa [#allocation3], 0  ;;  %s1417_s29 = smov 0   ;;  %s1560_s0 = inlined_call_operand.vmem [shape: f32[2,8,32], index: 0, kind: input, shape index: {}]   ;;  %s1561_s1 = inlined_call_operand.vmem [shape: f32[2,8,32], index: 1, kind: input, shape index: {}]   ;;  %s1562_s2 = inlined_call_operand.vmem [shape: f32[2,16,32], index: 2, kind: input, shape index: {}]   ;;  %s1563_s3 = inlined_call_operand.vmem [shape: f32[2,16,32], index: 3, kind: input, shape index: {}]   ;;  %s1564_s4 = inlined_call_operand.vmem [shape: f32[32,32], index: 4, kind: input, shape index: {}]   ;;  %s1565_s5 = inlined_call_operand.vmem [shape: f32[1,32], index: 5, kind: input, shape index: {}]   ;;  %s1566_s6 = inlined_call_operand.vmem [shape: f32[32,32], index: 6, kind: input, shape index: {}]   ;;  %s1567_s7 = inlined_call_operand.vmem [shape: f32[1,32], index: 7, kind: input, shape index: {}]   ;;  %s1568_s8 = inlined_call_operand.vmem [shape: f32[32,32], index: 8, kind: input, shape index: {}]   ;;  %s1569_s9 = inlined_call_operand.vmem [shape: f32[1,32], index: 9, kind: input, shape index: {}]   ;;  %s1570_s10 = inlined_call_operand.hbm [shape: f32[32,32], index: 10, kind: input, shape index: {}]   ;;  %s1571_s11 = inlined_call_operand.vmem [shape: f32[1,32], index: 11, kind: input, shape index: {}]   ;;  %s1572_s12 = inlined_call_operand.vmem [shape: f32[1,32], index: 12, kind: input, shape index: {}]   ;;  %s1573_s13 = inlined_call_operand.vmem [shape: f32[1,32], index: 13, kind: input, shape index: {}]   ;;  %s1574_s14 = inlined_call_operand.vmem [shape: f32[2,8,32], index: 14, kind: output, shape index: {}]  }
   0x1 LB: > { %s399_s16 = sshll.u32 %s1570_s10, 4  ;;  %s1184_s17 = sadd.s32 4294967295, %s1333_s29   ;;  %s1333_s29 = sphi %s1417_s29, %s25_s29   ;;  %s400_s16 = int_to_ptr.hbm [resolvable:$true] %s399_s16 }
   0x2   : > { %p1186_p0 = scmp.ge.s32.totalorder %s1333_s29, 1  ;;  %p370_p1 = scmp.lt.s32.totalorder %s1333_s29, 3 }
   0x3   : > { %p1235_p2 = scmp.eq.s32.totalorder %s1184_s17, 0  ;;  %s1335_s18 = smov [#allocation2]  }
   0x4   : > { %p371_p3 = pnand %p1186_p0, %p370_p1  ;;  %s401_s19 = sshll.u32 %s1335_s18, 4  ;;  %s402_s19 = int_to_ptr.vmem [resolvable:$true] %s401_s19 }
   0x5   : > { %s1336_s20 = smov 128   ;;  %s1337_s21 = smov 8  }
   0x6   : > { %p1231_p4 = pneg %p371_p3  ;;  %456 = sbr.rel (%p371_p3) target bundleno = 1376 (0x560), region = 76 }
   0x8   : > { %p1232_p5 = pnand %p1235_p2, %p1231_p4 }
   0xa   : > { %1234 = dma.hbm_to_vmem [thread:$0]  (!%p1232_p5), %s400_s16, 512, %s402_s19, [#allocation3], %s1336_s20, %s1336_s20, %s1337_s21  }
   0xb   : > { %1328 = dma.done.wait (%p1235_p2), [#allocation3], 512  }
   0xc   : > { %1330 = vsyncadd (%p1235_p2), [#allocation3], 4294966784  ;;  %p515_p6 = scmp.lt.s32.totalorder %s1184_s17, 1  ;;  %v581_v0 = vld [vmem:[%s1566_s6 + $0x18] sm:$0xff]  ;;  %v580_v1 = vld [vmem:[%s1566_s6 + $0x10] sm:$0xff]  ;;  %vm554_vm0 = vcmask 261120  }
   0xd   : > { %604 = vmatpush.msra.mxu1 %v581_v0  ;;  %v579_v4 = vld [vmem:[%s1566_s6 + $0x8] sm:$0xff]  ;;  %v549_v5 = vld [vmem:[%s1564_s4 + $0x18] sm:$0xff]  ;;  %v578_v6 = vld [vmem:[%s1566_s6] sm:$0xff]  ;;  %vm656_vm1 = vcmask 64512   ;;  %s1338_s24 = smov 104   ;;  %s1339_s25 = smov 120  }
   0xe   : > { %s1576_s17 = smov (!%p515_p6, %s1184_s17), 1  ;;  %570 = vmatpush.msra.mxu0 %v549_v5  ;;  %v548_v7 = vld [vmem:[%s1564_s4 + $0x10] sm:$0xff]  ;;  %v547_v8 = vld [vmem:[%s1564_s4 + $0x8] sm:$0xff]  ;;  %v546_v12 = vld [vmem:[%s1564_s4] sm:$0xff]  ;;  %vm687_vm2 = vcmask 130048  }
   0xf   : > { %s1225_s22 = sshll.u32 %s1576_s17, 4  ;;  %s1428_s23 = sshll.u32 %s1576_s17, 3  ;;  %605 = vmatpush.msra.mxu1 %v580_v1  ;;  %v618_v18 = vld [vmem:[%s1568_s8 + $0x18] sm:$0xff]  ;;  %v617_v19 = vld [vmem:[%s1568_s8 + $0x10] sm:$0xff]  ;;  %v616_v20 = vld [vmem:[%s1568_s8 + $0x8] sm:$0xff] }
  0x10   : > { %s527_s26 = scalar_lea.vmem %s1562_s2, %s1225_s22  ;;  %s532_s30 = scalar_lea.vmem %s1563_s3, %s1225_s22  ;;  %571 = vmatpush.msra.mxu0 %v548_v7  ;;  %641 = vmatpush.msra.mxu2 %v618_v18  ;;  %v1267_v21 = vld [vmem:[%s1567_s7] ss:$0 sm:$0xff] }
  0x11   : > { %v540_v2 = vld [vmem:[%s527_s26] sm:$0xff]  ;;  %s518_s21 = scalar_lea.vmem %s1560_s0, %s1428_s23  ;;  %s522_s27 = scalar_lea.vmem %s1561_s1, %s1428_s23  ;;  %606 = vmatpush.msra.mxu1 %v579_v4  ;;  %v541_v14 = vld [vmem:[%s527_s26 + $0x8] sm:$0xff] }
  0x12   : > { %v542_v3 = vld [vmem:[%s532_s30] sm:$0xff]  ;;  %572 = vmatpush.msra.mxu0 %v547_v8  ;;  %v543_v15 = vld [vmem:[%s532_s30 + $0x8] sm:$0xff]  ;;  %642 = vmatpush.msra.mxu2 %v617_v19 }
  0x13   : > { %v544_v9 = vadd.f32 %v542_v3, %v540_v2  ;;  %v1465_v10 = vld [vmem:[%s518_s21] sm:$0xff]  ;;  %607 = vmatpush.msra.mxu1 %v578_v6  ;;  %v545_v16 = vadd.f32 %v543_v15, %v541_v14  ;;  %s1340_s21 = smov 112  }
  0x14   : > { %v538_v11 = vld [vmem:[%s522_s27] sm:$0xff]  ;;  %573 = vmatpush.msra.mxu0 %v546_v12  ;;  %643 = vmatpush.msra.mxu2 %v616_v20 }
  0x15   : > { %v539_v13 = vadd.f32 %v538_v11, %v1465_v10  ;;  %1199 = vmatmul.msk.f32.vlgmr.msra.gmra.mxu1 %vm554_vm0, %v544_v9  ;;  %v615_v24 = vld [vmem:[%s1568_s8] sm:$0xff] }
  0x16   : > { %v652_v25 = vld [vmem:[#allocation2] sm:$0xff]  ;;  %644 = vmatpush.msra.mxu2 %v615_v24 }
  0x17   : > { %1198 = vmatmul.msk.f32.vlgmr.msra.gmra.mxu0 %vm554_vm0, %v539_v13  ;;  %v1268_v26 = vld [vmem:[%s1565_s5] ss:$0 sm:$0xff]  ;;  %1201 = vmatmul.msk.f32.vlgmr.msra.gmra.mxu2 %vm554_vm0, %v540_v2 }
  0x18   : > { %838 = vmatpush.msrb.mxu2 %v652_v25  ;;  %v1269_v39 = vld [vmem:[%s1569_s9] ss:$0 sm:$0xff] }
  0x1d   : > { %1200 = vmatmul.msk.f32.gmra.mxu1 %vm554_vm0, %v545_v16 }
  0x1f   : > { %1202 = vmatmul.msk.f32.gmra.mxu2 %vm554_vm0, %v541_v14 }
  0x92   : > { %v609_v17 = vpop.f32.mrf.mxu1 }
  0x93   : > { %v610_v28 = vadd.f32 %v1267_v21, %v609_v17 }
  0x94   : > { %v575_v27 = vpop.f32.mrf.mxu0 }
  0x95   : > { %v576_v29 = vadd.f32 %v1268_v26, %v575_v27 }
  0x9a   : > { %v612_v22 = vpop.f32.mrf.mxu1  ;;  %v646_v38 = vpop.f32.mrf.mxu2 }
  0x9b   : > { %v613_v23 = vadd.f32 %v1267_v21, %v612_v22  ;;  %v647_v41 = vadd.f32 %v1269_v39, %v646_v38 }
  0x9d   : > { %944 = vrot.lane.b32.xlu2 %v613_v23, %s1338_s24  ;;  %726 = vrot.lane.b32.xlu1 %v613_v23, %s1339_s25 }
  0x9e   : > { %1203 = vmatpush.xpose.msk.msra.mxu3 %vm656_vm1, %v613_v23 }
  0xa2   : > { %1204 = vmatpush.xpose.msk.msra.mxu3 %vm656_vm1, %v610_v28  ;;  %v649_v40 = vpop.f32.mrf.mxu2 }
  0xa3   : > { %v650_v42 = vadd.f32 %v1269_v39, %v649_v40 }
  0xa5   : > { %1205 = vmatmul.msk.f32.vlgmr.msra.gmra.mxu3 %vm656_vm1, %v576_v29  ;;  %724 = vrot.lane.b32.xlu1 %v610_v28, %s1339_s25  ;;  %v1252_v43 = vpack.i.bf16 %v647_v41, %v650_v42 }
  0xa6   : > { %722 = vrot.lane.b32.xlu2 %v576_v29, %s1339_s25  ;;  %714 = vmatpush.msrb.mxu0 %v650_v42 }
  0xa8   : > { %715 = vmatpush.msrb.mxu0 %v647_v41 }
  0xad   : > { %942 = vrot.lane.b32.xlu1 %v610_v28, %s1338_s24 }
  0xae   : > { %940 = vrot.lane.b32.xlu2 %v576_v29, %s1338_s24 }
  0xb5   : > { %845 = vrot.lane.b32.xlu1 %v610_v28, %s1340_s21  ;;  %v653_v28 = vld [vmem:[#allocation2 + $0x8] sm:$0xff] }
  0xb6   : > { %843 = vrot.lane.b32.xlu2 %v576_v29, %s1340_s21  ;;  %815 = vmatpush.msrb.mxu1 %v653_v28  ;;  %v655_v29 = vld [vmem:[#allocation2 + $0x18] sm:$0xff] }
  0xf7   : > { %v945_v30 = vpop.permute.xlu2 %944 }
  0xf8   : > { %1218 = vmatpush.xpose.msk.msra.mxu2 %vm656_vm1, %v945_v30  ;;  %v654_v30 = vld [vmem:[#allocation2 + $0x10] sm:$0xff] }
  0xf9   : > { %934 = vmatpush.msra.mxu1 %v654_v30 }
 0x100   : > { %v723_v33 = vpop.permute.xlu2 %722 }
 0x108   : > { %v941_v58 = vpop.permute.xlu2 %940 }
 0x10f   : > { %v727_v31 = vpop.permute.xlu1 %726 }
 0x110   : > { %1207 = vmatpush.xpose.msk.msrb.mxu3 %vm656_vm1, %v727_v31  ;;  %v844_v62 = vpop.permute.xlu2 %843 }
 0x117   : > { %v725_v32 = vpop.permute.xlu1 %724 }
 0x118   : > { %1208 = vmatpush.xpose.msk.msrb.mxu3 %vm656_vm1, %v725_v32 }
 0x11b   : > { %1209 = vmatmul.msk.f32.vlgmr.msrb.gmra.mxu3 %vm656_vm1, %v723_v33 }
 0x11f   : > { %v943_v34 = vpop.permute.xlu1 %942 }
 0x120   : > { %1219 = vmatpush.xpose.msk.msra.mxu2 %vm656_vm1, %v943_v34 }
 0x127   : > { %v846_v53 = vpop.permute.xlu1 %845 }
 0x128   : > { %v683_v35 = vpop.f32.mrf.mxu3 }
 0x129   : > { %v686_v36 = vmul.f32 0.35355338, %v683_v35 }
 0x12b   : > { %v688_v37 = vsel %vm687_vm2, %v686_v36, -inf }
 0x12c   : > { %689 = vmax.xlane.f32.xlu0 %v688_v37 }
 0x19e   : > { %v751_v44 = vpop.f32.mrf.mxu3 }
 0x19f   : > { %v754_v45 = vmul.f32 0.35355338, %v751_v44  ;;  %v690_v46 = vpop.xlane.xlu0 %689 }
 0x1a0   : > { %v691_v47 = vsub.f32 %v686_v36, %v690_v46 }
 0x1a1   : > { %v755_v48 = vsel %vm687_vm2, %v754_v45, -inf }
 0x1a2   : > { %v692_v49 = vmul.f32 1.442695, %v691_v47  ;;  %756 = vmax.xlane.f32.xlu1 %v755_v48 }
 0x1a4   : > { %1273 = vpow2.f32 %v692_v49  ;;  %v1270_v49 = vld [vmem:[%s1571_s11] ss:$0 sm:$0xff] }
 0x1aa   : > { %v1274_v50 = vpop.eup %1273 }
 0x1ab   : > { %1206 = vmatmul.msk.f32.vlgmr.msrb.gmra.mxu0 %vm687_vm2, %v1274_v50  ;;  %v694_v51 = vsel %vm687_vm2, %v1274_v50, 0.0 }
 0x1ac   : > { %695 = vadd.xlane.f32.xlu0 %v694_v51 }
 0x1bb   : > { %1258 = vrot.lane.b32.xlu1 %v1252_v43, %s1338_s24 }
 0x1c0   : > { %847 = vrot.lane.b32.xlu0 %v613_v23, %s1340_s21 }
 0x215   : > { %v757_v57 = vpop.xlane.xlu1 %756 }
 0x216   : > { %v758_v7 = vsub.f32 %v754_v45, %v757_v57 }
 0x218   : > { %v759_v8 = vmul.f32 1.442695, %v758_v7 }
 0x21f   : > { %v696_v52 = vpop.xlane.xlu0 %695 }
 0x220   : > { %1275 = vrcp.f32 %v696_v52 }
 0x221   : > { %1277 = vpow2.f32 %v759_v8 }
 0x226   : > { %v1276_v54 = vpop.eup %1275 }
 0x227   : > { %v1278_v9 = vpop.eup %1277 }
 0x228   : > { %v717_v55 = vpop.f32.mrf.mxu0  ;;  %v761_v11 = vsel %vm687_vm2, %v1278_v9, 0.0 }
 0x229   : > { %v721_v56 = vmul.f32 %v1276_v54, %v717_v55 }
 0x22b   : > { %1212 = vmatmul.msk.f32.vlgmr.msrb.gmra.mxu2 %vm656_vm1, %v721_v56 }
 0x22d   : > { %v1259_v60 = vpop.permute.xlu1 %1258 }
 0x22e   : > { %v1260_v61 = vunpack.i.l.bf16 %v1259_v60  ;;  %v1261_v63 = vunpack.i.h.bf16 %v1259_v60 }
 0x232   : > { %v848_v59 = vpop.permute.xlu0 %847 }
 0x233   : > { %1213 = vmatpush.xpose.msk.msra.mxu3 %vm656_vm1, %v848_v59  ;;  %1220 = vmatmul.msk.f32.vlgmr.msra.gmra.mxu2 %vm656_vm1, %v941_v58 }
 0x237   : > { %1214 = vmatpush.xpose.msk.msra.mxu3 %vm656_vm1, %v846_v53  ;;  %v1341_v53 = vmov 32.0  }
 0x23a   : > { %1215 = vmatmul.msk.f32.vlgmr.msra.gmra.mxu3 %vm656_vm1, %v844_v62 }
 0x23b   : > { %1005 = vmatpush.msrb.mxu3 %v1260_v61 }
 0x23d   : > { %1006 = vmatpush.msrb.mxu3 %v1261_v63 }
 0x2ae   : > { %v1524_v0 = vpop.f32.mrf.mxu2 }
 0x2b6   : > { %v969_v1 = vpop.f32.mrf.mxu2 }
 0x2b7   : > { %v972_v2 = vmul.f32 0.35355338, %v969_v1 }
 0x2b9   : > { %v973_v3 = vsel %vm687_vm2, %v972_v2, -inf }
 0x2ba   : > { %974 = vmax.xlane.f32.xlu2 %v973_v3 }
 0x2bd   : > { %v872_v4 = vpop.f32.mrf.mxu3 }
 0x2be   : > { %v875_v5 = vmul.f32 0.35355338, %v872_v4 }
 0x2c0   : > { %v876_v6 = vsel %vm687_vm2, %v875_v5, -inf }
 0x2c1   : > { %877 = vmax.xlane.f32.xlu0 %v876_v6 }
 0x2d2   : > { %1253 = vrot.lane.b32.xlu2 %v1252_v43, %s1339_s25  ;;  %s536_s25 = scalar_lea.vmem %s1574_s14, %s1428_s23 }
 0x2d5   : > { %1263 = vrot.lane.b32.xlu0 %v1252_v43, %s1340_s21 }
 0x2fb   : > { %762 = vadd.xlane.f32.xlu2 %v761_v11 }
 0x32d   : > { %v975_v12 = vpop.xlane.xlu2 %974 }
 0x32e   : > { %v976_v13 = vsub.f32 %v972_v2, %v975_v12  ;;  %v1272_v12 = vld [vmem:[%s1573_s13] ss:$0 sm:$0xff] }
 0x330   : > { %v977_v14 = vmul.f32 1.442695, %v976_v13 }
 0x332   : > { %1279 = vpow2.f32 %v977_v14 }
 0x334   : > { %v878_v15 = vpop.xlane.xlu0 %877 }
 0x335   : > { %v879_v16 = vsub.f32 %v875_v5, %v878_v15  ;;  %v1254_v17 = vpop.permute.xlu2 %1253 }
 0x336   : > { %v1255_v18 = vunpack.i.l.bf16 %v1254_v17  ;;  %v1256_v21 = vunpack.i.h.bf16 %v1254_v17 }
 0x337   : > { %v880_v19 = vmul.f32 1.442695, %v879_v16 }
 0x338   : > { %v1280_v20 = vpop.eup %1279  ;;  %789 = vmatpush.msra.mxu0 %v1255_v18 }
 0x339   : > { %1281 = vpow2.f32 %v880_v19  ;;  %1221 = vmatmul.msk.f32.vlgmr.msrb.gmra.mxu3 %vm687_vm2, %v1280_v20  ;;  %v979_v22 = vsel %vm687_vm2, %v1280_v20, 0.0 }
 0x33a   : > { %980 = vadd.xlane.f32.xlu1 %v979_v22  ;;  %790 = vmatpush.msra.mxu0 %v1256_v21 }
 0x33b   : > { %1210 = vmatmul.msk.f32.vlgmr.msra.gmra.mxu0 %vm687_vm2, %v1278_v9  ;;  %v1271_v9 = vld [vmem:[%s1572_s12] ss:$0 sm:$0xff] }
 0x33f   : > { %v1282_v23 = vpop.eup %1281 }
 0x340   : > { %v882_v24 = vsel %vm687_vm2, %v1282_v23, 0.0 }
 0x341   : > { %883 = vadd.xlane.f32.xlu0 %v882_v24 }
 0x347   : > { %v1264_v25 = vpop.permute.xlu0 %1263 }
 0x348   : > { %v1265_v26 = vunpack.i.l.bf16 %v1264_v25  ;;  %v1266_v27 = vunpack.i.h.bf16 %v1264_v25 }
 0x34a   : > { %908 = vmatpush.msrb.mxu0 %v1265_v26 }
 0x34c   : > { %909 = vmatpush.msrb.mxu0 %v1266_v27 }
 0x34d   : > { %1216 = vmatmul.msk.f32.vlgmr.msrb.gmra.mxu0 %vm687_vm2, %v1282_v23 }
 0x34e   : > { %1031 = vmatpush.msra.mxu0 %v655_v29 }
 0x36e   : > { %v763_v31 = vpop.xlane.xlu2 %762 }
 0x36f   : > { %1283 = vrcp.f32 %v763_v31 }
 0x375   : > { %v1284_v33 = vpop.eup %1283 }
 0x3ad   : > { %v981_v32 = vpop.xlane.xlu1 %980 }
 0x3ae   : > { %1285 = vrcp.f32 %v981_v32 }
 0x3b4   : > { %v1286_v36 = vpop.eup %1285  ;;  %v884_v39 = vpop.xlane.xlu0 %883 }
 0x3b5   : > { %1287 = vrcp.f32 %v884_v39 }
 0x3b6   : > { %1289 = vrcp.f32 %v1341_v53 }
 0x3b8   : > { %v792_v34 = vpop.f32.mrf.mxu0 }
 0x3b9   : > { %v796_v35 = vmul.f32 %v1284_v33, %v792_v34 }
 0x3bb   : > { %1211 = vmatmul.msk.f32.vlgmr.msrb.gmra.mxu1 %vm656_vm1, %v796_v35  ;;  %v1288_v40 = vpop.eup %1287 }
 0x3bc   : > { %v1008_v37 = vpop.f32.mrf.mxu3  ;;  %v1290_v54 = vpop.eup %1289 }
 0x3bd   : > { %v1012_v38 = vmul.f32 %v1286_v36, %v1008_v37  ;;  %v1049_v55 = vmul.f32 32.0, %v1290_v54  ;;  %vm1053_vm3 = vweird.f32 %v1290_v54 }
 0x3bf   : > { %1222 = vmatmul.msk.f32.vlgmr.msra.gmra.mxu0 %vm656_vm1, %v1012_v38  ;;  %v1050_v56 = vsub.f32 1.0, %v1049_v55 }
 0x3c1   : > { %v1051_v57 = vmul.f32 %v1290_v54, %v1050_v56 }
 0x3c3   : > { %v1052_v58 = vadd.f32 %v1290_v54, %v1051_v57 }
 0x3c5   : > { %v1054_v59 = vsel %vm1053_vm3, %v1290_v54, %v1052_v58 }
 0x3ca   : > { %v911_v41 = vpop.f32.mrf.mxu0 }
 0x3cb   : > { %v915_v42 = vmul.f32 %v1288_v40, %v911_v41 }
 0x3cd   : > { %1217 = vmatmul.msk.f32.vlgmr.msra.gmra.mxu1 %vm656_vm1, %v915_v42 }
 0x438   : > { %v817_v43 = vpop.f32.mrf.mxu1 }
 0x439   : > { %v841_v44 = vadd.f32 %v1524_v0, %v817_v43 }
 0x43c   : > { %v1033_v47 = vpop.f32.mrf.mxu0 }
 0x44a   : > { %v936_v45 = vpop.f32.mrf.mxu1 }
 0x44b   : > { %v939_v46 = vadd.f32 %v936_v45, %v841_v44 }
 0x44d   : > { %v1036_v48 = vadd.f32 %v1033_v47, %v939_v46 }
 0x44f   : > { %v1037_v50 = vadd.f32 %v1036_v48, %v1465_v10 }
 0x451   : > { %v1042_v51 = vadd.f32 %v1270_v49, %v1037_v50 }
 0x453   : > { %v1045_v52 = vsel %vm554_vm0, %v1042_v51, 0.0 }
 0x454   : > { %1046 = vadd.xlane.f32.xlu2 %v1045_v52 }
 0x4c7   : > { %v1047_v60 = vpop.xlane.xlu2 %1046 }
 0x4c8   : > { %v1055_v61 = vmul.f32 %v1054_v59, %v1047_v60 }
 0x4ca   : > { %v1056_v62 = vsub.f32 %v1042_v51, %v1055_v61 }
 0x4cc   : > { %v1057_v63 = vmul.f32 %v1056_v62, %v1056_v62 }
 0x4ce   : > { %v1058_v0 = vsel %vm554_vm0, %v1057_v63, 0.0 }
 0x4cf   : > { %1059 = vadd.xlane.f32.xlu0 %v1058_v0 }
 0x542   : > { %v1060_v10 = vpop.xlane.xlu0 %1059 }
 0x543   : > { %v1061_v1 = vmul.f32 %v1060_v10, %v1054_v59 }
 0x545   : > { %v1062_v2 = vadd.f32 1e-05, %v1061_v1 }
 0x547   : > { %1291 = vrsqrt.f32 %v1062_v2  ;;  %vm1069_vm5 = vweird.f32 %v1062_v2 }
 0x54d   : > { %v1292_v3 = vpop.eup %1291 }
 0x54e   : > { %v1064_v4 = vmul.f32 %v1292_v3, %v1062_v2  ;;  %vm1070_vm4 = vweird.f32 %v1292_v3 }
 0x54f   : > { %vm1071_vm6 = vmor %vm1069_vm5, %vm1070_vm4 }
 0x550   : > { %v1065_v5 = vmul.f32 %v1292_v3, %v1064_v4 }
 0x552   : > { %v1066_v6 = vmul.f32 0.5, %v1065_v5 }
 0x554   : > { %v1067_v7 = vsub.f32 1.5, %v1066_v6 }
 0x556   : > { %v1068_v8 = vmul.f32 %v1292_v3, %v1067_v7 }
 0x558   : > { %v1072_v11 = vsel %vm1071_vm6, %v1292_v3, %v1068_v8 }
 0x559   : > { %v1073_v13 = vmul.f32 %v1072_v11, %v1056_v62 }
 0x55b   : > { %v1077_v14 = vmul.f32 %v1271_v9, %v1073_v13 }
 0x55d   : > { %v1081_v15 = vadd.f32 %v1272_v12, %v1077_v14 }
 0x55f   : > { %1082 = vst.msk [vmem:[%s536_s25] sm:$0xff] %vm554_vm0, %v1081_v15 }
 0x560 PF: > { %s25_s29 = sadd.s32 1, %s1333_s29  }
 0x561   : > { %p22_p7 = scmp.ge.s32.totalorder %s25_s29, 4  }
 0x563   :  { %24 = sbr.rel (!%p22_p7) target bundleno = 1 (0x1), region = 120 }
 0x568   :  { %1102 = vsyncpa [#allocation3], 1 }
 0x569   :  { %1104 = vsyncpa [#allocation3 + $0x1], 1 }

// kernel: transformer_decoder.9
= control target key start
LH: loop header
LB: loop body
LE: loop exit
PB: predicated region body
PF: predicated region fallthrough
CT: control target
= control target key end

     0   :  { %s1264_s29 = smov 0   ;;  %s1406_s0 = inlined_call_operand.vmem [shape: f32[2,8,32], index: 0, kind: input, shape index: {}, may-alias: {0,2}]   ;;  %s1407_s1 = inlined_call_operand.vmem [shape: f32[2,8,32], index: 1, kind: input, shape index: {}, may-alias: {1,3}]   ;;  %s1408_s2 = inlined_call_operand.vmem [shape: f32[2,8,32], index: 2, kind: input, shape index: {}, may-alias: {0,2}]   ;;  %s1409_s3 = inlined_call_operand.vmem [shape: f32[2,8,32], index: 3, kind: input, shape index: {}, may-alias: {1,3}]   ;;  %s1410_s4 = inlined_call_operand.vmem [shape: f32[32,32], index: 4, kind: input, shape index: {}]   ;;  %s1411_s5 = inlined_call_operand.vmem [shape: f32[1,32], index: 5, kind: input, shape index: {}]   ;;  %s1412_s6 = inlined_call_operand.vmem [shape: f32[32,32], index: 6, kind: input, shape index: {}]   ;;  %s1413_s7 = inlined_call_operand.vmem [shape: f32[1,32], index: 7, kind: input, shape index: {}]   ;;  %s1414_s8 = inlined_call_operand.vmem [shape: f32[32,32], index: 8, kind: input, shape index: {}]   ;;  %s1415_s9 = inlined_call_operand.vmem [shape: f32[1,32], index: 9, kind: input, shape index: {}]   ;;  %s1416_s10 = inlined_call_operand.vmem [shape: f32[32,32], index: 10, kind: input, shape index: {}]   ;;  %s1417_s11 = inlined_call_operand.vmem [shape: f32[1,32], index: 11, kind: input, shape index: {}]   ;;  %s1418_s12 = inlined_call_operand.vmem [shape: f32[1,32], index: 12, kind: input, shape index: {}]   ;;  %s1419_s13 = inlined_call_operand.vmem [shape: f32[1,32], index: 13, kind: input, shape index: {}]   ;;  %s1420_s14 = inlined_call_operand.vmem [shape: f32[2,8,32], index: 14, kind: output, shape index: {}]  }
   0x1 LB: > { %s1108_s30 = sadd.s32 4294967295, %s1183_s29   ;;  %p1112_p0 = scmp.ge.s32.totalorder %s1183_s29, 1  ;;  %s1183_s29 = sphi %s1264_s29, %s24_s29  }
   0x2   : > { %p438_p1 = scmp.lt.s32.totalorder %s1183_s29, 3 }
   0x4   : > { %p439_p2 = pnand %p1112_p0, %p438_p1 }
   0x5   : > { %p494_p3 = scmp.lt.s32.totalorder (!%p439_p2), %s1108_s30, 1  ;;  %s1186_s21 = smov (!%p439_p2), 120  }
   0x6   : > { %442 = sbr.rel (%p439_p2) target bundleno = 1348 (0x544), region = 76  ;;  %s1187_s22 = smov (!%p439_p2), 104  }
   0xb   : > { %v555_v0 = vld [vmem:[%s1412_s6 + $0x18] sm:$0xff]  ;;  %v554_v1 = vld [vmem:[%s1412_s6 + $0x10] sm:$0xff]  ;;  %v553_v4 = vld [vmem:[%s1412_s6 + $0x8] sm:$0xff]  ;;  %s1422_s30 = smov (!%p494_p3, %s1108_s30), 1  ;;  %vm528_vm0 = vcmask 261120   ;;  %vm618_vm1 = vcmask 64512  }
   0xc   : > { %v523_v2 = vld [vmem:[%s1410_s4 + $0x18] sm:$0xff]  ;;  %575 = vmatpush.msra.mxu1 %v555_v0  ;;  %v522_v3 = vld [vmem:[%s1410_s4 + $0x10] sm:$0xff]  ;;  %v521_v5 = vld [vmem:[%s1410_s4 + $0x8] sm:$0xff]  ;;  %s1293_s15 = sshll.u32 %s1422_s30, 3 }
   0xd   : > { %544 = vmatpush.msra.mxu0 %v523_v2  ;;  %v552_v6 = vld [vmem:[%s1412_s6] sm:$0xff]  ;;  %s505_s20 = scalar_lea.vmem %s1408_s2, %s1293_s15  ;;  %s509_s23 = scalar_lea.vmem %s1409_s3, %s1293_s15  ;;  %v586_v20 = vld [vmem:[%s1414_s8 + $0x18] sm:$0xff]  ;;  %v585_v21 = vld [vmem:[%s1414_s8 + $0x10] sm:$0xff] }
   0xe   : > { %576 = vmatpush.msra.mxu1 %v554_v1  ;;  %v520_v7 = vld [vmem:[%s1410_s4] sm:$0xff]  ;;  %s497_s25 = scalar_lea.vmem %s1406_s0, %s1293_s15  ;;  %s501_s28 = scalar_lea.vmem %s1407_s1, %s1293_s15  ;;  %606 = vmatpush.msra.mxu2 %v586_v20  ;;  %v584_v22 = vld [vmem:[%s1414_s8 + $0x8] sm:$0xff] }
   0xf   : > { %545 = vmatpush.msra.mxu0 %v522_v3  ;;  %v517_v8 = vld [vmem:[%s505_s20] sm:$0xff]  ;;  %s1185_s20 = smov 112   ;;  %v615_v56 = vld [vmem:[%s1416_s10 + $0x8] sm:$0xff] }
  0x10   : > { %577 = vmatpush.msra.mxu1 %v553_v4  ;;  %v518_v9 = vld [vmem:[%s509_s23] sm:$0xff]  ;;  %607 = vmatpush.msra.mxu2 %v585_v21 }
  0x11   : > { %546 = vmatpush.msra.mxu0 %v521_v5  ;;  %v519_v10 = vadd.f32 %v518_v9, %v517_v8  ;;  %v1314_v11 = vld [vmem:[%s497_s25] sm:$0xff] }
  0x12   : > { %578 = vmatpush.msra.mxu1 %v552_v6  ;;  %v515_v12 = vld [vmem:[%s501_s28] sm:$0xff]  ;;  %608 = vmatpush.msra.mxu2 %v584_v22 }
  0x13   : > { %547 = vmatpush.msra.mxu0 %v520_v7  ;;  %1119 = vmatmul.msk.f32.vlgmr.msra.gmra.mxu1 %vm528_vm0, %v519_v10  ;;  %v516_v13 = vadd.f32 %v515_v12, %v1314_v11  ;;  %v1151_v14 = vld [vmem:[%s1413_s7] ss:$0 sm:$0xff] }
  0x14   : > { %v1152_v15 = vld [vmem:[%s1411_s5] ss:$0 sm:$0xff] }
  0x15   : > { %1118 = vmatmul.msk.f32.vlgmr.msra.gmra.mxu0 %vm528_vm0, %v516_v13  ;;  %v583_v23 = vld [vmem:[%s1414_s8] sm:$0xff] }
  0x16   : > { %609 = vmatpush.msra.mxu2 %v583_v23  ;;  %v1153_v30 = vld [vmem:[%s1415_s9] ss:$0 sm:$0xff] }
  0x17   : > { %1120 = vmatmul.msk.f32.vlgmr.msra.gmra.mxu2 %vm528_vm0, %v517_v8  ;;  %v614_v33 = vld [vmem:[%s1416_s10] sm:$0xff] }
  0x18   : > { %765 = vmatpush.msrb.mxu2 %v615_v56  ;;  %v1155_v56 = vld [vmem:[%s1418_s12] ss:$0 sm:$0xff] }
  0x90   : > { %v580_v16 = vpop.f32.mrf.mxu1 }
  0x91   : > { %v581_v17 = vadd.f32 %v1151_v14, %v580_v16  ;;  %v616_v16 = vld [vmem:[%s1416_s10 + $0x10] sm:$0xff] }
  0x92   : > { %v549_v18 = vpop.f32.mrf.mxu0  ;;  %877 = vmatpush.msra.mxu2 %v616_v16 }
  0x93   : > { %795 = vrot.lane.b32.xlu2 %v581_v17, %s1185_s20  ;;  %682 = vrot.lane.b32.xlu1 %v581_v17, %s1186_s21  ;;  %v550_v19 = vadd.f32 %v1152_v15, %v549_v18 }
  0x94   : > { %1121 = vmatpush.xpose.msk.msra.mxu3 %vm618_vm1, %v581_v17 }
  0x97   : > { %1122 = vmatmul.msk.f32.vlgmr.msra.gmra.mxu3 %vm618_vm1, %v550_v19 }
  0x9a   : > { %v611_v31 = vpop.f32.mrf.mxu2 }
  0x9b   : > { %885 = vrot.lane.b32.xlu2 %v581_v17, %s1187_s22  ;;  %680 = vrot.lane.b32.xlu1 %v550_v19, %s1186_s21  ;;  %v612_v32 = vadd.f32 %v1153_v30, %v611_v31  ;;  %v617_v17 = vld [vmem:[%s1416_s10 + $0x18] sm:$0xff] }
  0x9d   : > { %673 = vmatpush.msrb.mxu3 %v612_v32 }
  0x9f   : > { %788 = vmatpush.msra.mxu3 %v614_v33 }
  0xa3   : > { %883 = vrot.lane.b32.xlu1 %v550_v19, %s1187_s22 }
  0xed   : > { %v796_v25 = vpop.permute.xlu2 %795 }
  0xf5   : > { %v886_v41 = vpop.permute.xlu2 %885 }
 0x105   : > { %v683_v24 = vpop.permute.xlu1 %682 }
 0x106   : > { %1124 = vmatpush.xpose.msk.msrb.mxu0 %vm618_vm1, %v683_v24 }
 0x10a   : > { %1129 = vmatpush.xpose.msk.msra.mxu0 %vm618_vm1, %v796_v25 }
 0x10d   : > { %v681_v26 = vpop.permute.xlu1 %680 }
 0x10e   : > { %1125 = vmatmul.msk.f32.vlgmr.msrb.gmra.mxu0 %vm618_vm1, %v681_v26 }
 0x115   : > { %v884_v53 = vpop.permute.xlu1 %883 }
 0x11a   : > { %v642_v27 = vpop.f32.mrf.mxu3 }
 0x11b   : > { %v645_v28 = vmul.f32 0.35355338, %v642_v27 }
 0x11d   : > { %v646_v29 = vsel %vm618_vm1, %v645_v28, -inf }
 0x11e   : > { %647 = vmax.xlane.f32.xlu0 %v646_v29 }
 0x18b   : > { %v705_v34 = vpop.f32.mrf.mxu0 }
 0x18c   : > { %v708_v35 = vmul.f32 0.35355338, %v705_v34 }
 0x18e   : > { %v709_v36 = vsel %vm618_vm1, %v708_v35, -inf }
 0x18f   : > { %710 = vmax.xlane.f32.xlu2 %v709_v36  ;;  %v1188_v36 = vmov 32.0  }
 0x191   : > { %v648_v37 = vpop.xlane.xlu0 %647 }
 0x192   : > { %v649_v38 = vsub.f32 %v645_v28, %v648_v37 }
 0x194   : > { %v650_v39 = vmul.f32 1.442695, %v649_v38 }
 0x196   : > { %1157 = vpow2.f32 %v650_v39 }
 0x19c   : > { %v1158_v40 = vpop.eup %1157 }
 0x19d   : > { %1123 = vmatmul.msk.f32.vlgmr.msrb.gmra.mxu3 %vm618_vm1, %v1158_v40  ;;  %v652_v42 = vsel %vm618_vm1, %v1158_v40, 0.0 }
 0x19e   : > { %1133 = vmatpush.xpose.msk.msrb.mxu3 %vm618_vm1, %v886_v41  ;;  %653 = vadd.xlane.f32.xlu0 %v652_v42 }
 0x1a7   : > { %831 = vrot.lane.b32.xlu2 %v612_v32, %s1185_s20 }
 0x1b2   : > { %793 = vrot.lane.b32.xlu0 %v550_v19, %s1185_s20  ;;  %s513_s20 = scalar_lea.vmem %s1420_s14, %s1293_s15 }
 0x1ba   : > { %719 = vrot.lane.b32.xlu0 %v612_v32, %s1186_s21 }
 0x202   : > { %v711_v43 = vpop.xlane.xlu2 %710 }
 0x203   : > { %v712_v44 = vsub.f32 %v708_v35, %v711_v43 }
 0x205   : > { %v713_v45 = vmul.f32 1.442695, %v712_v44 }
 0x207   : > { %1159 = vpow2.f32 %v713_v45 }
 0x20a   : > { %v832_v55 = vpop.permute.xlu2 %831 }
 0x20d   : > { %v1160_v46 = vpop.eup %1159 }
 0x20e   : > { %v715_v47 = vsel %vm618_vm1, %v1160_v46, 0.0 }
 0x20f   : > { %716 = vadd.xlane.f32.xlu2 %v715_v47 }
 0x211   : > { %v654_v48 = vpop.xlane.xlu0 %653 }
 0x212   : > { %1161 = vrcp.f32 %v654_v48 }
 0x218   : > { %v1162_v49 = vpop.eup %1161 }
 0x220   : > { %v675_v50 = vpop.f32.mrf.mxu3 }
 0x221   : > { %v679_v51 = vmul.f32 %v1162_v49, %v675_v50 }
 0x223   : > { %1128 = vmatmul.msk.f32.vlgmr.msra.gmra.mxu3 %vm618_vm1, %v679_v51 }
 0x224   : > { %v794_v52 = vpop.permute.xlu0 %793 }
 0x225   : > { %1130 = vmatmul.msk.f32.vlgmr.msra.gmra.mxu0 %vm618_vm1, %v794_v52 }
 0x22b   : > { %1134 = vmatmul.msk.f32.vlgmr.msrb.gmra.mxu3 %vm618_vm1, %v884_v53 }
 0x22c   : > { %v720_v54 = vpop.permute.xlu0 %719 }
 0x22d   : > { %740 = vmatpush.msrb.mxu1 %v720_v54 }
 0x22e   : > { %1126 = vmatmul.msk.f32.vlgmr.msrb.gmra.mxu1 %vm618_vm1, %v1160_v46 }
 0x22f   : > { %852 = vmatpush.msra.mxu1 %v832_v55 }
 0x231   : > { %967 = vmatpush.msrb.mxu1 %v617_v17 }
 0x282   : > { %v717_v57 = vpop.xlane.xlu2 %716 }
 0x283   : > { %1163 = vrcp.f32 %v717_v57 }
 0x289   : > { %v1164_v62 = vpop.eup %1163 }
 0x2a2   : > { %v818_v58 = vpop.f32.mrf.mxu0 }
 0x2a3   : > { %v821_v59 = vmul.f32 0.35355338, %v818_v58  ;;  %v1156_v58 = vld [vmem:[%s1419_s13] ss:$0 sm:$0xff] }
 0x2a5   : > { %v822_v60 = vsel %vm618_vm1, %v821_v59, -inf }
 0x2a6   : > { %v790_v61 = vpop.f32.mrf.mxu3  ;;  %823 = vmax.xlane.f32.xlu1 %v822_v60 }
 0x2ab   : > { %v742_v63 = vpop.f32.mrf.mxu1 }
 0x2ac   : > { %v746_v0 = vmul.f32 %v1164_v62, %v742_v63 }
 0x2ae   : > { %1127 = vmatmul.msk.f32.vlgmr.msrb.gmra.mxu2 %vm618_vm1, %v746_v0  ;;  %v908_v1 = vpop.f32.mrf.mxu3 }
 0x2af   : > { %v911_v2 = vmul.f32 0.35355338, %v908_v1 }
 0x2b1   : > { %v912_v3 = vsel %vm618_vm1, %v911_v2, -inf }
 0x2b2   : > { %913 = vmax.xlane.f32.xlu0 %v912_v3 }
 0x2bf   : > { %921 = vrot.lane.b32.xlu1 %v612_v32, %s1187_s22  ;;  %v1154_v32 = vld [vmem:[%s1417_s11] ss:$0 sm:$0xff] }
 0x319   : > { %v824_v4 = vpop.xlane.xlu1 %823 }
 0x31a   : > { %v825_v5 = vsub.f32 %v821_v59, %v824_v4 }
 0x31c   : > { %v826_v6 = vmul.f32 1.442695, %v825_v5 }
 0x31e   : > { %1165 = vpow2.f32 %v826_v6 }
 0x324   : > { %v1166_v7 = vpop.eup %1165 }
 0x325   : > { %1131 = vmatmul.msk.f32.vlgmr.msra.gmra.mxu1 %vm618_vm1, %v1166_v7  ;;  %v914_v8 = vpop.xlane.xlu0 %913  ;;  %v828_v9 = vsel %vm618_vm1, %v1166_v7, 0.0 }
 0x326   : > { %v915_v10 = vsub.f32 %v911_v2, %v914_v8  ;;  %829 = vadd.xlane.f32.xlu0 %v828_v9 }
 0x328   : > { %v916_v12 = vmul.f32 1.442695, %v915_v10 }
 0x32a   : > { %1167 = vpow2.f32 %v916_v12 }
 0x330   : > { %v1168_v13 = vpop.eup %1167 }
 0x331   : > { %v922_v14 = vpop.permute.xlu1 %921  ;;  %v918_v15 = vsel %vm618_vm1, %v1168_v13, 0.0  ;;  %v767_v26 = vpop.f32.mrf.mxu2 }
 0x332   : > { %942 = vmatpush.msrb.mxu0 %v922_v14  ;;  %919 = vadd.xlane.f32.xlu1 %v918_v15  ;;  %v791_v28 = vadd.f32 %v790_v61, %v767_v26 }
 0x333   : > { %1135 = vmatmul.msk.f32.vlgmr.msrb.gmra.mxu0 %vm618_vm1, %v1168_v13 }
 0x399   : > { %v830_v18 = vpop.xlane.xlu0 %829 }
 0x39a   : > { %1169 = vrcp.f32 %v830_v18 }
 0x3a0   : > { %v1170_v19 = vpop.eup %1169 }
 0x3a2   : > { %v854_v20 = vpop.f32.mrf.mxu1 }
 0x3a3   : > { %v858_v21 = vmul.f32 %v1170_v19, %v854_v20 }
 0x3a5   : > { %1132 = vmatmul.msk.f32.vlgmr.msra.gmra.mxu2 %vm618_vm1, %v858_v21  ;;  %v920_v22 = vpop.xlane.xlu1 %919 }
 0x3a6   : > { %1171 = vrcp.f32 %v920_v22 }
 0x3a7   : > { %1173 = vrcp.f32 %v1188_v36 }
 0x3ac   : > { %v1172_v23 = vpop.eup %1171 }
 0x3ad   : > { %v1174_v37 = vpop.eup %1173 }
 0x3ae   : > { %v985_v38 = vmul.f32 32.0, %v1174_v37  ;;  %vm989_vm2 = vweird.f32 %v1174_v37 }
 0x3b0   : > { %v944_v24 = vpop.f32.mrf.mxu0  ;;  %v986_v39 = vsub.f32 1.0, %v985_v38 }
 0x3b1   : > { %v948_v25 = vmul.f32 %v1172_v23, %v944_v24 }
 0x3b2   : > { %v987_v40 = vmul.f32 %v1174_v37, %v986_v39 }
 0x3b3   : > { %1136 = vmatmul.msk.f32.vlgmr.msrb.gmra.mxu1 %vm618_vm1, %v948_v25 }
 0x3b4   : > { %v988_v41 = vadd.f32 %v1174_v37, %v987_v40 }
 0x3b6   : > { %v990_v42 = vsel %vm989_vm2, %v1174_v37, %v988_v41 }
 0x428   : > { %v879_v27 = vpop.f32.mrf.mxu2 }
 0x429   : > { %v882_v29 = vadd.f32 %v879_v27, %v791_v28 }
 0x430   : > { %v969_v30 = vpop.f32.mrf.mxu1 }
 0x431   : > { %v972_v31 = vadd.f32 %v969_v30, %v882_v29 }
 0x433   : > { %v973_v33 = vadd.f32 %v972_v31, %v1314_v11 }
 0x435   : > { %v978_v34 = vadd.f32 %v1154_v32, %v973_v33 }
 0x437   : > { %v981_v35 = vsel %vm528_vm0, %v978_v34, 0.0 }
 0x438   : > { %982 = vadd.xlane.f32.xlu0 %v981_v35 }
 0x4ab   : > { %v983_v43 = vpop.xlane.xlu0 %982 }
 0x4ac   : > { %v991_v44 = vmul.f32 %v990_v42, %v983_v43 }
 0x4ae   : > { %v992_v45 = vsub.f32 %v978_v34, %v991_v44 }
 0x4b0   : > { %v993_v46 = vmul.f32 %v992_v45, %v992_v45 }
 0x4b2   : > { %v994_v47 = vsel %vm528_vm0, %v993_v46, 0.0 }
 0x4b3   : > { %995 = vadd.xlane.f32.xlu0 %v994_v47 }
 0x526   : > { %v996_v11 = vpop.xlane.xlu0 %995 }
 0x527   : > { %v997_v48 = vmul.f32 %v996_v11, %v990_v42 }
 0x529   : > { %v998_v49 = vadd.f32 1e-05, %v997_v48 }
 0x52b   : > { %1175 = vrsqrt.f32 %v998_v49  ;;  %vm1005_vm4 = vweird.f32 %v998_v49 }
 0x531   : > { %v1176_v50 = vpop.eup %1175 }
 0x532   : > { %v1000_v51 = vmul.f32 %v1176_v50, %v998_v49  ;;  %vm1006_vm3 = vweird.f32 %v1176_v50 }
 0x533   : > { %vm1007_vm5 = vmor %vm1005_vm4, %vm1006_vm3 }
 0x534   : > { %v1001_v52 = vmul.f32 %v1176_v50, %v1000_v51 }
 0x536   : > { %v1002_v53 = vmul.f32 0.5, %v1001_v52 }
 0x538   : > { %v1003_v54 = vsub.f32 1.5, %v1002_v53 }
 0x53a   : > { %v1004_v55 = vmul.f32 %v1176_v50, %v1003_v54 }
 0x53c   : > { %v1008_v57 = vsel %vm1007_vm5, %v1176_v50, %v1004_v55 }
 0x53d   : > { %v1009_v59 = vmul.f32 %v1008_v57, %v992_v45 }
 0x53f   : > { %v1013_v60 = vmul.f32 %v1155_v56, %v1009_v59 }
 0x541   : > { %v1017_v61 = vadd.f32 %v1156_v58, %v1013_v60 }
 0x543   : > { %1018 = vst.msk [vmem:[%s513_s20] sm:$0xff] %vm528_vm0, %v1017_v61 }
 0x544 PF: > { %s24_s29 = sadd.s32 1, %s1183_s29  }
 0x545   : > { %p21_p4 = scmp.ge.s32.totalorder %s24_s29, 4  }
 0x547   :  { %23 = sbr.rel (!%p21_p4) target bundleno = 1 (0x1), region = 115 }

// kernel: transformer_decoder.11
= control target key start
LH: loop header
LB: loop body
LE: loop exit
PB: predicated region body
PF: predicated region fallthrough
CT: control target
= control target key end

     0   :  { %s957_s0 = inlined_call_operand.vmem [shape: f32[2,8,32], index: 0, kind: input, shape index: {}]   ;;  %s958_s1 = inlined_call_operand.vmem [shape: f32[32,64], index: 1, kind: input, shape index: {}]   ;;  %s959_s2 = inlined_call_operand.vmem [shape: f32[1,64], index: 2, kind: input, shape index: {}]   ;;  %s960_s3 = inlined_call_operand.vmem [shape: f32[64,32], index: 3, kind: input, shape index: {}]   ;;  %s961_s4 = inlined_call_operand.vmem [shape: f32[1,32], index: 4, kind: input, shape index: {}]   ;;  %s962_s5 = inlined_call_operand.vmem [shape: f32[1,32], index: 5, kind: input, shape index: {}]   ;;  %s963_s6 = inlined_call_operand.vmem [shape: f32[1,32], index: 6, kind: input, shape index: {}]   ;;  %s964_s7 = inlined_call_operand.vmem [shape: f32[1,32], index: 7, kind: input, shape index: {}]   ;;  %s965_s8 = inlined_call_operand.vmem [shape: f32[1,32], index: 8, kind: input, shape index: {}]   ;;  %s966_s9 = inlined_call_operand.hbm [shape: f32[2,8,32], index: 9, kind: output, shape index: {0}]   ;;  %s967_s10 = inlined_call_operand.vmem [shape: f32[2,8,32], index: 10, kind: output, shape index: {1}]  }
   0x1   :  { %969 = sst [smem:[#allocation5_spill]] %s957_s0 }
   0x2   :  { %970 = sst [smem:[#allocation6_spill]] %s958_s1 }
   0x3   :  { %971 = sst [smem:[#allocation7_spill]] %s959_s2 }
   0x4   :  { %972 = sst [smem:[#allocation8_spill]] %s960_s3 }
   0x5   :  { %973 = sst [smem:[#allocation9_spill]] %s961_s4 }
   0x6   :  { %16 = vsyncpa [#allocation3], 0 }
   0x7   :  { %18 = vsyncpa [#allocation3 + $0x1], 0  ;;  %s801_s13 = smov 0   ;;  %s803_s14 = smov 0  }
   0x8   :  { %s805_s15 = smov 0   ;;  %s807_s16 = smov 0  }
   0x9 LB: > { %s822_s17 = sadd.s32 4294967295, %s743_s16   ;;  %s616_s18 = sadd.s32 4294967294, %s743_s16   ;;  %s743_s16 = sphi %s807_s16, %s985_s16   ;;  %s739_s15 = sphi %s805_s15, %s984_s15   ;;  %s735_s14 = sphi %s803_s14, %s983_s14   ;;  %s731_s13 = sphi %s801_s13, %s982_s13  }
   0xa   : > { %s826_s19 = sadd.s32 1, %s743_s16   ;;  %s225_s20 = sadd.s32 1, %s739_s15 }
   0xb   : > { %s222_s21 = ssub.s32 %s743_s16, %s826_s19  ;;  %p235_p0 = scmp.ne.s32.totalorder %s739_s15, %s735_s14 }
   0xc   : > { %p223_p1 = scmp.eq.s32.totalorder %s222_s21, 0  ;;  %p236_p2 = scmp.eq.s32.totalorder %s822_s17, 1 }
   0xd   : > { %p241_p3 = scmp.ne.s32.totalorder %s735_s14, %s731_s13  ;;  %p242_p4 = scmp.eq.s32.totalorder %s616_s18, 1 }
   0xe   : > { %s837_s22 = scalar_select %p223_p1, %s739_s15, %s225_s20  }
   0xf   : > { %p839_p5 = por %p236_p2, %p235_p0  ;;  %p843_p6 = por %p242_p4, %p241_p3 }
  0x10   : > { %p619_p7 = scmp.ge.s32.totalorder %s743_s16, 1  ;;  %p317_p8 = scmp.lt.s32.totalorder %s743_s16, 3 }
  0x12   : > { %p318_p9 = pnand %p619_p7, %p317_p8 }
  0x13   : > { %s976_s1 = sld [smem:[#allocation6_spill]] (!%p318_p9)  ;;  %p358_p10 = scmp.lt.s32.totalorder (!%p318_p9), %s822_s17, 1 }
  0x14   : > { %321 = sbr.rel (%p318_p9) target bundleno = 830 (0x33e), region = 56  ;;  %s977_s3 = sld [smem:[#allocation8_spill]] (!%p318_p9) }
  0x15   : > { %s978_s0 = sld [smem:[#allocation5_spill]] (!%p318_p9)  ;;  %s349_s28 = sand.u32 (!%p318_p9), 1, %s735_s14  }
  0x16   : > { %s979_s2 = sld [smem:[#allocation7_spill]] (!%p318_p9)  ;;  %s620_s20 = sshll.u32 (!%p318_p9), %s349_s28, 3 }
  0x17   : > { %s980_s4 = sld [smem:[#allocation9_spill]] (!%p318_p9)  ;;  %s351_s25 = scalar_lea.vmem (!%p318_p9), [#allocation2], %s620_s20 }
  0x18   : > { %s626_s26 = sshll.u32 (!%p318_p9), %s822_s17, 3  ;;  %s511_s20 = scalar_lea.sflag (!%p318_p9), [#allocation3], %s349_s28 }
  0x19   : > { %v370_v0 = vld [vmem:[%s976_s1 + $0x18] sm:$0xff]  ;;  %v369_v1 = vld [vmem:[%s976_s1 + $0x10] sm:$0xff]  ;;  %v368_v4 = vld [vmem:[%s976_s1 + $0x8] sm:$0xff]  ;;  %s866_s21 = scalar_select %p358_p10, %s822_s17, 1  ;;  %vm375_vm0 = vcmask 261120   ;;  %vm412_vm1 = vcmask 523264  }
  0x1a   : > { %391 = vmatpush.msra.mxu0 %v370_v0  ;;  %v407_v2 = vld [vmem:[%s977_s3 + $0x38] sm:$0xff]  ;;  %v406_v3 = vld [vmem:[%s977_s3 + $0x30] sm:$0xff]  ;;  %v405_v5 = vld [vmem:[%s977_s3 + $0x28] sm:$0xff]  ;;  %v745_v22 = vmov 32.0   ;;  %s525_s11 = scalar_lea.hbm %s966_s9, %s626_s26  ;;  %s701_s17 = scalar_lea.hbm %s966_s9, 16 }
  0x1b   : > { %424 = vmatpush.msra.mxu1 %v407_v2  ;;  %v367_v6 = vld [vmem:[%s976_s1] sm:$0xff]  ;;  %s968_s29 = sshll.u32 %s866_s21, 3  ;;  %v403_v9 = vld [vmem:[%s977_s3 + $0x18] sm:$0xff]  ;;  %v402_v10 = vld [vmem:[%s977_s3 + $0x10] sm:$0xff]  ;;  %675 = vrcp.f32 %v745_v22  ;;  %s529_s18 = sshll.u32 %s525_s11, 4  ;;  %s530_s18 = int_to_ptr.hbm [resolvable:$true] %s529_s18 }
  0x1c   : > { %392 = vmatpush.msra.mxu0 %v369_v1  ;;  %s361_s12 = scalar_lea.vmem %s978_s0, %s968_s29  ;;  %v404_v7 = vld [vmem:[%s977_s3 + $0x20] sm:$0xff]  ;;  %v401_v11 = vld [vmem:[%s977_s3 + $0x8] sm:$0xff]  ;;  %s695_s29 = sshra.s32 %s530_s18, 4  ;;  %s696_s29 = int_to_ptr.hbm [resolvable:$true] %s695_s29 }
  0x1d   : > { %425 = vmatpush.msra.mxu1 %v406_v3  ;;  %v366_v8 = vld [vmem:[%s361_s12] sm:$0xff]  ;;  %s527_s12 = sshll.u32 %s351_s25, 4  ;;  %s697_s0 = scalar_lea.hbm %s696_s29, 8  ;;  %s528_s12 = int_to_ptr.vmem [resolvable:$true] %s527_s12 }
  0x1e   : > { %393 = vmatpush.msra.mxu0 %v368_v4  ;;  %v400_v12 = vld [vmem:[%s977_s3] sm:$0xff]  ;;  %p698_p11 = scmp.ne.s32.totalorder %s696_s29, %s697_s0  ;;  %p702_p0 = scmp.lt.s32.totalorder %s696_s29, %s966_s9 }
  0x1f   : > { %426 = vmatpush.msra.mxu1 %v405_v5  ;;  %v669_v13 = vld [vmem:[%s979_s2] ss:$0 sm:$0xff]  ;;  %p703_p1 = scmp.lt.s32.totalorder %s701_s17, %s697_s0 }
  0x20   : > { %394 = vmatpush.msra.mxu0 %v367_v6  ;;  %v670_v17 = vld [vmem:[%s980_s4] ss:$0 sm:$0xff]  ;;  %p699_p12 = pnand %p698_p11, %p839_p5 }
  0x21   : > { %623 = vmatmul.msk.f32.vlgmr.msra.gmra.mxu0 %vm375_vm0, %v366_v8  ;;  %427 = vmatpush.msra.mxu1 %v404_v7  ;;  %v676_v23 = vpop.eup %675  ;;  %v671_v43 = vld [vmem:[%s962_s5] ss:$0 sm:$0xff]  ;;  %p704_p2 = por %p703_p1, %p702_p0 }
  0x22   : > { %v443_v24 = vmul.f32 32.0, %v676_v23  ;;  %vm447_vm2 = vweird.f32 %v676_v23  ;;  %v672_v46 = vld [vmem:[%s963_s6] ss:$0 sm:$0xff]  ;;  %p700_p13 = pneg %p699_p12 }
  0x23   : > { %428 = vmatpush.msra.mxu1 %v403_v9 }
  0x24   : > { %v444_v25 = vsub.f32 1.0, %v443_v24  ;;  %p705_p3 = pnand %p704_p2, %p700_p13 }
  0x25   : > { %429 = vmatpush.msra.mxu1 %v402_v10 }
  0x26   : > { %v445_v26 = vmul.f32 %v676_v23, %v444_v25 }
  0x27   : > { %430 = vmatpush.msra.mxu1 %v401_v11 }
  0x28   : > { %v446_v27 = vadd.f32 %v676_v23, %v445_v26 }
  0x29   : > { %431 = vmatpush.msra.mxu1 %v400_v12 }
  0x2a   : > { %v448_v28 = vsel %vm447_vm2, %v676_v23, %v446_v27 }
  0x9e   : > { %v396_v14 = vpop.f32.mrf.mxu0 }
  0x9f   : > { %v397_v15 = vadd.f32 %v669_v13, %v396_v14 }
  0xa1   : > { %v399_v16 = vmax.f32 %v397_v15, 0.0 }
  0xa3   : > { %624 = vmatmul.msk.f32.vlgmr.msra.gmra.mxu1 %vm412_vm1, %v399_v16 }
 0x120   : > { %v433_v18 = vpop.f32.mrf.mxu1 }
 0x121   : > { %v434_v19 = vadd.f32 %v670_v17, %v433_v18 }
 0x123   : > { %v436_v20 = vadd.f32 %v434_v19, %v366_v8 }
 0x125   : > { %v439_v21 = vsel %vm375_vm0, %v436_v20, 0.0 }
 0x126   : > { %440 = vadd.xlane.f32.xlu0 %v439_v21 }
 0x199   : > { %v441_v29 = vpop.xlane.xlu0 %440 }
 0x19a   : > { %v449_v30 = vmul.f32 %v448_v28, %v441_v29 }
 0x19c   : > { %v450_v31 = vsub.f32 %v436_v20, %v449_v30 }
 0x19e   : > { %v451_v32 = vmul.f32 %v450_v31, %v450_v31 }
 0x1a0   : > { %v452_v33 = vsel %vm375_vm0, %v451_v32, 0.0 }
 0x1a1   : > { %453 = vadd.xlane.f32.xlu0 %v452_v33 }
 0x214   : > { %v454_v34 = vpop.xlane.xlu0 %453 }
 0x215   : > { %v455_v35 = vmul.f32 %v454_v34, %v448_v28 }
 0x217   : > { %v456_v36 = vadd.f32 1e-05, %v455_v35 }
 0x219   : > { %677 = vrsqrt.f32 %v456_v36  ;;  %vm463_vm4 = vweird.f32 %v456_v36 }
 0x21f   : > { %v678_v37 = vpop.eup %677 }
 0x220   : > { %v458_v38 = vmul.f32 %v678_v37, %v456_v36  ;;  %vm464_vm3 = vweird.f32 %v678_v37 }
 0x221   : > { %vm465_vm5 = vmor %vm463_vm4, %vm464_vm3 }
 0x222   : > { %v459_v39 = vmul.f32 %v678_v37, %v458_v38 }
 0x224   : > { %v460_v40 = vmul.f32 0.5, %v459_v39 }
 0x226   : > { %v461_v41 = vsub.f32 1.5, %v460_v40 }
 0x228   : > { %v462_v42 = vmul.f32 %v678_v37, %v461_v41 }
 0x22a   : > { %v466_v44 = vsel %vm465_vm5, %v678_v37, %v462_v42 }
 0x22b   : > { %v467_v45 = vmul.f32 %v466_v44, %v450_v31 }
 0x22d   : > { %v471_v47 = vmul.f32 %v671_v43, %v467_v45 }
 0x22f   : > { %v475_v48 = vadd.f32 %v672_v46, %v471_v47 }
 0x231   : > { %v479_v49 = vsel %vm375_vm0, %v475_v48, 0.0  ;;  %476 = vst.msk [vmem:[%s351_s25] sm:$0xff] %vm375_vm0, %v475_v48 }
 0x232   : > { %480 = vadd.xlane.f32.xlu1 %v479_v49 }
 0x2a5   : > { %v481_v50 = vpop.xlane.xlu1 %480 }
 0x2a6   : > { %v482_v51 = vmul.f32 %v481_v50, %v448_v28 }
 0x2a8   : > { %v483_v52 = vsub.f32 %v475_v48, %v482_v51 }
 0x2aa   : > { %v484_v53 = vmul.f32 %v483_v52, %v483_v52 }
 0x2ac   : > { %v485_v54 = vsel %vm375_vm0, %v484_v53, 0.0 }
 0x2ad   : > { %486 = vadd.xlane.f32.xlu1 %v485_v54 }
 0x2ae   : > { %708 = shalt.err (!%p705_p3)
}
 0x2af   : > { %629 = dma.vmem_to_hbm [thread:$0]  (%p839_p5), %s528_s12, 128, %s530_s18, %s511_s20   ;;  %v673_v0 = vld [vmem:[%s964_s7] ss:$0 sm:$0xff] }
 0x2b0   : > { %v674_v2 = vld [vmem:[%s965_s8] ss:$0 sm:$0xff]  ;;  %s981_s4 = sshll.u32 %s866_s21, 3 }
 0x2b1   : > { %s365_s28 = scalar_lea.vmem %s967_s10, %s981_s4 }
 0x320   : > { %v487_v55 = vpop.xlane.xlu1 %486 }
 0x321   : > { %v488_v56 = vmul.f32 %v487_v55, %v448_v28 }
 0x323   : > { %v489_v57 = vadd.f32 1e-05, %v488_v56 }
 0x325   : > { %679 = vrsqrt.f32 %v489_v57  ;;  %vm496_vm7 = vweird.f32 %v489_v57 }
 0x32b   : > { %v680_v58 = vpop.eup %679 }
 0x32c   : > { %v491_v59 = vmul.f32 %v680_v58, %v489_v57  ;;  %vm497_vm6 = vweird.f32 %v680_v58 }
 0x32d   : > { %vm498_vm8 = vmor %vm496_vm7, %vm497_vm6 }
 0x32e   : > { %v492_v60 = vmul.f32 %v680_v58, %v491_v59 }
 0x330   : > { %v493_v61 = vmul.f32 0.5, %v492_v60 }
 0x332   : > { %v494_v62 = vsub.f32 1.5, %v493_v61 }
 0x334   : > { %v495_v63 = vmul.f32 %v680_v58, %v494_v62 }
 0x336   : > { %v499_v1 = vsel %vm498_vm8, %v680_v58, %v495_v63 }
 0x337   : > { %v500_v3 = vmul.f32 %v499_v1, %v483_v52 }
 0x339   : > { %v504_v4 = vmul.f32 %v673_v0, %v500_v3 }
 0x33b   : > { %v508_v5 = vadd.f32 %v674_v2, %v504_v4 }
 0x33d   : > { %509 = vst.msk [vmem:[%s365_s28] sm:$0xff] %vm375_vm0, %v508_v5 }
 0x33e PF: > { %p635_p4 = scmp.ge.s32.totalorder %s743_s16, 2  ;;  %s544_s25 = sand.u32 1, %s731_s13  }
 0x33f   : > { %s545_s26 = scalar_lea.sflag [#allocation3], %s544_s25 }
 0x340   : > { %p632_p5 = pnand %p635_p4, %p843_p6 }
 0x342   : > { %p633_p7 = pneg %p632_p5 }
 0x344   : > { %726 = dma.done.wait (%p633_p7), %s545_s26, 128  }
 0x345   : > { %728 = vsyncadd (%p633_p7), %s545_s26, 4294967168  ;;  %p21_p8 = scmp.ge.s32.totalorder %s826_s19, 4   ;;  %s982_s13 = smov %s735_s14 }
 0x346   : > { %s983_s14 = smov %s739_s15  ;;  %s984_s15 = smov %s837_s22 }
 0x347   : > { %s985_s16 = smov %s826_s19  ;;  %23 = sbr.rel (!%p21_p8) target bundleno = 9 (0x9), region = 103 }
 0x34c   :  { %558 = vsyncpa [#allocation3], 1 }
 0x34d   :  { %560 = vsyncpa [#allocation3 + $0x1], 1 }

// kernel: transformer_decoder.10
= control target key start
LH: loop header
LB: loop body
LE: loop exit
PB: predicated region body
PF: predicated region fallthrough
CT: control target
= control target key end

     0   :  { %s1958_s0 = inlined_call_operand.vmem [shape: f32[2,8,32], index: 0, kind: input, shape index: {}]   ;;  %s1959_s1 = inlined_call_operand.vmem [shape: f32[2,8,32], index: 1, kind: input, shape index: {}]   ;;  %s1960_s2 = inlined_call_operand.vmem [shape: f32[2,16,32], index: 2, kind: input, shape index: {}]   ;;  %s1961_s3 = inlined_call_operand.vmem [shape: f32[2,16,32], index: 3, kind: input, shape index: {}]   ;;  %s1962_s4 = inlined_call_operand.vmem [shape: f32[32,32], index: 4, kind: input, shape index: {}]   ;;  %s1963_s5 = inlined_call_operand.hbm [shape: f32[1,32], index: 5, kind: input, shape index: {}]   ;;  %s1964_s6 = inlined_call_operand.vmem [shape: f32[32,32], index: 6, kind: input, shape index: {}]   ;;  %s1965_s7 = inlined_call_operand.hbm [shape: f32[1,32], index: 7, kind: input, shape index: {}]   ;;  %s1966_s8 = inlined_call_operand.vmem [shape: f32[32,32], index: 8, kind: input, shape index: {}]   ;;  %s1967_s9 = inlined_call_operand.hbm [shape: f32[1,32], index: 9, kind: input, shape index: {}]   ;;  %s1968_s10 = inlined_call_operand.vmem [shape: f32[32,32], index: 10, kind: input, shape index: {}]   ;;  %s1969_s11 = inlined_call_operand.hbm [shape: f32[1,32], index: 11, kind: input, shape index: {}]   ;;  %s1970_s12 = inlined_call_operand.hbm [shape: f32[1,32], index: 12, kind: input, shape index: {}]   ;;  %s1971_s13 = inlined_call_operand.hbm [shape: f32[1,32], index: 13, kind: input, shape index: {}]   ;;  %s1972_s14 = inlined_call_operand.vmem [shape: f32[2,8,32], index: 14, kind: output, shape index: {}]  }
   0x1   :  { %1973 = sst [smem:[#allocation16_spill]] %s1963_s5 }
   0x2   :  { %1974 = sst [smem:[#allocation17_spill]] %s1965_s7 }
   0x3   :  { %19 = vsyncpa [#allocation3], 0 }
   0x4   :  { %20 = vsyncpa [#allocation5], 0 }
   0x5   :  { %21 = vsyncpa [#allocation8], 0 }
   0x6   :  { %22 = vsyncpa [#allocation11], 0  ;;  %s1759_s29 = smov 0  }
   0x7 LB: > { %s1975_s7 = sld [smem:[#allocation17_spill]]  ;;  %s1768_s17 = sadd.s32 4294967295, %s1672_s29   ;;  %s1672_s29 = sphi %s1759_s29, %s28_s29  }
   0x8   : > { %p1305_p0 = scmp.ge.s32.totalorder %s1672_s29, 1  ;;  %p373_p1 = scmp.lt.s32.totalorder %s1672_s29, 3 }
   0x9   : > { %p1399_p2 = scmp.eq.s32.totalorder %s1768_s17, 0  ;;  %s1674_s19 = smov [#allocation4]  }
   0xa   : > { %p1773_p3 = pnand %p1305_p0, %p373_p1  ;;  %s405_s20 = sshll.u32 %s1674_s19, 4  ;;  %s406_s20 = int_to_ptr.vmem [resolvable:$true] %s405_s20 }
   0xb   : > { %s433_s23 = sshll.u32 %s1969_s11, 4  ;;  %s1977_s5 = sld [smem:[#allocation16_spill]]  ;;  %s434_s23 = int_to_ptr.hbm [resolvable:$true] %s433_s23 }
   0xc   : > { %p1380_p4 = pneg %p1773_p3  ;;  %s1675_s28 = smov [#allocation7]  }
   0xd   : > { %s403_s16 = sshll.u32 %s1975_s7, 4  ;;  %s435_s30 = sshll.u32 %s1675_s28, 4  ;;  %s404_s16 = int_to_ptr.hbm [resolvable:$true] %s403_s16  ;;  %s436_s30 = int_to_ptr.vmem [resolvable:$true] %s435_s30 }
   0xe   : > { %p1787_p5 = pnand %p1399_p2, %p1380_p4  ;;  %s1676_s15 = smov [#allocation2]  }
   0xf   : > { %s390_s19 = sshll.u32 %s1676_s15, 4  ;;  %s418_s24 = sshll.u32 %s1967_s9, 4  ;;  %s391_s19 = int_to_ptr.vmem [resolvable:$true] %s390_s19  ;;  %s419_s24 = int_to_ptr.hbm [resolvable:$true] %s418_s24 }
  0x10   : > { %1386 = dma.hbm_to_vmem [thread:$0]  (!%p1787_p5), %s404_s16, 16, %s406_s20, [#allocation5]  }
  0x11   : > { %s388_s26 = sshll.u32 %s1977_s5, 4  ;;  %s445_s5 = sshll.u32 %s1970_s12, 4  ;;  %s389_s26 = int_to_ptr.hbm [resolvable:$true] %s388_s26  ;;  %s446_s5 = int_to_ptr.hbm [resolvable:$true] %s445_s5 }
  0x12   : > { %1392 = dma.hbm_to_vmem [thread:$0]  (!%p1787_p5), %s434_s23, 16, %s436_s30, [#allocation8]  }
  0x13   : > { %1383 = dma.hbm_to_vmem [thread:$0]  (!%p1787_p5), %s389_s26, 16, %s391_s19, [#allocation3]  }
  0x14   : > { %s1677_s7 = smov [#allocation6]   ;;  %s1678_s20 = smov [#allocation9]  }
  0x15   : > { %s420_s16 = sshll.u32 %s1677_s7, 4  ;;  %s447_s23 = sshll.u32 %s1678_s20, 4  ;;  %s421_s16 = int_to_ptr.vmem [resolvable:$true] %s420_s16  ;;  %s448_s23 = int_to_ptr.vmem [resolvable:$true] %s447_s23 }
  0x16   : > { %1389 = dma.hbm_to_vmem [thread:$0]  (!%p1787_p5), %s419_s24, 16, %s421_s16, [#allocation5]  }
  0x17   : > { %s457_s21 = sshll.u32 %s1971_s13, 4  ;;  %s1679_s26 = smov [#allocation10]   ;;  %s458_s21 = int_to_ptr.hbm [resolvable:$true] %s457_s21 }
  0x18   : > { %1395 = dma.hbm_to_vmem [thread:$0]  (!%p1787_p5), %s446_s5, 16, %s448_s23, [#allocation8]  }
  0x19   : > { %s459_s19 = sshll.u32 %s1679_s26, 4  ;;  %502 = sbr.rel (%p1773_p3) target bundleno = 1401 (0x579), region = 76  ;;  %s460_s19 = int_to_ptr.vmem [resolvable:$true] %s459_s19 }
  0x1a   : > { %1398 = dma.hbm_to_vmem [thread:$0]  (!%p1787_p5), %s458_s21, 16, %s460_s19, [#allocation11]  }
  0x1e   : > { %1655 = dma.done.wait (%p1399_p2), [#allocation3], 16  }
  0x1f   : > { %1657 = vsyncadd (%p1399_p2), [#allocation3], 4294967280 }
  0x20   : > { %1659 = dma.done.wait (%p1399_p2), [#allocation5], 32  }
  0x21   : > { %1661 = vsyncadd (%p1399_p2), [#allocation5], 4294967264 }
  0x22   : > { %1663 = dma.done.wait (%p1399_p2), [#allocation8], 32  }
  0x23   : > { %1665 = vsyncadd (%p1399_p2), [#allocation8], 4294967264 }
  0x24   : > { %1667 = dma.done.wait (%p1399_p2), [#allocation11], 16  }
  0x25   : > { %1669 = vsyncadd (%p1399_p2), [#allocation11], 4294967280  ;;  %p586_p6 = scmp.lt.s32.totalorder %s1768_s17, 1  ;;  %v652_v0 = vld [vmem:[%s1964_s6 + $0x18] sm:$0xff]  ;;  %v651_v1 = vld [vmem:[%s1964_s6 + $0x10] sm:$0xff]  ;;  %vm625_vm0 = vcmask 261120  }
  0x26   : > { %675 = vmatpush.msra.mxu1 %v652_v0  ;;  %v650_v4 = vld [vmem:[%s1964_s6 + $0x8] sm:$0xff]  ;;  %v620_v5 = vld [vmem:[%s1962_s4 + $0x18] sm:$0xff]  ;;  %v649_v6 = vld [vmem:[%s1964_s6] sm:$0xff]  ;;  %vm727_vm1 = vcmask 64512   ;;  %s1680_s23 = smov 104   ;;  %s1681_s30 = smov 120  }
  0x27   : > { %s1980_s17 = smov (!%p586_p6, %s1768_s17), 1  ;;  %641 = vmatpush.msra.mxu0 %v620_v5  ;;  %v619_v7 = vld [vmem:[%s1962_s4 + $0x10] sm:$0xff]  ;;  %v618_v8 = vld [vmem:[%s1962_s4 + $0x8] sm:$0xff]  ;;  %v617_v12 = vld [vmem:[%s1962_s4] sm:$0xff]  ;;  %vm758_vm2 = vcmask 130048  }
  0x28   : > { %s1354_s5 = sshll.u32 %s1980_s17, 4  ;;  %s1832_s7 = sshll.u32 %s1980_s17, 3  ;;  %676 = vmatpush.msra.mxu1 %v651_v1  ;;  %v689_v18 = vld [vmem:[%s1966_s8 + $0x18] sm:$0xff]  ;;  %v688_v19 = vld [vmem:[%s1966_s8 + $0x10] sm:$0xff]  ;;  %v687_v20 = vld [vmem:[%s1966_s8 + $0x8] sm:$0xff] }
  0x29   : > { %s598_s22 = scalar_lea.vmem %s1960_s2, %s1354_s5  ;;  %s603_s28 = scalar_lea.vmem %s1961_s3, %s1354_s5  ;;  %642 = vmatpush.msra.mxu0 %v619_v7  ;;  %712 = vmatpush.msra.mxu2 %v689_v18  ;;  %v1444_v21 = vld [vmem:[#allocation4] ss:$0 sm:$0xff]  ;;  %v1445_v26 = vld [vmem:[#allocation2] ss:$0 sm:$0xff]  ;;  %v1446_v39 = vld [vmem:[#allocation6] ss:$0 sm:$0xff] }
  0x2a   : > { %v611_v2 = vld [vmem:[%s598_s22] sm:$0xff]  ;;  %s589_s21 = scalar_lea.vmem %s1958_s0, %s1832_s7  ;;  %s593_s18 = scalar_lea.vmem %s1959_s1, %s1832_s7  ;;  %677 = vmatpush.msra.mxu1 %v650_v4  ;;  %v612_v14 = vld [vmem:[%s598_s22 + $0x8] sm:$0xff] }
  0x2b   : > { %v613_v3 = vld [vmem:[%s603_s28] sm:$0xff]  ;;  %643 = vmatpush.msra.mxu0 %v618_v8  ;;  %v614_v15 = vld [vmem:[%s603_s28 + $0x8] sm:$0xff]  ;;  %713 = vmatpush.msra.mxu2 %v688_v19  ;;  %s1682_s17 = smov 112   ;;  %s607_s25 = scalar_lea.vmem %s1972_s14, %s1832_s7 }
  0x2c   : > { %v615_v9 = vadd.f32 %v613_v3, %v611_v2  ;;  %v1869_v10 = vld [vmem:[%s589_s21] sm:$0xff]  ;;  %678 = vmatpush.msra.mxu1 %v649_v6  ;;  %v616_v16 = vadd.f32 %v614_v15, %v612_v14 }
  0x2d   : > { %v609_v11 = vld [vmem:[%s593_s18] sm:$0xff]  ;;  %644 = vmatpush.msra.mxu0 %v617_v12  ;;  %714 = vmatpush.msra.mxu2 %v687_v20 }
  0x2e   : > { %v610_v13 = vadd.f32 %v609_v11, %v1869_v10  ;;  %1328 = vmatmul.msk.f32.vlgmr.msra.gmra.mxu1 %vm625_vm0, %v615_v9  ;;  %v686_v24 = vld [vmem:[%s1966_s8] sm:$0xff] }
  0x2f   : > { %v723_v25 = vld [vmem:[%s1968_s10] sm:$0xff]  ;;  %715 = vmatpush.msra.mxu2 %v686_v24 }
  0x30   : > { %1327 = vmatmul.msk.f32.vlgmr.msra.gmra.mxu0 %vm625_vm0, %v610_v13  ;;  %1330 = vmatmul.msk.f32.vlgmr.msra.gmra.mxu2 %vm625_vm0, %v611_v2 }
  0x31   : > { %909 = vmatpush.msrb.mxu2 %v723_v25 }
  0x36   : > { %1329 = vmatmul.msk.f32.gmra.mxu1 %vm625_vm0, %v616_v16 }
  0x38   : > { %1331 = vmatmul.msk.f32.gmra.mxu2 %vm625_vm0, %v612_v14 }
  0xab   : > { %v680_v17 = vpop.f32.mrf.mxu1 }
  0xac   : > { %v681_v28 = vadd.f32 %v1444_v21, %v680_v17 }
  0xad   : > { %v646_v27 = vpop.f32.mrf.mxu0 }
  0xae   : > { %v647_v29 = vadd.f32 %v1445_v26, %v646_v27 }
  0xb3   : > { %v683_v22 = vpop.f32.mrf.mxu1  ;;  %v717_v38 = vpop.f32.mrf.mxu2 }
  0xb4   : > { %v684_v23 = vadd.f32 %v1444_v21, %v683_v22  ;;  %v718_v41 = vadd.f32 %v1446_v39, %v717_v38 }
  0xb6   : > { %1015 = vrot.lane.b32.xlu2 %v684_v23, %s1680_s23  ;;  %797 = vrot.lane.b32.xlu1 %v684_v23, %s1681_s30 }
  0xb7   : > { %1332 = vmatpush.xpose.msk.msra.mxu3 %vm727_vm1, %v684_v23 }
  0xbb   : > { %1333 = vmatpush.xpose.msk.msra.mxu3 %vm727_vm1, %v681_v28  ;;  %v720_v40 = vpop.f32.mrf.mxu2 }
  0xbc   : > { %v721_v42 = vadd.f32 %v1446_v39, %v720_v40 }
  0xbe   : > { %1334 = vmatmul.msk.f32.vlgmr.msra.gmra.mxu3 %vm727_vm1, %v647_v29  ;;  %795 = vrot.lane.b32.xlu1 %v681_v28, %s1681_s30  ;;  %v1429_v43 = vpack.i.bf16 %v718_v41, %v721_v42 }
  0xbf   : > { %793 = vrot.lane.b32.xlu2 %v647_v29, %s1681_s30  ;;  %785 = vmatpush.msrb.mxu0 %v721_v42 }
  0xc1   : > { %786 = vmatpush.msrb.mxu0 %v718_v41 }
  0xc6   : > { %1013 = vrot.lane.b32.xlu1 %v681_v28, %s1680_s23 }
  0xc7   : > { %1011 = vrot.lane.b32.xlu2 %v647_v29, %s1680_s23 }
  0xce   : > { %916 = vrot.lane.b32.xlu1 %v681_v28, %s1682_s17  ;;  %v724_v28 = vld [vmem:[%s1968_s10 + $0x8] sm:$0xff] }
  0xcf   : > { %914 = vrot.lane.b32.xlu2 %v647_v29, %s1682_s17  ;;  %886 = vmatpush.msrb.mxu1 %v724_v28  ;;  %v726_v29 = vld [vmem:[%s1968_s10 + $0x18] sm:$0xff] }
 0x110   : > { %v1016_v30 = vpop.permute.xlu2 %1015 }
 0x111   : > { %1347 = vmatpush.xpose.msk.msra.mxu2 %vm727_vm1, %v1016_v30  ;;  %v725_v30 = vld [vmem:[%s1968_s10 + $0x10] sm:$0xff] }
 0x112   : > { %1005 = vmatpush.msra.mxu1 %v725_v30 }
 0x119   : > { %v794_v33 = vpop.permute.xlu2 %793 }
 0x121   : > { %v1012_v58 = vpop.permute.xlu2 %1011 }
 0x128   : > { %v798_v31 = vpop.permute.xlu1 %797 }
 0x129   : > { %1336 = vmatpush.xpose.msk.msrb.mxu3 %vm727_vm1, %v798_v31  ;;  %v915_v62 = vpop.permute.xlu2 %914 }
 0x130   : > { %v796_v32 = vpop.permute.xlu1 %795 }
 0x131   : > { %1337 = vmatpush.xpose.msk.msrb.mxu3 %vm727_vm1, %v796_v32 }
 0x134   : > { %1338 = vmatmul.msk.f32.vlgmr.msrb.gmra.mxu3 %vm727_vm1, %v794_v33 }
 0x138   : > { %v1014_v34 = vpop.permute.xlu1 %1013 }
 0x139   : > { %1348 = vmatpush.xpose.msk.msra.mxu2 %vm727_vm1, %v1014_v34 }
 0x140   : > { %v917_v53 = vpop.permute.xlu1 %916 }
 0x141   : > { %v754_v35 = vpop.f32.mrf.mxu3 }
 0x142   : > { %v757_v36 = vmul.f32 0.35355338, %v754_v35 }
 0x144   : > { %v759_v37 = vsel %vm758_vm2, %v757_v36, -inf }
 0x145   : > { %760 = vmax.xlane.f32.xlu0 %v759_v37 }
 0x1b7   : > { %v822_v44 = vpop.f32.mrf.mxu3 }
 0x1b8   : > { %v825_v45 = vmul.f32 0.35355338, %v822_v44  ;;  %v761_v46 = vpop.xlane.xlu0 %760 }
 0x1b9   : > { %v762_v47 = vsub.f32 %v757_v36, %v761_v46 }
 0x1ba   : > { %v826_v48 = vsel %vm758_vm2, %v825_v45, -inf }
 0x1bb   : > { %v763_v49 = vmul.f32 1.442695, %v762_v47  ;;  %827 = vmax.xlane.f32.xlu1 %v826_v48 }
 0x1bd   : > { %1450 = vpow2.f32 %v763_v49  ;;  %v1447_v49 = vld [vmem:[#allocation7] ss:$0 sm:$0xff] }
 0x1c3   : > { %v1451_v50 = vpop.eup %1450 }
 0x1c4   : > { %1335 = vmatmul.msk.f32.vlgmr.msrb.gmra.mxu0 %vm758_vm2, %v1451_v50  ;;  %v765_v51 = vsel %vm758_vm2, %v1451_v50, 0.0 }
 0x1c5   : > { %766 = vadd.xlane.f32.xlu0 %v765_v51 }
 0x1d4   : > { %1435 = vrot.lane.b32.xlu1 %v1429_v43, %s1680_s23 }
 0x1d9   : > { %918 = vrot.lane.b32.xlu0 %v684_v23, %s1682_s17 }
 0x22e   : > { %v828_v57 = vpop.xlane.xlu1 %827 }
 0x22f   : > { %v829_v7 = vsub.f32 %v825_v45, %v828_v57 }
 0x231   : > { %v830_v8 = vmul.f32 1.442695, %v829_v7 }
 0x238   : > { %v767_v52 = vpop.xlane.xlu0 %766 }
 0x239   : > { %1452 = vrcp.f32 %v767_v52 }
 0x23a   : > { %1454 = vpow2.f32 %v830_v8 }
 0x23f   : > { %v1453_v54 = vpop.eup %1452 }
 0x240   : > { %v1455_v9 = vpop.eup %1454 }
 0x241   : > { %v788_v55 = vpop.f32.mrf.mxu0  ;;  %v832_v11 = vsel %vm758_vm2, %v1455_v9, 0.0 }
 0x242   : > { %v792_v56 = vmul.f32 %v1453_v54, %v788_v55 }
 0x244   : > { %1341 = vmatmul.msk.f32.vlgmr.msrb.gmra.mxu2 %vm727_vm1, %v792_v56 }
 0x246   : > { %v1436_v60 = vpop.permute.xlu1 %1435 }
 0x247   : > { %v1437_v61 = vunpack.i.l.bf16 %v1436_v60  ;;  %v1438_v63 = vunpack.i.h.bf16 %v1436_v60 }
 0x24b   : > { %v919_v59 = vpop.permute.xlu0 %918 }
 0x24c   : > { %1342 = vmatpush.xpose.msk.msra.mxu3 %vm727_vm1, %v919_v59  ;;  %1349 = vmatmul.msk.f32.vlgmr.msra.gmra.mxu2 %vm727_vm1, %v1012_v58 }
 0x250   : > { %1343 = vmatpush.xpose.msk.msra.mxu3 %vm727_vm1, %v917_v53  ;;  %v1683_v53 = vmov 32.0  }
 0x253   : > { %1344 = vmatmul.msk.f32.vlgmr.msra.gmra.mxu3 %vm727_vm1, %v915_v62 }
 0x254   : > { %1076 = vmatpush.msrb.mxu3 %v1437_v61 }
 0x256   : > { %1077 = vmatpush.msrb.mxu3 %v1438_v63 }
 0x2c7   : > { %v1922_v0 = vpop.f32.mrf.mxu2 }
 0x2cf   : > { %v1040_v1 = vpop.f32.mrf.mxu2 }
 0x2d0   : > { %v1043_v2 = vmul.f32 0.35355338, %v1040_v1 }
 0x2d2   : > { %v1044_v3 = vsel %vm758_vm2, %v1043_v2, -inf }
 0x2d3   : > { %1045 = vmax.xlane.f32.xlu2 %v1044_v3 }
 0x2d6   : > { %v943_v4 = vpop.f32.mrf.mxu3 }
 0x2d7   : > { %v946_v5 = vmul.f32 0.35355338, %v943_v4 }
 0x2d9   : > { %v947_v6 = vsel %vm758_vm2, %v946_v5, -inf }
 0x2da   : > { %948 = vmax.xlane.f32.xlu0 %v947_v6 }
 0x2eb   : > { %1430 = vrot.lane.b32.xlu2 %v1429_v43, %s1681_s30 }
 0x2ee   : > { %1440 = vrot.lane.b32.xlu0 %v1429_v43, %s1682_s17 }
 0x314   : > { %833 = vadd.xlane.f32.xlu2 %v832_v11 }
 0x346   : > { %v1046_v12 = vpop.xlane.xlu2 %1045 }
 0x347   : > { %v1047_v13 = vsub.f32 %v1043_v2, %v1046_v12  ;;  %v1449_v12 = vld [vmem:[#allocation10] ss:$0 sm:$0xff] }
 0x349   : > { %v1048_v14 = vmul.f32 1.442695, %v1047_v13 }
 0x34b   : > { %1456 = vpow2.f32 %v1048_v14 }
 0x34d   : > { %v949_v15 = vpop.xlane.xlu0 %948 }
 0x34e   : > { %v950_v16 = vsub.f32 %v946_v5, %v949_v15  ;;  %v1431_v17 = vpop.permute.xlu2 %1430 }
 0x34f   : > { %v1432_v18 = vunpack.i.l.bf16 %v1431_v17  ;;  %v1433_v21 = vunpack.i.h.bf16 %v1431_v17 }
 0x350   : > { %v951_v19 = vmul.f32 1.442695, %v950_v16 }
 0x351   : > { %v1457_v20 = vpop.eup %1456  ;;  %860 = vmatpush.msra.mxu0 %v1432_v18 }
 0x352   : > { %1458 = vpow2.f32 %v951_v19  ;;  %1350 = vmatmul.msk.f32.vlgmr.msrb.gmra.mxu3 %vm758_vm2, %v1457_v20  ;;  %v1050_v22 = vsel %vm758_vm2, %v1457_v20, 0.0 }
 0x353   : > { %1051 = vadd.xlane.f32.xlu1 %v1050_v22  ;;  %861 = vmatpush.msra.mxu0 %v1433_v21 }
 0x354   : > { %1339 = vmatmul.msk.f32.vlgmr.msra.gmra.mxu0 %vm758_vm2, %v1455_v9  ;;  %v1448_v9 = vld [vmem:[#allocation9] ss:$0 sm:$0xff] }
 0x358   : > { %v1459_v23 = vpop.eup %1458 }
 0x359   : > { %v953_v24 = vsel %vm758_vm2, %v1459_v23, 0.0 }
 0x35a   : > { %954 = vadd.xlane.f32.xlu0 %v953_v24 }
 0x360   : > { %v1441_v25 = vpop.permute.xlu0 %1440 }
 0x361   : > { %v1442_v26 = vunpack.i.l.bf16 %v1441_v25  ;;  %v1443_v27 = vunpack.i.h.bf16 %v1441_v25 }
 0x363   : > { %979 = vmatpush.msrb.mxu0 %v1442_v26 }
 0x365   : > { %980 = vmatpush.msrb.mxu0 %v1443_v27 }
 0x366   : > { %1345 = vmatmul.msk.f32.vlgmr.msrb.gmra.mxu0 %vm758_vm2, %v1459_v23 }
 0x367   : > { %1102 = vmatpush.msra.mxu0 %v726_v29 }
 0x387   : > { %v834_v31 = vpop.xlane.xlu2 %833 }
 0x388   : > { %1460 = vrcp.f32 %v834_v31 }
 0x38e   : > { %v1461_v33 = vpop.eup %1460 }
 0x3c6   : > { %v1052_v32 = vpop.xlane.xlu1 %1051 }
 0x3c7   : > { %1462 = vrcp.f32 %v1052_v32 }
 0x3cd   : > { %v1463_v36 = vpop.eup %1462  ;;  %v955_v39 = vpop.xlane.xlu0 %954 }
 0x3ce   : > { %1464 = vrcp.f32 %v955_v39 }
 0x3cf   : > { %1466 = vrcp.f32 %v1683_v53 }
 0x3d1   : > { %v863_v34 = vpop.f32.mrf.mxu0 }
 0x3d2   : > { %v867_v35 = vmul.f32 %v1461_v33, %v863_v34 }
 0x3d4   : > { %1340 = vmatmul.msk.f32.vlgmr.msrb.gmra.mxu1 %vm727_vm1, %v867_v35  ;;  %v1465_v40 = vpop.eup %1464 }
 0x3d5   : > { %v1079_v37 = vpop.f32.mrf.mxu3  ;;  %v1467_v54 = vpop.eup %1466 }
 0x3d6   : > { %v1083_v38 = vmul.f32 %v1463_v36, %v1079_v37  ;;  %v1120_v55 = vmul.f32 32.0, %v1467_v54  ;;  %vm1124_vm3 = vweird.f32 %v1467_v54 }
 0x3d8   : > { %1351 = vmatmul.msk.f32.vlgmr.msra.gmra.mxu0 %vm727_vm1, %v1083_v38  ;;  %v1121_v56 = vsub.f32 1.0, %v1120_v55 }
 0x3da   : > { %v1122_v57 = vmul.f32 %v1467_v54, %v1121_v56 }
 0x3dc   : > { %v1123_v58 = vadd.f32 %v1467_v54, %v1122_v57 }
 0x3de   : > { %v1125_v59 = vsel %vm1124_vm3, %v1467_v54, %v1123_v58 }
 0x3e3   : > { %v982_v41 = vpop.f32.mrf.mxu0 }
 0x3e4   : > { %v986_v42 = vmul.f32 %v1465_v40, %v982_v41 }
 0x3e6   : > { %1346 = vmatmul.msk.f32.vlgmr.msra.gmra.mxu1 %vm727_vm1, %v986_v42 }
 0x451   : > { %v888_v43 = vpop.f32.mrf.mxu1 }
 0x452   : > { %v912_v44 = vadd.f32 %v1922_v0, %v888_v43 }
 0x455   : > { %v1104_v47 = vpop.f32.mrf.mxu0 }
 0x463   : > { %v1007_v45 = vpop.f32.mrf.mxu1 }
 0x464   : > { %v1010_v46 = vadd.f32 %v1007_v45, %v912_v44 }
 0x466   : > { %v1107_v48 = vadd.f32 %v1104_v47, %v1010_v46 }
 0x468   : > { %v1108_v50 = vadd.f32 %v1107_v48, %v1869_v10 }
 0x46a   : > { %v1113_v51 = vadd.f32 %v1447_v49, %v1108_v50 }
 0x46c   : > { %v1116_v52 = vsel %vm625_vm0, %v1113_v51, 0.0 }
 0x46d   : > { %1117 = vadd.xlane.f32.xlu2 %v1116_v52 }
 0x4e0   : > { %v1118_v60 = vpop.xlane.xlu2 %1117 }
 0x4e1   : > { %v1126_v61 = vmul.f32 %v1125_v59, %v1118_v60 }
 0x4e3   : > { %v1127_v62 = vsub.f32 %v1113_v51, %v1126_v61 }
 0x4e5   : > { %v1128_v63 = vmul.f32 %v1127_v62, %v1127_v62 }
 0x4e7   : > { %v1129_v0 = vsel %vm625_vm0, %v1128_v63, 0.0 }
 0x4e8   : > { %1130 = vadd.xlane.f32.xlu0 %v1129_v0 }
 0x55b   : > { %v1131_v10 = vpop.xlane.xlu0 %1130 }
 0x55c   : > { %v1132_v1 = vmul.f32 %v1131_v10, %v1125_v59 }
 0x55e   : > { %v1133_v2 = vadd.f32 1e-05, %v1132_v1 }
 0x560   : > { %1468 = vrsqrt.f32 %v1133_v2  ;;  %vm1140_vm5 = vweird.f32 %v1133_v2 }
 0x566   : > { %v1469_v3 = vpop.eup %1468 }
 0x567   : > { %v1135_v4 = vmul.f32 %v1469_v3, %v1133_v2  ;;  %vm1141_vm4 = vweird.f32 %v1469_v3 }
 0x568   : > { %vm1142_vm6 = vmor %vm1140_vm5, %vm1141_vm4 }
 0x569   : > { %v1136_v5 = vmul.f32 %v1469_v3, %v1135_v4 }
 0x56b   : > { %v1137_v6 = vmul.f32 0.5, %v1136_v5 }
 0x56d   : > { %v1138_v7 = vsub.f32 1.5, %v1137_v6 }
 0x56f   : > { %v1139_v8 = vmul.f32 %v1469_v3, %v1138_v7 }
 0x571   : > { %v1143_v11 = vsel %vm1142_vm6, %v1469_v3, %v1139_v8 }
 0x572   : > { %v1144_v13 = vmul.f32 %v1143_v11, %v1127_v62 }
 0x574   : > { %v1148_v14 = vmul.f32 %v1448_v9, %v1144_v13 }
 0x576   : > { %v1152_v15 = vadd.f32 %v1449_v12, %v1148_v14 }
 0x578   : > { %1153 = vst.msk [vmem:[%s607_s25] sm:$0xff] %vm625_vm0, %v1152_v15 }
 0x579 PF: > { %s28_s29 = sadd.s32 1, %s1672_s29  }
 0x57a   : > { %p25_p7 = scmp.ge.s32.totalorder %s28_s29, 4  }
 0x57c   :  { %27 = sbr.rel (!%p25_p7) target bundleno = 7 (0x7), region = 140 }
 0x581   :  { %1173 = vsyncpa [#allocation3], 1 }
 0x582   :  { %1175 = vsyncpa [#allocation3 + $0x1], 1 }
 0x583   :  { %1176 = vsyncpa [#allocation5], 1 }
 0x584   :  { %1177 = vsyncpa [#allocation8], 1 }
 0x585   :  { %1178 = vsyncpa [#allocation11], 1 }

</bundles_post_ra>
